<compile_context>
chip_gen: v7x
topology: tpu7x:2x2x1
jax: 0.10.0
libtpu: 0.0.40
codegen_flags: <defaults>
</compile_context>

<pallas_src>
import functools

import numpy as np
import jax
import jax.numpy as jnp
from jax.experimental import pallas as pl
from jax.experimental.pallas import tpu as pltpu


# ----------------------------------------------------------------------------
# Hardware / tiling helpers
# ----------------------------------------------------------------------------
def _vmem_capacity_bytes(default=64 * 2**20):
    """Physical VMEM per TensorCore; conservative 64 MiB (v7x) fallback."""
    try:
        info = pltpu.get_tpu_info()
        cap = int(getattr(info, "vmem_capacity_bytes", 0) or 0)
        if cap > 0:
            return cap
    except Exception:
        pass
    return default


def _vmem_limit(block_bytes, cap):
    """Compiler VMEM limit: real footprint + ~25% headroom, capped at 3/4 of
    the physical VMEM of this generation (no fixed 32/48 MiB constants)."""
    want = block_bytes * 5 // 4 + (2 << 20)
    return int(min(cap * 3 // 4, max(8 << 20, want)))


def _largest_divisor_tile(total, unit, max_tile):
    """Largest multiple of `unit` dividing `total` that is <= max_tile.
    Falls back to the full extent when `total` is not a multiple of `unit`
    (a full-extent block is always a legal Mosaic block shape)."""
    if total % unit != 0:
        return total
    best = unit
    t = unit
    limit = min(total, max(max_tile, unit))
    while t <= limit:
        if total % t == 0:
            best = t
        t += unit
    return best


def _pick_fused_tiling(H2, *, K, W2, H, W, C, HW, x_bytes, o_bytes, cap):
    """Choose (n_chunks, t_h2) for the fused kernel: footprint under ~cap/3,
    and two parallel H2 chunks so a 2-TC chip is busy even at N == 1."""
    fixed = (2 * C * HW * x_bytes          # input block, double-buffered
             + K * HW * 4                  # logits scratch (persistent)
             + (C + K) * HW * 4            # f32 intermediates (y, relayout)
             + K * C * 4 + W * W2 * 4 + 4 * C * 4 + K * 4)
    per_row = (2 * K * W2 * o_bytes        # output block, double-buffered
               + 2 * H * 4                 # A_h tile, double-buffered
               + K * (2 * W + W2) * 4)     # t1 / t1' / t2 temporaries
    budget = max(cap // 3 - fixed, 8 * per_row)
    max_rows = max(8, budget // per_row)
    if H2 % 16 == 0:
        half = H2 // 2
        return 2, _largest_divisor_tile(half, 8, min(max_rows, half))
    if H2 % 8 == 0:
        return 1, _largest_divisor_tile(H2, 8, min(max_rows, H2))
    # Rare odd output heights: single full-extent block (legal, may be large).
    return 1, H2


def _fused_block_bytes(*, K, W2, H, W, C, HW, t_h2, x_bytes, o_bytes):
    return (2 * C * HW * x_bytes
            + K * HW * 4
            + (C + K) * HW * 4
            + K * C * 4 + W * W2 * 4 + 4 * C * 4 + K * 4
            + t_h2 * (2 * K * W2 * o_bytes + 2 * H * 4
                      + K * (2 * W + W2) * 4))


def _pick_head_tile(HW, C, K, x_bytes, cap):
    per_col = 2 * C * x_bytes + 2 * K * 4 + (C + K) * 4
    budget = max(cap // 3, 256 * per_col)
    max_cols = max(128, budget // per_col)
    if HW % 128 == 0 and HW >= 256:
        max_cols = min(max_cols, HW // 2)   # >= 2 steps for the v7x core split
    return _largest_divisor_tile(HW, 128, max_cols)


def _pick_up_tile(H2, K, W2, H, W, o_bytes, cap):
    per_row = 2 * K * W2 * o_bytes + 2 * H * 4 + K * (H + W + W2) * 4
    budget = max(cap // 3, 16 * per_row)
    max_rows = max(8, budget // per_row)
    if H2 % 8 == 0 and H2 >= 16:
        max_rows = min(max_rows, H2 // 2)   # >= 2 steps for the v7x core split
    return _largest_divisor_tile(H2, 8, max_rows)


# ----------------------------------------------------------------------------
# PRIMARY: fused head + bilinear upsample kernel
#   grid = (N, n_chunks, H2_tiles_per_chunk), semantics (parallel, parallel,
#   arbitrary). Scratch `logits_sc` [K, H*W] persists across the arbitrary
#   axis and is recomputed at the first tile of each (image, chunk).
# ----------------------------------------------------------------------------
def fused_head_upsample_kernel(x_ref, scale_ref, shift_ref, w_ref, b_ref,
                               ah_ref, awt_ref, o_ref, logits_sc, *,
                               H, W, mxu_dtype):
    K = w_ref.shape[0]
    t_h2 = ah_ref.shape[0]
    W2 = awt_ref.shape[1]

    # ---- head (folded dw-conv+BN affine -> ReLU -> conv_seg), once per chunk
    @pl.when(pl.program_id(2) == 0)
    def _():
        x = x_ref[...].astype(jnp.float32)           # bf16/f32 HBM -> f32 VPU
        y = jnp.maximum(x * scale_ref[...] + shift_ref[...], 0.0)
        logits_sc[...] = (
            jnp.dot(w_ref[...].astype(mxu_dtype), y.astype(mxu_dtype),
                    preferred_element_type=jnp.float32) + b_ref[...])

    # ---- bilinear upsample of this tile of output rows
    # (Dropout2d is identity at inference.)
    logits3 = logits_sc[...].reshape(K, H, W)
    # Relayout [K,H,W] -> [H, K*W] so the H-pass is ONE merged MXU matmul
    # (no K-fold broadcast of A_h, no K tiny batched matmuls).
    x_hkw = pltpu.einshape("khw->hkw", logits3).reshape(H, K * W)
    t1 = jnp.dot(ah_ref[...].astype(mxu_dtype), x_hkw.astype(mxu_dtype),
                 preferred_element_type=jnp.float32)              # [t_h2, K*W]
    t1 = pltpu.einshape("ykw->kyw", t1.reshape(t_h2, K, W))        # [K, t_h2, W]
    t2 = jnp.dot(t1.reshape(K * t_h2, W).astype(mxu_dtype),
                 awt_ref[...].astype(mxu_dtype),
                 preferred_element_type=jnp.float32)              # [K*t_h2, W2]
    o_ref[...] = t2.reshape(K, t_h2, W2).astype(o_ref.dtype)


def run_fused(x_flat, scale, shift, w_kc, b_k, a_h, a_wt, *, n_chunks, t_h2,
              H, W, out_dtype, mxu_dtype, cap):
    N, C, HW = x_flat.shape
    K = w_kc.shape[0]
    H2, W2 = a_h.shape[0], a_wt.shape[1]
    tiles = H2 // (n_chunks * t_h2)
    block_bytes = _fused_block_bytes(
        K=K, W2=W2, H=H, W=W, C=C, HW=HW, t_h2=t_h2,
        x_bytes=x_flat.dtype.itemsize, o_bytes=np.dtype(out_dtype).itemsize)
    kernel = functools.partial(fused_head_upsample_kernel, H=H, W=W,
                               mxu_dtype=mxu_dtype)
    # NOTE: pl.Buffered(3) on the x spec can hide exposed input DMA on v7x if
    # a profile shows it; left at the default depth here.
    return pl.pallas_call(
        kernel,
        out_shape=jax.ShapeDtypeStruct((N, K, H2, W2), out_dtype),
        grid_spec=pltpu.PrefetchScalarGridSpec(
            num_scalar_prefetch=0,
            grid=(N, n_chunks, tiles),
            in_specs=[
                pl.BlockSpec((pl.Squeezed(), C, HW), lambda n, c, j: (n, 0, 0)),
                pl.BlockSpec((C, 1), lambda n, c, j: (0, 0)),
                pl.BlockSpec((C, 1), lambda n, c, j: (0, 0)),
                pl.BlockSpec((K, C), lambda n, c, j: (0, 0)),
                pl.BlockSpec((K, 1), lambda n, c, j: (0, 0)),
                pl.BlockSpec((t_h2, H), lambda n, c, j: (c * tiles + j, 0)),
                pl.BlockSpec((W, W2), lambda n, c, j: (0, 0)),
            ],
            out_specs=pl.BlockSpec((pl.Squeezed(), K, t_h2, W2),
                                   lambda n, c, j: (n, 0, c * tiles + j, 0)),
            scratch_shapes=[pltpu.VMEM((K, HW), jnp.float32)],
        ),
        compiler_params=pltpu.CompilerParams(
            dimension_semantics=("parallel", "parallel", "arbitrary"),
            vmem_limit_bytes=_vmem_limit(block_bytes, cap)),
    )(x_flat, scale, shift, w_kc, b_k, a_h, a_wt)


# ----------------------------------------------------------------------------
# FALLBACK: previously-validated two-kernel pipeline (head, then upsample).
# ----------------------------------------------------------------------------
def head_kernel(x_ref, scale_ref, shift_ref, w_ref, b_ref, o_ref, *, mxu_dtype):
    x = x_ref[...].astype(jnp.float32)
    y = jnp.maximum(x * scale_ref[...] + shift_ref[...], 0.0)
    logits = jnp.dot(w_ref[...].astype(mxu_dtype), y.astype(mxu_dtype),
                     preferred_element_type=jnp.float32)
    o_ref[...] = (logits + b_ref[...]).astype(o_ref.dtype)


def run_head(x_flat, scale, shift, w_kc, b_k, *, t_hw, mxu_dtype, cap):
    N, C, HW = x_flat.shape
    K = w_kc.shape[0]
    block_bytes = (2 * C * t_hw * x_flat.dtype.itemsize
                   + 2 * K * t_hw * 4 + (C + K) * t_hw * 4
                   + K * C * 4 + 2 * C * 4 + K * 4)
    kernel = functools.partial(head_kernel, mxu_dtype=mxu_dtype)
    return pl.pallas_call(
        kernel,
        out_shape=jax.ShapeDtypeStruct((N, K, HW), jnp.float32),
        grid_spec=pltpu.PrefetchScalarGridSpec(
            num_scalar_prefetch=0,
            grid=(N, HW // t_hw),
            in_specs=[
                pl.BlockSpec((pl.Squeezed(), C, t_hw), lambda n, j: (n, 0, j)),
                pl.BlockSpec((C, 1), lambda n, j: (0, 0)),
                pl.BlockSpec((C, 1), lambda n, j: (0, 0)),
                pl.BlockSpec((K, C), lambda n, j: (0, 0)),
                pl.BlockSpec((K, 1), lambda n, j: (0, 0)),
            ],
            out_specs=pl.BlockSpec((pl.Squeezed(), K, t_hw),
                                   lambda n, j: (n, 0, j)),
        ),
        compiler_params=pltpu.CompilerParams(
            dimension_semantics=("parallel", "parallel"),
            vmem_limit_bytes=_vmem_limit(block_bytes, cap)),
    )(x_flat, scale, shift, w_kc, b_k)


def upsample_kernel(x_ref, ah_ref, awt_ref, o_ref, *, mxu_dtype):
    K, H, W = x_ref.shape
    t_h2 = ah_ref.shape[0]
    W2 = awt_ref.shape[1]
    ah_b = jnp.broadcast_to(ah_ref[...][None, :, :], (K, t_h2, H))
    t1 = jax.lax.dot_general(
        ah_b.astype(mxu_dtype), x_ref[...].astype(mxu_dtype),
        dimension_numbers=(((2,), (1,)), ((0,), (0,))),
        preferred_element_type=jnp.float32)                       # [K, t_h2, W]
    t2 = jnp.dot(t1.reshape(K * t_h2, W).astype(mxu_dtype),
                 awt_ref[...].astype(mxu_dtype),
                 preferred_element_type=jnp.float32)              # [K*t_h2, W2]
    o_ref[...] = t2.reshape(K, t_h2, W2).astype(o_ref.dtype)


def run_upsample(logits_nkhw, a_h, a_wt, *, t_h2, out_dtype, mxu_dtype, cap):
    N, K, H, W = logits_nkhw.shape
    H2, W2 = a_h.shape[0], a_wt.shape[1]
    block_bytes = (2 * K * H * W * 4
                   + 2 * K * t_h2 * W2 * np.dtype(out_dtype).itemsize
                   + 2 * t_h2 * H * 4 + W * W2 * 4
                   + K * t_h2 * (H + W + W2) * 4)
    kernel = functools.partial(upsample_kernel, mxu_dtype=mxu_dtype)
    return pl.pallas_call(
        kernel,
        out_shape=jax.ShapeDtypeStruct((N, K, H2, W2), out_dtype),
        grid_spec=pltpu.PrefetchScalarGridSpec(
            num_scalar_prefetch=0,
            grid=(N, H2 // t_h2),
            in_specs=[
                pl.BlockSpec((pl.Squeezed(), K, H, W), lambda n, j: (n, 0, 0, 0)),
                pl.BlockSpec((t_h2, H), lambda n, j: (j, 0)),
                pl.BlockSpec((W, W2), lambda n, j: (0, 0)),
            ],
            out_specs=pl.BlockSpec((pl.Squeezed(), K, t_h2, W2),
                                   lambda n, j: (n, 0, j, 0)),
        ),
        compiler_params=pltpu.CompilerParams(
            dimension_semantics=("parallel", "parallel"),
            vmem_limit_bytes=_vmem_limit(block_bytes, cap)),
    )(logits_nkhw, a_h, a_wt)


# ----------------------------------------------------------------------------
# Bilinear interpolation weight matrix (matches F.interpolate 'bilinear').
# ----------------------------------------------------------------------------
def bilinear_matrix_np(out_size, in_size, align_corners=False):
    i = np.arange(out_size, dtype=np.float64)
    if align_corners and out_size > 1:
        src = i * (in_size - 1) / (out_size - 1)
    else:
        src = (i + 0.5) * in_size / out_size - 0.5
        src = np.maximum(src, 0.0)
    i0 = np.minimum(np.floor(src).astype(np.int64), in_size - 1)
    i1 = np.minimum(i0 + 1, in_size - 1)
    frac = (src - i0).astype(np.float32)
    A = np.zeros((out_size, in_size), dtype=np.float32)
    A[np.arange(out_size), i0] += (1.0 - frac)
    A[np.arange(out_size), i1] += frac
    return A


# ----------------------------------------------------------------------------
# PPMobileSegHead (inference forward) in JAX/Pallas
# ----------------------------------------------------------------------------
class PPMobileSegHeadPallas:
    def __init__(self, num_classes, in_channels, align_corners=False, key=None,
                 matmul_dtype=jnp.float32, out_dtype=jnp.float32):
        self.num_classes = num_classes
        self.in_channels = in_channels
        self.align_corners = align_corners
        # matmul_dtype=bf16 is a v6e/v7x MXU option (needs ~1e-2 tolerance);
        # f32 default preserves reference numerics (kernels are mem-bound).
        self.matmul_dtype = matmul_dtype
        # out_dtype=bf16 halves the dominant HBM write (K*H2*W2); f32 default
        # matches the PyTorch module's output dtype.
        self.out_dtype = out_dtype
        self.vmem_cap = _vmem_capacity_bytes()
        self._impl = None          # decided on first call: "fused" | "split"

        C, K = in_channels, num_classes
        if key is None:
            key = jax.random.PRNGKey(0)
        keys = jax.random.split(key, 7)
        # linear_fuse: depthwise 1x1 conv weight [C,1,1,1] (bias=False) + BN.
        dw_w = jax.random.normal(keys[0], (C,), jnp.float32) * 0.1 + 1.0
        bn_gamma = jax.random.normal(keys[1], (C,), jnp.float32) * 0.1 + 1.0
        bn_beta = jax.random.normal(keys[2], (C,), jnp.float32) * 0.1
        bn_mean = jax.random.normal(keys[3], (C,), jnp.float32) * 0.1
        bn_var = jax.nn.softplus(jax.random.normal(keys[4], (C,), jnp.float32)) + 0.5
        inv_std = 1.0 / jnp.sqrt(bn_var + 1e-5)
        # Fold depthwise conv + BN into a per-channel affine ONCE.
        self.scale = (dw_w * bn_gamma * inv_std).reshape(C, 1)
        self.shift = (bn_beta - bn_mean * bn_gamma * inv_std).reshape(C, 1)
        # conv_seg: 1x1 conv [K, C, 1, 1] with bias -> stored as [K, C]/[K, 1].
        self.w_kc = jax.random.normal(keys[5], (K, C), jnp.float32) / np.sqrt(C)
        self.b_k = (jax.random.normal(keys[6], (K,), jnp.float32) * 0.01).reshape(K, 1)
        self._interp_cache = {}

    def _interp_matrices(self, H2, H, W2, W):
        key = (H2, H, W2, W, self.align_corners)
        if key not in self._interp_cache:
            a_h = bilinear_matrix_np(H2, H, self.align_corners)             # [H2, H]
            a_wt = bilinear_matrix_np(W2, W, self.align_corners).T.copy()   # [W, W2]
            self._interp_cache[key] = (jnp.asarray(a_h), jnp.asarray(a_wt))
        return self._interp_cache[key]

    # ---- primary: single fused pallas_call ----------------------------------
    def _forward_fused(self, x, H2, W2):
        N, C, H, W = x.shape
        K = self.num_classes
        HW = H * W
        x_flat = x.reshape(N, C, HW)                 # contiguous (free) reshape
        a_h, a_wt = self._interp_matrices(H2, H, W2, W)
        n_chunks, t_h2 = _pick_fused_tiling(
            H2, K=K, W2=W2, H=H, W=W, C=C, HW=HW,
            x_bytes=x.dtype.itemsize,
            o_bytes=np.dtype(self.out_dtype).itemsize, cap=self.vmem_cap)
        return run_fused(x_flat, self.scale, self.shift, self.w_kc, self.b_k,
                         a_h, a_wt, n_chunks=n_chunks, t_h2=t_h2, H=H, W=W,
                         out_dtype=self.out_dtype, mxu_dtype=self.matmul_dtype,
                         cap=self.vmem_cap)

    # ---- fallback: head kernel + upsample kernel -----------------------------
    def _forward_split(self, x, H2, W2):
        N, C, H, W = x.shape
        K = self.num_classes
        HW = H * W
        x_flat = x.reshape(N, C, HW)
        t_hw = _pick_head_tile(HW, C, K, x.dtype.itemsize, self.vmem_cap)
        logits = run_head(x_flat, self.scale, self.shift, self.w_kc, self.b_k,
                          t_hw=t_hw, mxu_dtype=self.matmul_dtype,
                          cap=self.vmem_cap)                     # [N, K, HW]
        logits_nkhw = logits.reshape(N, K, H, W)                 # free reshape
        a_h, a_wt = self._interp_matrices(H2, H, W2, W)
        t_h2 = _pick_up_tile(H2, K, W2, H, W,
                             np.dtype(self.out_dtype).itemsize, self.vmem_cap)
        return run_upsample(logits_nkhw, a_h, a_wt, t_h2=t_h2,
                            out_dtype=self.out_dtype,
                            mxu_dtype=self.matmul_dtype, cap=self.vmem_cap)

    def __call__(self, inputs):
        x, x_hw = inputs[0], inputs[1]        # x: NCHW (f32 or bf16), x_hw: (H2, W2)
        H2, W2 = int(x_hw[0]), int(x_hw[1])
        if self._impl != "split":
            try:
                out = self._forward_fused(x, H2, W2)
                self._impl = "fused"
                return [out]
            except Exception:
                self._impl = "split"          # fall back to the proven pipeline
        out = self._forward_split(x, H2, W2)
        return [out]
        # TODO(synk): the 'vim' upsample branch (torch.unique / gather label
        # retrieval) is data-dependent and never taken for the default
        # 'intepolate' config; only the interpolate path is implemented.


if __name__ == "__main__":
    key = jax.random.PRNGKey(0)
    k_in, k_param = jax.random.split(key)

    N, C, H, W = 2, 32, 16, 16
    num_classes = 19
    x_hw = (64, 64)

    # Backbone activations kept bf16 in HBM (halves the dominant head input
    # stream); all in-kernel math is f32.
    x = jax.random.normal(k_in, (N, C, H, W), jnp.float32).astype(jnp.bfloat16)

    head = PPMobileSegHeadPallas(num_classes=num_classes, in_channels=C,
                                 align_corners=False, key=k_param)

    out = head([x, x_hw])[0]
    out = jax.block_until_ready(out)
    assert out.shape == (N, num_classes, x_hw[0], x_hw[1])
    assert bool(jnp.all(jnp.isfinite(out)))

    # Pure-JAX reference on the same (bf16-quantized) input and folded params.
    xf = x.astype(jnp.float32)
    y_ref = jnp.maximum(xf * head.scale.reshape(1, C, 1, 1)
                        + head.shift.reshape(1, C, 1, 1), 0.0)
    logits_ref = (jnp.einsum('kc,nchw->nkhw', head.w_kc, y_ref,
                             precision=jax.lax.Precision.HIGHEST)
                  + head.b_k.reshape(1, num_classes, 1, 1))
    a_h, a_wt = head._interp_matrices(x_hw[0], H, x_hw[1], W)
    ref = jnp.einsum('yh,nkhw,wz->nkyz', a_h, logits_ref, a_wt,
                     precision=jax.lax.Precision.HIGHEST)
    err = float(jnp.max(jnp.abs(out.astype(jnp.float32) - ref)))
    assert err < 2e-3, f"max abs err = {err}"

    print("KERNEL_OK")
</pallas_src>

<mosaic_0001>
module attributes {stable_mosaic.version = 11 : i64} {
  func.func @fused_head_upsample_kernel(%arg0: i32, %arg1: i32, %arg2: i32, %arg3: memref<1x32x256xbf16, #tpu.memory_space<vmem>>, %arg4: memref<32x1xf32, #tpu.memory_space<vmem>>, %arg5: memref<32x1xf32, #tpu.memory_space<vmem>>, %arg6: memref<19x32xf32, #tpu.memory_space<vmem>>, %arg7: memref<19x1xf32, #tpu.memory_space<vmem>>, %arg8: memref<32x16xf32, #tpu.memory_space<vmem>>, %arg9: memref<16x64xf32, #tpu.memory_space<vmem>>, %arg10: memref<1x19x32x64xf32, #tpu.memory_space<vmem>>, %arg11: memref<19x256xf32, #tpu.memory_space<vmem>>) attributes {dimension_semantics = [#tpu.dimension_semantics<parallel>, #tpu.dimension_semantics<parallel>, #tpu.dimension_semantics<arbitrary>], iteration_bounds = array<i64: 2, 2, 1>, scalar_prefetch = 0 : i64, scratch_operands = 1 : i64, tpu.core_type = #tpu.core_type<tc>, window_params = [{transform_indices = @transform_0, window_bounds = array<i64: 1, 32, 256>}, {pipeline_mode = #tpu.pipeline_mode<synchronous>, transform_indices = @transform_1, window_bounds = array<i64: 32, 1>}, {pipeline_mode = #tpu.pipeline_mode<synchronous>, transform_indices = @transform_2, window_bounds = array<i64: 32, 1>}, {pipeline_mode = #tpu.pipeline_mode<synchronous>, transform_indices = @transform_3, window_bounds = array<i64: 19, 32>}, {pipeline_mode = #tpu.pipeline_mode<synchronous>, transform_indices = @transform_4, window_bounds = array<i64: 19, 1>}, {transform_indices = @transform_5, window_bounds = array<i64: 32, 16>}, {pipeline_mode = #tpu.pipeline_mode<synchronous>, transform_indices = @transform_6, window_bounds = array<i64: 16, 64>}, {transform_indices = @transform_7, window_bounds = array<i64: 1, 19, 32, 64>}]} {
    %c0_i32 = arith.constant 0 : i32
    %0 = arith.cmpi eq, %arg2, %c0_i32 : i32
    %1 = arith.extui %0 : i1 to i32
    %c0_i32_0 = arith.constant 0 : i32
    %2 = arith.cmpi ne, %1, %c0_i32_0 : i32
    scf.if %2 {
      %c0_11 = arith.constant 0 : index
      %c0_12 = arith.constant 0 : index
      %c0_13 = arith.constant 0 : index
      %18 = vector.load %arg3[%c0_11, %c0_12, %c0_13] : memref<1x32x256xbf16, #tpu.memory_space<vmem>>, vector<1x32x256xbf16>
      %19 = vector.shape_cast %18 : vector<1x32x256xbf16> to vector<32x256xbf16>
      %20 = arith.extf %19 : vector<32x256xbf16> to vector<32x256xf32>
      %c0_14 = arith.constant 0 : index
      %c0_15 = arith.constant 0 : index
      %21 = vector.load %arg4[%c0_14, %c0_15] : memref<32x1xf32, #tpu.memory_space<vmem>>, vector<32x1xf32>
      %22 = vector.broadcast %21 : vector<32x1xf32> to vector<32x256xf32>
      %23 = arith.mulf %20, %22 : vector<32x256xf32>
      %c0_16 = arith.constant 0 : index
      %c0_17 = arith.constant 0 : index
      %24 = vector.load %arg5[%c0_16, %c0_17] : memref<32x1xf32, #tpu.memory_space<vmem>>, vector<32x1xf32>
      %25 = vector.broadcast %24 : vector<32x1xf32> to vector<32x256xf32>
      %26 = arith.addf %23, %25 : vector<32x256xf32>
      %cst_18 = arith.constant 0.000000e+00 : f32
      %27 = vector.broadcast %cst_18 : f32 to vector<32x256xf32>
      %28 = arith.maximumf %26, %27 : vector<32x256xf32>
      %c0_19 = arith.constant 0 : index
      %c0_20 = arith.constant 0 : index
      %29 = vector.load %arg6[%c0_19, %c0_20] : memref<19x32xf32, #tpu.memory_space<vmem>>, vector<19x32xf32>
      %cst_21 = arith.constant dense<0.000000e+00> : vector<19x256xf32>
      %30 = tpu.matmul %29, %28, %cst_21 {dimension_numbers = #tpu.dot_dimension_numbers<[1], [0], [0], [1], [0, 0, 1, 1], [], []>} : vector<19x32xf32>, vector<32x256xf32>, vector<19x256xf32> -> vector<19x256xf32>
      %c0_22 = arith.constant 0 : index
      %c0_23 = arith.constant 0 : index
      %31 = vector.load %arg7[%c0_22, %c0_23] : memref<19x1xf32, #tpu.memory_space<vmem>>, vector<19x1xf32>
      %32 = vector.broadcast %31 : vector<19x1xf32> to vector<19x256xf32>
      %33 = arith.addf %30, %32 : vector<19x256xf32>
      %c0_24 = arith.constant 0 : index
      %c0_25 = arith.constant 0 : index
      %34 = vector.load %arg11[%c0_24, %c0_25] : memref<19x256xf32, #tpu.memory_space<vmem>>, vector<19x256xf32>
      tpu.vector_store %arg11[%c0_24, %c0_25], %33 {strides = array<i32>} : memref<19x256xf32, #tpu.memory_space<vmem>>, vector<19x256xf32>,
    } else {
    }
    %c0 = arith.constant 0 : index
    %c0_1 = arith.constant 0 : index
    %3 = vector.load %arg11[%c0, %c0_1] : memref<19x256xf32, #tpu.memory_space<vmem>>, vector<19x256xf32>
    %4 = vector.shape_cast %3 : vector<19x256xf32> to vector<19x16x16xf32>
    %5 = tpu.transpose %4, [1, 0, 2] : vector<19x16x16xf32> -> vector<16x19x16xf32>
    %6 = vector.shape_cast %5 : vector<16x19x16xf32> to vector<16x304xf32>
    %c0_2 = arith.constant 0 : index
    %c0_3 = arith.constant 0 : index
    %7 = vector.load %arg8[%c0_2, %c0_3] : memref<32x16xf32, #tpu.memory_space<vmem>>, vector<32x16xf32>
    %cst = arith.constant dense<0.000000e+00> : vector<32x304xf32>
    %8 = tpu.matmul %7, %6, %cst {dimension_numbers = #tpu.dot_dimension_numbers<[1], [0], [0], [1], [0, 0, 1, 1], [], []>} : vector<32x16xf32>, vector<16x304xf32>, vector<32x304xf32> -> vector<32x304xf32>
    %9 = vector.shape_cast %8 : vector<32x304xf32> to vector<32x19x16xf32>
    %10 = tpu.transpose %9, [1, 0, 2] : vector<32x19x16xf32> -> vector<19x32x16xf32>
    %11 = vector.shape_cast %10 : vector<19x32x16xf32> to vector<608x16xf32>
    %c0_4 = arith.constant 0 : index
    %c0_5 = arith.constant 0 : index
    %12 = vector.load %arg9[%c0_4, %c0_5] : memref<16x64xf32, #tpu.memory_space<vmem>>, vector<16x64xf32>
    %cst_6 = arith.constant dense<0.000000e+00> : vector<608x64xf32>
    %13 = tpu.matmul %11, %12, %cst_6 {dimension_numbers = #tpu.dot_dimension_numbers<[1], [0], [0], [1], [0, 0, 1, 1], [], []>} : vector<608x16xf32>, vector<16x64xf32>, vector<608x64xf32> -> vector<608x64xf32>
    %14 = vector.shape_cast %13 : vector<608x64xf32> to vector<19x32x64xf32>
    %c0_7 = arith.constant 0 : index
    %c0_8 = arith.constant 0 : index
    %c0_9 = arith.constant 0 : index
    %c0_10 = arith.constant 0 : index
    %15 = vector.load %arg10[%c0_7, %c0_8, %c0_9, %c0_10] : memref<1x19x32x64xf32, #tpu.memory_space<vmem>>, vector<1x19x32x64xf32>
    %16 = vector.shape_cast %15 : vector<1x19x32x64xf32> to vector<19x32x64xf32>
    %17 = vector.shape_cast %14 : vector<19x32x64xf32> to vector<1x19x32x64xf32>
    tpu.vector_store %arg10[%c0_7, %c0_8, %c0_9, %c0_10], %17 {strides = array<i32>} : memref<1x19x32x64xf32, #tpu.memory_space<vmem>>, vector<1x19x32x64xf32>,
    return
  }
  func.func @transform_0(%arg0: i32, %arg1: i32, %arg2: i32) -> (i32, i32, i32) {
    %c0_i32 = arith.constant 0 : i32
    %c0_i32_0 = arith.constant 0 : i32
    %c0_i32_1 = arith.constant 0 : i32
    return %arg0, %c0_i32, %c0_i32_0 : i32, i32, i32
  }
  func.func @transform_1(%arg0: i32, %arg1: i32, %arg2: i32) -> (i32, i32) {
    %c0_i32 = arith.constant 0 : i32
    %c0_i32_0 = arith.constant 0 : i32
    %c0_i32_1 = arith.constant 0 : i32
    return %c0_i32, %c0_i32_0 : i32, i32
  }
  func.func @transform_2(%arg0: i32, %arg1: i32, %arg2: i32) -> (i32, i32) {
    %c0_i32 = arith.constant 0 : i32
    %c0_i32_0 = arith.constant 0 : i32
    %c0_i32_1 = arith.constant 0 : i32
    return %c0_i32, %c0_i32_0 : i32, i32
  }
  func.func @transform_3(%arg0: i32, %arg1: i32, %arg2: i32) -> (i32, i32) {
    %c0_i32 = arith.constant 0 : i32
    %c0_i32_0 = arith.constant 0 : i32
    %c0_i32_1 = arith.constant 0 : i32
    return %c0_i32, %c0_i32_0 : i32, i32
  }
  func.func @transform_4(%arg0: i32, %arg1: i32, %arg2: i32) -> (i32, i32) {
    %c0_i32 = arith.constant 0 : i32
    %c0_i32_0 = arith.constant 0 : i32
    %c0_i32_1 = arith.constant 0 : i32
    return %c0_i32, %c0_i32_0 : i32, i32
  }
  func.func @transform_5(%arg0: i32, %arg1: i32, %arg2: i32) -> (i32, i32) {
    %c1_i32 = arith.constant 1 : i32
    %0 = arith.muli %arg1, %c1_i32 : i32
    %1 = arith.addi %0, %arg2 : i32
    %c0_i32 = arith.constant 0 : i32
    %c0_i32_0 = arith.constant 0 : i32
    return %1, %c0_i32 : i32, i32
  }
  func.func @transform_6(%arg0: i32, %arg1: i32, %arg2: i32) -> (i32, i32) {
    %c0_i32 = arith.constant 0 : i32
    %c0_i32_0 = arith.constant 0 : i32
    %c0_i32_1 = arith.constant 0 : i32
    return %c0_i32, %c0_i32_0 : i32, i32
  }
  func.func @transform_7(%arg0: i32, %arg1: i32, %arg2: i32) -> (i32, i32, i32, i32) {
    %c1_i32 = arith.constant 1 : i32
    %0 = arith.muli %arg1, %c1_i32 : i32
    %1 = arith.addi %0, %arg2 : i32
    %c0_i32 = arith.constant 0 : i32
    %c0_i32_0 = arith.constant 0 : i32
    %c0_i32_1 = arith.constant 0 : i32
    return %arg0, %c0_i32, %1, %c0_i32_0 : i32, i32, i32, i32
  }
}

module attributes {stable_mosaic.version = 11 : i64} {
  func.func @head_kernel(%arg0: i32, %arg1: i32, %arg2: memref<1x32x128xbf16, #tpu.memory_space<vmem>>, %arg3: memref<32x1xf32, #tpu.memory_space<vmem>>, %arg4: memref<32x1xf32, #tpu.memory_space<vmem>>, %arg5: memref<19x32xf32, #tpu.memory_space<vmem>>, %arg6: memref<19x1xf32, #tpu.memory_space<vmem>>, %arg7: memref<1x19x128xf32, #tpu.memory_space<vmem>>) attributes {dimension_semantics = [#tpu.dimension_semantics<parallel>, #tpu.dimension_semantics<parallel>], iteration_bounds = array<i64: 2, 2>, scalar_prefetch = 0 : i64, scratch_operands = 0 : i64, tpu.core_type = #tpu.core_type<tc>, window_params = [{transform_indices = @transform_0, window_bounds = array<i64: 1, 32, 128>}, {pipeline_mode = #tpu.pipeline_mode<synchronous>, transform_indices = @transform_1, window_bounds = array<i64: 32, 1>}, {pipeline_mode = #tpu.pipeline_mode<synchronous>, transform_indices = @transform_2, window_bounds = array<i64: 32, 1>}, {pipeline_mode = #tpu.pipeline_mode<synchronous>, transform_indices = @transform_3, window_bounds = array<i64: 19, 32>}, {pipeline_mode = #tpu.pipeline_mode<synchronous>, transform_indices = @transform_4, window_bounds = array<i64: 19, 1>}, {transform_indices = @transform_5, window_bounds = array<i64: 1, 19, 128>}]} {
    %c0 = arith.constant 0 : index
    %c0_0 = arith.constant 0 : index
    %c0_1 = arith.constant 0 : index
    %0 = vector.load %arg2[%c0, %c0_0, %c0_1] : memref<1x32x128xbf16, #tpu.memory_space<vmem>>, vector<1x32x128xbf16>
    %1 = vector.shape_cast %0 : vector<1x32x128xbf16> to vector<32x128xbf16>
    %2 = arith.extf %1 : vector<32x128xbf16> to vector<32x128xf32>
    %c0_2 = arith.constant 0 : index
    %c0_3 = arith.constant 0 : index
    %3 = vector.load %arg3[%c0_2, %c0_3] : memref<32x1xf32, #tpu.memory_space<vmem>>, vector<32x1xf32>
    %4 = vector.broadcast %3 : vector<32x1xf32> to vector<32x128xf32>
    %5 = arith.mulf %2, %4 : vector<32x128xf32>
    %c0_4 = arith.constant 0 : index
    %c0_5 = arith.constant 0 : index
    %6 = vector.load %arg4[%c0_4, %c0_5] : memref<32x1xf32, #tpu.memory_space<vmem>>, vector<32x1xf32>
    %7 = vector.broadcast %6 : vector<32x1xf32> to vector<32x128xf32>
    %8 = arith.addf %5, %7 : vector<32x128xf32>
    %cst = arith.constant 0.000000e+00 : f32
    %9 = vector.broadcast %cst : f32 to vector<32x128xf32>
    %10 = arith.maximumf %8, %9 : vector<32x128xf32>
    %c0_6 = arith.constant 0 : index
    %c0_7 = arith.constant 0 : index
    %11 = vector.load %arg5[%c0_6, %c0_7] : memref<19x32xf32, #tpu.memory_space<vmem>>, vector<19x32xf32>
    %cst_8 = arith.constant dense<0.000000e+00> : vector<19x128xf32>
    %12 = tpu.matmul %11, %10, %cst_8 {dimension_numbers = #tpu.dot_dimension_numbers<[1], [0], [0], [1], [0, 0, 1, 1], [], []>} : vector<19x32xf32>, vector<32x128xf32>, vector<19x128xf32> -> vector<19x128xf32>
    %c0_9 = arith.constant 0 : index
    %c0_10 = arith.constant 0 : index
    %13 = vector.load %arg6[%c0_9, %c0_10] : memref<19x1xf32, #tpu.memory_space<vmem>>, vector<19x1xf32>
    %14 = vector.broadcast %13 : vector<19x1xf32> to vector<19x128xf32>
    %15 = arith.addf %12, %14 : vector<19x128xf32>
    %c0_11 = arith.constant 0 : index
    %c0_12 = arith.constant 0 : index
    %c0_13 = arith.constant 0 : index
    %16 = vector.load %arg7[%c0_11, %c0_12, %c0_13] : memref<1x19x128xf32, #tpu.memory_space<vmem>>, vector<1x19x128xf32>
    %17 = vector.shape_cast %16 : vector<1x19x128xf32> to vector<19x128xf32>
    %18 = vector.shape_cast %15 : vector<19x128xf32> to vector<1x19x128xf32>
    tpu.vector_store %arg7[%c0_11, %c0_12, %c0_13], %18 {strides = array<i32>} : memref<1x19x128xf32, #tpu.memory_space<vmem>>, vector<1x19x128xf32>,
    return
  }
  func.func @transform_0(%arg0: i32, %arg1: i32) -> (i32, i32, i32) {
    %c0_i32 = arith.constant 0 : i32
    %c0_i32_0 = arith.constant 0 : i32
    return %arg0, %c0_i32, %arg1 : i32, i32, i32
  }
  func.func @transform_1(%arg0: i32, %arg1: i32) -> (i32, i32) {
    %c0_i32 = arith.constant 0 : i32
    %c0_i32_0 = arith.constant 0 : i32
    %c0_i32_1 = arith.constant 0 : i32
    return %c0_i32, %c0_i32_0 : i32, i32
  }
  func.func @transform_2(%arg0: i32, %arg1: i32) -> (i32, i32) {
    %c0_i32 = arith.constant 0 : i32
    %c0_i32_0 = arith.constant 0 : i32
    %c0_i32_1 = arith.constant 0 : i32
    return %c0_i32, %c0_i32_0 : i32, i32
  }
  func.func @transform_3(%arg0: i32, %arg1: i32) -> (i32, i32) {
    %c0_i32 = arith.constant 0 : i32
    %c0_i32_0 = arith.constant 0 : i32
    %c0_i32_1 = arith.constant 0 : i32
    return %c0_i32, %c0_i32_0 : i32, i32
  }
  func.func @transform_4(%arg0: i32, %arg1: i32) -> (i32, i32) {
    %c0_i32 = arith.constant 0 : i32
    %c0_i32_0 = arith.constant 0 : i32
    %c0_i32_1 = arith.constant 0 : i32
    return %c0_i32, %c0_i32_0 : i32, i32
  }
  func.func @transform_5(%arg0: i32, %arg1: i32) -> (i32, i32, i32) {
    %c0_i32 = arith.constant 0 : i32
    %c0_i32_0 = arith.constant 0 : i32
    return %arg0, %c0_i32, %arg1 : i32, i32, i32
  }
}

</mosaic_0001>

<bundles_post_ra>
// kernel: tpu_custom_call.1
= control target key start
LH: loop header
LB: loop body
LE: loop exit
PB: predicated region body
PF: predicated region fallthrough
CT: control target
= control target key end

     0   :  { %s10337_s0 = inlined_call_operand.hbm [shape: bf16[2,32,256], index: 0, kind: input, shape index: {}]   ;;  %s10338_s1 = inlined_call_operand.vmem [shape: f32[32,1], index: 1, kind: input, shape index: {}]   ;;  %s10339_s2 = inlined_call_operand.vmem [shape: f32[32,1], index: 2, kind: input, shape index: {}]   ;;  %s10340_s3 = inlined_call_operand.hbm [shape: f32[19,32], index: 3, kind: input, shape index: {}]   ;;  %s10341_s4 = inlined_call_operand.vmem [shape: f32[19,1], index: 4, kind: input, shape index: {}]   ;;  %s10342_s5 = inlined_call_operand.vmem [shape: f32[64,16], index: 5, kind: input, shape index: {}]   ;;  %s10343_s6 = inlined_call_operand.hbm [shape: f32[16,64], index: 6, kind: input, shape index: {}]   ;;  %s10344_s7 = inlined_call_operand.hbm [shape: f32[2,19,64,64], index: 7, kind: output, shape index: {}]  }
   0x1   :  { %10389 = sst [smem:[#allocation44_spill]] %s10340_s3 }
   0x2   :  { %10390 = sst [smem:[#allocation45_spill]] %s10343_s6 }
   0x3   :  { %10391 = sst [smem:[#allocation46_spill]] %s10344_s7 }
   0x4   :  { %12 = vsyncpa [#allocation4], 0 }
   0x5   :  { %14 = vsyncpa [#allocation4 + $0x1], 0 }
   0x6   :  { %15 = vsyncpa [#allocation7], 0 }
   0x7   :  { %16 = vsyncpa [#allocation5], 0 }
   0x8   :  { %18 = vsyncpa [#allocation5 + $0x1], 0  ;;  %s7921_s24 = smov 0   ;;  %s7923_s25 = smov 0  }
   0x9   :  { %s7925_s26 = smov 0   ;;  %s7927_s27 = smov 0  }
   0xa   :  { %s7929_s28 = smov 0   ;;  %s7931_s29 = smov 0  }
   0xb   :  { %s7933_s30 = smov 0   ;;  %s7935_s8 = smov 0  }
   0xc   :  { %s7937_s9 = smov 0   ;;  %s7939_s10 = smov 0  }
   0xd   :  { %s7941_s11 = smov 0  }
   0xe LB: > { %10392 = sst [smem:[#allocation15_spill]] %s7816_s24  ;;  %s6952_s12 = sadd.s32 4294967295, %s7856_s11   ;;  %s7856_s11 = sphi %s7941_s11, %s24_s11   ;;  %s7852_s10 = sphi %s7939_s10, %s10498_s10   ;;  %s7848_s9 = sphi %s7937_s9, %s10491_s9   ;;  %s7844_s8 = sphi %s7935_s8, %s10497_s8   ;;  %s7840_s30 = sphi %s7933_s30, %s10490_s30   ;;  %s7836_s29 = sphi %s7931_s29, %s10496_s29   ;;  %s7832_s28 = sphi %s7929_s28, %s10495_s28   ;;  %s7828_s27 = sphi %s7927_s27, %s10494_s27   ;;  %s7824_s26 = sphi %s7925_s26, %s10493_s26   ;;  %s7820_s25 = sphi %s7923_s25, %s10492_s25   ;;  %s7816_s24 = sphi %s7921_s24, %s10489_s24  }
   0xf   : > { %10393 = sst [smem:[#allocation16_spill]] %s7820_s25  ;;  %s6953_s13 = sadd.s32 4294967294, %s7856_s11  }
  0x10   : > { %10394 = sst [smem:[#allocation17_spill]] %s7844_s8  ;;  %p63_p0 = scmp.ne.s32.totalorder %s7832_s28, %s7828_s27 }
  0x11   : > { %10395 = sst [smem:[#allocation18_spill]] %s7848_s9  ;;  %p7977_p1 = scmp.eq.s32.totalorder %s6952_s12, 0 }
  0x12   : > { %p223_p2 = scmp.ne.s32.totalorder %s7824_s26, %s7820_s25  ;;  %p224_p4 = scmp.eq.s32.totalorder %s6952_s12, 3 }
  0x13   : > { %s10396_s14 = scalar_select %p7977_p1, 1, 0 }
  0x14   : > { %p7986_p3 = por %p7977_p1, %p63_p0  ;;  %p229_p5 = scmp.ne.s32.totalorder %s7820_s25, %s7816_s24 }
  0x15   : > { %p230_p6 = scmp.eq.s32.totalorder %s6953_s13, 3  ;;  %p7992_p7 = por %p224_p4, %p223_p2 }
  0x16   : > { %s10397_s16 = scalar_select %p7986_p3, 1, 0 }
  0x17   : > { %s10398_s17 = scalar_select %p7992_p7, 1, 0 }
  0x18   : > { %p6954_p8 = scmp.ge.s32.totalorder %s7856_s11, 1  ;;  %p7997_p9 = por %p230_p6, %p229_p5 }
  0x19   : > { %10399 = sst [smem:[#allocation19_spill]] %s10398_s17  ;;  %p237_p10 = scmp.lt.s32.totalorder %s7856_s11, 5 }
  0x1a   : > { %s10400_s18 = scalar_select %p7997_p9, 1, 0 }
  0x1b   : > { %p8002_p11 = pnand %p6954_p8, %p237_p10  ;;  %s7858_s20 = smov [#allocation6]  }
  0x1c   : > { %10401 = sst [smem:[#allocation20_spill]] %s10400_s18  ;;  %s255_s21 = sshll.u32 %s7858_s20, 4  ;;  %s256_s21 = int_to_ptr.vmem [resolvable:$true] %s255_s21 }
  0x1d   : > { %s10402_s19 = scalar_select %p8002_p11, 1, 0 }
  0x1e   : > { %p7459_p12 = pneg %p8002_p11  ;;  %s7859_s23 = smov [#allocation8]  }
  0x1f   : > { %s271_s27 = sshll.u32 %s7859_s23, 4  ;;  %s10404_s3 = sld [smem:[#allocation44_spill]]  ;;  %s8014_s27 = int_to_ptr.vmem [resolvable:$true] %s271_s27 }
  0x20   : > { %p8010_p13 = pnand %p7459_p12, %p7977_p1 }
  0x22   : > { %p7674_p2 = pneg %p8010_p13 }
  0x25   : > { %s7672_s15 = scalar_lea.hbm %s10404_s3, 384 }
  0x26   : > { %p7673_p0 = scmp.ne.s32.totalorder %s10404_s3, %s7672_s15  ;;  %p7679_p6 = scmp.lt.u32.totalorder %s7672_s15, %s10404_s3 }
  0x28   : > { %p7675_p4 = pnand %p7674_p2, %p7673_p0 }
  0x2a   : > { %p7676_p5 = pneg %p7675_p4 }
  0x2c   : > { %p7681_p8 = pnand %p7679_p6, %p7676_p5 }
  0x2e   : > { %7684 = shalt.err (!%p7681_p8)
}
  0x2f   : > { %s7685_s23 = scalar_lea.vmem %s256_s21, 384  ;;  %p7693_p7 = scmp.lt.s32.totalorder %s256_s21, %s256_s21 }
  0x30   : > { %p7686_p10 = scmp.ne.s32.totalorder %s256_s21, %s7685_s23  ;;  %p7694_p1 = scmp.lt.s32.totalorder %s7685_s23, %s7685_s23 }
  0x32   : > { %p7688_p12 = pnand %p7686_p10, %p7674_p2  ;;  %p7695_p3 = por %p7694_p1, %p7693_p7 }
  0x34   : > { %p7689_p9 = pneg %p7688_p12 }
  0x36   : > { %p7696_p11 = pnand %p7695_p3, %p7689_p9 }
  0x38   : > { %7699 = shalt.err (!%p7696_p11)
}
  0x39   : > { %s10356_s18 = smov 128   ;;  %s10357_s12 = smov 8  }
  0x3a   : > { %7462 = dma.hbm_to_vmem [thread:$0]  (!%p8010_p13), %s10404_s3, 384, %s256_s21, [#allocation7], %s10356_s18, %s10356_s18, %s10357_s12  }
  0x3b   : > { %s10405_s6 = sld [smem:[#allocation45_spill]] }
  0x41   : > { %s7700_s20 = scalar_lea.hbm %s10405_s6, 256 }
  0x42   : > { %p7701_p1 = scmp.ne.s32.totalorder %s10405_s6, %s7700_s20  ;;  %p7707_p9 = scmp.lt.u32.totalorder %s7700_s20, %s10405_s6 }
  0x44   : > { %p7703_p3 = pnand %p7701_p1, %p7674_p2 }
  0x46   : > { %p7704_p7 = pneg %p7703_p3 }
  0x48   : > { %p7709_p11 = pnand %p7707_p9, %p7704_p7 }
  0x4a   : > { %7712 = shalt.err (!%p7709_p11)
}
  0x4b   : > { %s7713_s21 = scalar_lea.vmem %s8014_s27, 256  ;;  %p7721_p6 = scmp.lt.s32.totalorder %s8014_s27, %s8014_s27 }
  0x4c   : > { %p7714_p0 = scmp.ne.s32.totalorder %s8014_s27, %s7713_s21  ;;  %p7722_p8 = scmp.lt.s32.totalorder %s7713_s21, %s7713_s21 }
  0x4e   : > { %p7716_p4 = pnand %p7714_p0, %p7674_p2  ;;  %p7723_p10 = por %p7722_p8, %p7721_p6 }
  0x50   : > { %p7717_p5 = pneg %p7716_p4 }
  0x52   : > { %p7724_p12 = pnand %p7723_p10, %p7717_p5 }
  0x54   : > { %7727 = shalt.err (!%p7724_p12)
}
  0x55   : > { %7465 = dma.hbm_to_vmem [thread:$0]  (!%p8010_p13), %s10405_s6, 256, %s8014_s27, [#allocation7], %s10356_s18, %s10356_s18, %s10357_s12  }
  0x56   : > { %s39_s17 = sadd.s32 1, %s7848_s9  ;;  %s43_s22 = sadd.s32 1, %s7852_s10 }
  0x57   : > { %p41_p2 = scmp.ge.s32.totalorder %s39_s17, 2  ;;  %s50_s7 = sadd.s32 1, %s7836_s29 }
  0x58   : > { %p57_p1 = scmp.ne.s32.totalorder %s7836_s29, %s7832_s28  ;;  %p58_p3 = scmp.eq.s32.totalorder %s7856_s11, 0 }
  0x59   : > { %s10500_s17 = smov (%p41_p2, %s39_s17), 0  ;;  %s10502_s22 = smov (!%p41_p2, %s43_s22), %s7852_s10 }
  0x5a   : > { %10406 = sst [smem:[#allocation21_spill]] %s10500_s17  ;;  %p8078_p7 = por %p58_p3, %p57_p1 }
  0x5b   : > { %s209_s15 = ssub.s32 %s7848_s9, %s10500_s17  ;;  %p45_p13 = scmp.ge.s32.totalorder %s10502_s22, 2 }
  0x5c   : > { %p7476_p9 = scmp.lt.s32.totalorder %s7856_s11, 4  ;;  %s285_s27 = sand.u32 1, %s7836_s29  }
  0x5d   : > { %s7204_s13 = sshll.u32 %s7852_s10, 9  ;;  %s10504_s22 = smov (%p45_p13, %s10502_s22), 0 }
  0x5e   : > { %s6958_s20 = sshll.u32 %s285_s27, 5  ;;  %s47_s23 = ssub.s32 %s7852_s10, %s10504_s22 }
  0x5f   : > { %p48_p11 = scmp.eq.s32.totalorder %s47_s23, 0  ;;  %s210_s21 = sor.u32 %s209_s15, %s47_s23 }
  0x60   : > { %p211_p0 = scmp.eq.s32.totalorder %s210_s21, 0  ;;  %s8094_s18 = scalar_lea.hbm %s10337_s0, %s7204_s13 }
  0x61   : > { %s8097_s12 = scalar_select %p48_p11, %s7836_s29, %s50_s7  }
  0x62   : > { %s10408_s3 = sadd.s32 1, %s7824_s26  ;;  %s289_s17 = scalar_lea.vmem [#allocation3], %s6958_s20 }
  0x63   : > { %s8102_s6 = scalar_select %p211_p0, %s7824_s26, %s10408_s3  }
  0x64   : > { %s296_s9 = sshll.u32 %s289_s17, 4  ;;  %p8108_p4 = pnand %p7476_p9, %p8078_p7  ;;  %s8112_s9 = int_to_ptr.vmem [resolvable:$true] %s296_s9 }
  0x65   : > { %s8114_s13 = scalar_lea.sflag [#allocation4], %s285_s27  ;;  %s7728_s7 = scalar_lea.hbm %s8094_s18, 512 }
  0x66   : > { %p7729_p5 = scmp.ne.s32.totalorder %s8094_s18, %s7728_s7  ;;  %p7730_p6 = pneg %p8108_p4 }
  0x67   : > { %s7733_s24 = scalar_lea.hbm %s10337_s0, 1024  ;;  %p7734_p12 = scmp.lt.u32.totalorder %s8094_s18, %s10337_s0 }
  0x68   : > { %p7731_p8 = pnand %p7730_p6, %p7729_p5  ;;  %p7735_p2 = scmp.lt.u32.totalorder %s7733_s24, %s7728_s7 }
  0x69   : > { %p7737_p3 = scmp.lt.u32.totalorder %s7728_s7, %s8094_s18 }
  0x6a   : > { %p7732_p10 = pneg %p7731_p8  ;;  %p7736_p1 = por %p7735_p2, %p7734_p12 }
  0x6c   : > { %p7738_p7 = por %p7737_p3, %p7736_p1 }
  0x6e   : > { %p7739_p13 = pnand %p7738_p7, %p7732_p10 }
  0x70   : > { %7742 = shalt.err (!%p7739_p13)
}
  0x71   : > { %s7743_s27 = scalar_lea.vmem %s8112_s9, 512  ;;  %s7862_s21 = smov [#allocation3]  }
  0x72   : > { %p7744_p9 = scmp.ne.s32.totalorder %s8112_s9, %s7743_s27  ;;  %s7748_s25 = sshll.u32 %s7862_s21, 4  ;;  %s7749_s25 = int_to_ptr.vmem [resolvable:$false] %s7748_s25 }
  0x73   : > { %s7750_s8 = scalar_lea.vmem %s7749_s25, 1024  ;;  %p7751_p5 = scmp.lt.s32.totalorder %s8112_s9, %s7749_s25 }
  0x74   : > { %p7746_p11 = pnand %p7744_p9, %p7730_p6  ;;  %p7752_p8 = scmp.lt.s32.totalorder %s7750_s8, %s7743_s27 }
  0x76   : > { %p7747_p0 = pneg %p7746_p11  ;;  %p7753_p12 = por %p7752_p8, %p7751_p5 }
  0x78   : > { %p7754_p2 = pnand %p7753_p12, %p7747_p0 }
  0x7a   : > { %7757 = shalt.err (!%p7754_p2)
}
  0x7b   : > { %s10410_s7 = smov 8   ;;  %s10411_s3 = smov 128  }
  0x7c   : > { %7469 = dma.hbm_to_vmem [thread:$0]  (!%p8108_p4), %s8094_s18, 512, %s8112_s9, %s8114_s13, %s10411_s3, %s10411_s3, %s10410_s7  }
  0x7d   : > { %p10412_p6 = scmp.ne.s32.totalorder %s10402_s19, 0 }
  0x7f   : > { %319 = sbr.rel (%p10412_p6) target bundleno = 1647 (0x66f), region = 48 }
  0x86   : > { %s321_s17 = sand.u32 1, %s7832_s28   ;;  %p10413_p10 = scmp.ne.s32.totalorder %s10397_s16, 0 }
  0x87   : > { %s6962_s24 = sshll.u32 %s321_s17, 5  ;;  %s322_s20 = scalar_lea.sflag [#allocation4], %s321_s17 }
  0x88   : > { %s8148_s23 = scalar_lea.vmem [#allocation3], %s6962_s24 }
  0x89   : > { %7803 = dma.done.wait (%p10413_p10), %s322_s20, 512  }
  0x8a   : > { %7805 = vsyncadd (%p10413_p10), %s322_s20, 4294966784  ;;  %p10414_p1 = scmp.ne.s32.totalorder %s10396_s14, 0 }
  0x8c   : > { %7807 = dma.done.wait (%p10414_p1), [#allocation7], 640  }
  0x8d   : > { %7809 = vsyncadd (%p10414_p1), [#allocation7], 4294966656  ;;  %v7863_v0 = vmov 0   ;;  %v428_v1 = vld [vmem:[%s10339_s2] sm:$0xff]  ;;  %v429_v3 = vld [vmem:[%s10339_s2 + $0x8] sm:$0xff]  ;;  %v10360_v12 = vmov 0.0  }
  0x8e   : > { %7591 = vset.pattern.permute.xlu1 %v7863_v0  ;;  %7590 = vset.pattern.permute.xlu0 %v7863_v0  ;;  %v396_v2 = vld [vmem:[%s10338_s1] sm:$0xff]  ;;  %v397_v4 = vld [vmem:[%s10338_s1 + $0x8] sm:$0xff]  ;;  %v399_v5 = vld [vmem:[%s10338_s1 + $0x18] sm:$0xff]  ;;  %vm489_vm0 = vcmask 261120   ;;  %s7866_s27 = smov 112   ;;  %s7867_s14 = smov 64  }
  0x8f   : > { %434 = vperm.xlu1 %7591, %v428_v1   ;;  %402 = vperm.xlu0 %7590, %v396_v2   ;;  %v398_v6 = vld [vmem:[%s10338_s1 + $0x10] sm:$0xff]  ;;  %v431_v7 = vld [vmem:[%s10339_s2 + $0x18] sm:$0xff]  ;;  %v471_v9 = vld [vmem:[%s10341_s4] sm:$0xff]  ;;  %s7868_s21 = smov 80   ;;  %s7869_s25 = smov 32   ;;  %vm2888_vm1 = vcmask 130048  }
  0x90   : > { %v430_v8 = vld [vmem:[%s10339_s2 + $0x10] sm:$0xff]  ;;  %v472_v10 = vld [vmem:[%s10341_s4 + $0x8] sm:$0xff]  ;;  %563 = vmatprep.mubr.f32.mxu0 %v10360_v12  ;;  %3007 = vmatprep.mubr.f32.mxu1 %v10360_v12  ;;  %v385_v16 = vld [vmem:[%s8148_s23 + $0x8] sm:$0xff]  ;;  %s7870_s8 = smov 48   ;;  %s7871_s7 = smov 16   ;;  %vm2894_vm2 = vcmask 392192  }
  0x91   : > { %v473_v11 = vld [vmem:[%s10341_s4 + $0x10] sm:$0x7]  ;;  %v390_v19 = vunpack.c.l.bf16 %v385_v16  ;;  %v391_v20 = vunpack.c.h.bf16 %v385_v16  ;;  %v387_v23 = vld [vmem:[%s8148_s23 + $0x18] sm:$0xff]  ;;  %v386_v26 = vld [vmem:[%s8148_s23 + $0x10] sm:$0xff]  ;;  %s8871_s3 = sshll.u32 %s7840_s30, 2  ;;  %vm2897_vm3 = vcmask 523264  }
  0x92   : > { %v384_v13 = vld [vmem:[%s8148_s23] sm:$0xff]  ;;  %v394_v29 = vunpack.c.l.bf16 %v387_v23  ;;  %v395_v30 = vunpack.c.h.bf16 %v387_v23  ;;  %v392_v33 = vunpack.c.l.bf16 %v386_v26  ;;  %v393_v34 = vunpack.c.h.bf16 %v386_v26  ;;  %v469_v62 = vld [vmem:[#allocation6 + $0x8] sm:$0xff]  ;;  %v470_v63 = vld [vmem:[#allocation6 + $0x10] sm:$0x7]  ;;  %s7865_s23 = smov 96   ;;  %p372_p4 = scmp.lt.s32.totalorder %s8871_s3, 7 }
  0x93   : > { %439 = vperm.xlu1 %7591, %v429_v3   ;;  %407 = vperm.xlu0 %7590, %v397_v4   ;;  %v388_v14 = vunpack.c.l.bf16 %v384_v13  ;;  %v389_v15 = vunpack.c.h.bf16 %v384_v13  ;;  %v468_v61 = vld [vmem:[#allocation6] sm:$0xff]  ;;  %vm2900_vm4 = vcmask 654336   ;;  %vm2903_vm5 = vcmask 785408   ;;  %s10475_s19 = sld [smem:[#allocation16_spill]] }
  0x94   : > { %s373_s30 = scalar_select %p372_p4, %s8871_s3, 7  ;;  %vm2906_vm6 = vcmask 916480  }
  0x96   : > { %s6966_s17 = sshll.u32 %s373_s30, 3 }
  0x97   : > { %417 = vperm.xlu1 %7591, %v399_v5   ;;  %412 = vperm.xlu0 %7590, %v398_v6   ;;  %s8902_s9 = scalar_lea.vmem %s10342_s5, %s6966_s17 }
  0x99   : > { %s367_s18 = sand.u32 1, %s10475_s19  }
  0x9a   : > { %s7439_s15 = smul.u32 608, %s367_s18  ;;  %s6785_s13 = scalar_lea.sflag [#allocation5], %s367_s18 }
  0x9b   : > { %449 = vperm.xlu1 %7591, %v431_v7   ;;  %444 = vperm.xlu0 %7590, %v430_v8  }
  0x9c   : > { %s10124_s16 = scalar_lea.vmem [#allocation9], %s7439_s15 }
  0x9f   : > { %476 = vperm.xlu1 %7591, %v471_v9   ;;  %481 = vperm.xlu0 %7590, %v472_v10  }
  0xa3   : > { %486 = vperm.xlu0 %7590, %v473_v11  }
 0x10e   : > { %v435_v17 = vpop.permute.xlu1 %434  ;;  %v403_v18 = vpop.permute.xlu0 %402 }
 0x10f   : > { %v420_v21 = vmul.f32 %v403_v18, %v388_v14  ;;  %v421_v22 = vmul.f32 %v403_v18, %v389_v15  ;;  %v7872_v18 = vmov 1983009808  }
 0x111   : > { %v453_v31 = vadd.f32 %v435_v17, %v421_v22  ;;  %v452_v32 = vadd.f32 %v435_v17, %v420_v21  ;;  %v7873_v21 = vmov 1934713408  }
 0x112   : > { %v440_v24 = vpop.permute.xlu1 %439  ;;  %v408_v25 = vpop.permute.xlu0 %407  ;;  %v793_v22 = vunpack.c.l.s4 %v7873_v21 }
 0x113   : > { %v422_v27 = vmul.f32 %v408_v25, %v390_v19  ;;  %v423_v28 = vmul.f32 %v408_v25, %v391_v20  ;;  %v461_v39 = vmax.f32 %v453_v31, 0.0  ;;  %v460_v41 = vmax.f32 %v452_v32, 0.0 }
 0x114   : > { %v729_v19 = vunpack.c.l.s4 %v7872_v18  ;;  %v731_v20 = vlaneseq }
 0x115   : > { %v455_v35 = vadd.f32 %v440_v24, %v423_v28  ;;  %v454_v36 = vadd.f32 %v440_v24, %v422_v27  ;;  %v794_v27 = vunpack.c.0.s8 %v793_v22 }
 0x116   : > { %v418_v37 = vpop.permute.xlu1 %417  ;;  %v413_v38 = vpop.permute.xlu0 %412  ;;  %v730_v23 = vunpack.c.0.s8 %v729_v19  ;;  %v732_v24 = vshrl.u32 %v731_v20, 7 }
 0x117   : > { %v463_v40 = vmax.f32 %v455_v35, 0.0  ;;  %v462_v42 = vmax.f32 %v454_v36, 0.0  ;;  %v426_v43 = vmul.f32 %v418_v37, %v394_v29  ;;  %v427_v44 = vmul.f32 %v418_v37, %v395_v30 }
 0x118   : > { %v424_v45 = vmul.f32 %v413_v38, %v392_v33  ;;  %v425_v46 = vmul.f32 %v413_v38, %v393_v34  ;;  %v8298_v28 = vsub.s32 %v730_v23, %v732_v24  ;;  %v8302_v35 = vsub.s32 %v794_v27, %v732_v24 }
 0x119   : > { %v7417_v49 = vpack.c.bf16 %v463_v40, %v461_v39  ;;  %v7419_v50 = vpack.c.bf16 %v462_v42, %v460_v41 }
 0x11a   : > { %v450_v47 = vpop.permute.xlu1 %449  ;;  %v445_v48 = vpop.permute.xlu0 %444 }
 0x11b   : > { %v458_v51 = vadd.f32 %v450_v47, %v426_v43  ;;  %v459_v52 = vadd.f32 %v450_v47, %v427_v44  ;;  %v456_v53 = vadd.f32 %v445_v48, %v424_v45  ;;  %v457_v54 = vadd.f32 %v445_v48, %v425_v46  ;;  %7418 = vmatprep.subr.bf16.mxu0 %v7417_v49 }
 0x11c   : > { %7420 = vmatpush1.bf16.msra.mxu0 %v7419_v50 }
 0x11d   : > { %v466_v55 = vmax.f32 %v458_v51, 0.0  ;;  %v467_v56 = vmax.f32 %v459_v52, 0.0  ;;  %v464_v57 = vmax.f32 %v456_v53, 0.0  ;;  %v465_v58 = vmax.f32 %v457_v54, 0.0 }
 0x11e   : > { %v477_v0 = vpop.permute.xlu1 %476  ;;  %v482_v4 = vpop.permute.xlu0 %481 }
 0x11f   : > { %v7421_v59 = vpack.c.bf16 %v467_v56, %v465_v58  ;;  %v7423_v60 = vpack.c.bf16 %v466_v55, %v464_v57 }
 0x121   : > { %7422 = vmatprep.subr.bf16.mxu0 %v7421_v59 }
 0x122   : > { %7424 = vmatpush1.bf16.msra.mxu0 %v7423_v60  ;;  %v487_v10 = vpop.permute.xlu0 %486 }
 0x125   : > { %6967 = vmatmul.mubr.msk.f32.vlgmr.msra.gmra.mrb[0].mxu0 %vm489_vm0, %v468_v61 }
 0x126   : > { %569 = vmatprep.mubr.f32.mxu0 %v10360_v12 }
 0x129   : > { %6968 = vmatmul.mubr.msk.f32.gmra.mrb[2].mxu0 %vm489_vm0, %v469_v62 }
 0x12a   : > { %575 = vmatprep.mubr.f32.mxu0 %v10360_v12 }
 0x12d   : > { %6969 = vmatmul.mubr.msk.f32.gmra.mrb[4].mxu0 %vm489_vm0, %v470_v63 }
 0x1f8   : > { %v565_v1 = vpop.f32.mrb[0].mxu0 }
 0x1f9   : > { %v8202_v2 = vadd.f32 %v565_v1, %v477_v0  ;;  %v567_v3 = vpop.f32.mrb[1].mxu0 }
 0x1fa   : > { %v8204_v5 = vadd.f32 %v567_v3, %v477_v0 }
 0x1fb   : > { %606 = vrot.lane.b32.xlu0 %v8202_v2, %s7865_s23  ;;  %597 = vrot.lane.b32.xlu1 %v8202_v2, %s7866_s27 }
 0x1fc   : > { %v571_v6 = vpop.f32.mrb[2].mxu0 }
 0x1fd   : > { %v8210_v7 = vadd.f32 %v571_v6, %v482_v4  ;;  %v573_v8 = vpop.f32.mrb[3].mxu0 }
 0x1fe   : > { %v8212_v9 = vadd.f32 %v573_v8, %v482_v4 }
 0x1ff   : > { %624 = vrot.lane.b32.xlu0 %v8202_v2, %s7867_s14  ;;  %615 = vrot.lane.b32.xlu1 %v8202_v2, %s7868_s21 }
 0x200   : > { %v577_v11 = vpop.f32.mrb[4].mxu0 }
 0x201   : > { %v578_v13 = vadd.f32 %v577_v11, %v487_v10  ;;  %v579_v14 = vpop.f32.mrb[5].mxu0 }
 0x202   : > { %v580_v15 = vadd.f32 %v579_v14, %v487_v10 }
 0x203   : > { %586 = vst [vmem:[#allocation2 + $0x20] sm:$0x7] %v578_v13  ;;  %642 = vrot.lane.b32.xlu0 %v8202_v2, %s7869_s25  ;;  %633 = vrot.lane.b32.xlu1 %v8202_v2, %s7870_s8 }
 0x204   : > { %587 = vst [vmem:[#allocation2 + $0x28] sm:$0x7] %v580_v15 }
 0x207   : > { %663 = vrot.lane.b32.xlu0 %v8204_v5, %s7866_s27  ;;  %651 = vrot.lane.b32.xlu1 %v8202_v2, %s7871_s7 }
 0x20a   : > { %v8266_v16 = vld [vmem:[#allocation2 + $0x20] sm:$0x7] }
 0x20b   : > { %681 = vrot.lane.b32.xlu0 %v8204_v5, %s7868_s21  ;;  %672 = vrot.lane.b32.xlu1 %v8204_v5, %s7865_s23  ;;  %v8280_v17 = vld [vmem:[#allocation2 + $0x28] sm:$0x7] }
 0x20f   : > { %699 = vrot.lane.b32.xlu0 %v8204_v5, %s7870_s8  ;;  %690 = vrot.lane.b32.xlu1 %v8204_v5, %s7867_s14 }
 0x213   : > { %608 = vrot.lane.b32.xlu0 %v8210_v7, %s7865_s23  ;;  %599 = vrot.lane.b32.xlu1 %v8210_v7, %s7866_s27 }
 0x217   : > { %626 = vrot.lane.b32.xlu0 %v8210_v7, %s7867_s14  ;;  %617 = vrot.lane.b32.xlu1 %v8210_v7, %s7868_s21 }
 0x21b   : > { %644 = vrot.lane.b32.xlu0 %v8210_v7, %s7869_s25  ;;  %635 = vrot.lane.b32.xlu1 %v8210_v7, %s7870_s8 }
 0x21f   : > { %665 = vrot.lane.b32.xlu0 %v8212_v9, %s7866_s27  ;;  %653 = vrot.lane.b32.xlu1 %v8210_v7, %s7871_s7 }
 0x223   : > { %683 = vrot.lane.b32.xlu0 %v8212_v9, %s7868_s21  ;;  %674 = vrot.lane.b32.xlu1 %v8212_v9, %s7865_s23 }
 0x227   : > { %701 = vrot.lane.b32.xlu0 %v8212_v9, %s7870_s8  ;;  %692 = vrot.lane.b32.xlu1 %v8212_v9, %s7867_s14 }
 0x22b   : > { %719 = vrot.lane.b32.xlu0 %v8212_v9, %s7871_s7  ;;  %710 = vrot.lane.b32.xlu1 %v8212_v9, %s7869_s25 }
 0x22f   : > { %717 = vrot.lane.b32.xlu0 %v8204_v5, %s7871_s7  ;;  %708 = vrot.lane.b32.xlu1 %v8204_v5, %s7869_s25 }
 0x233   : > { %610 = vrot.lane.b32.xlu0 %v8266_v16, %s7865_s23  ;;  %601 = vrot.lane.b32.xlu1 %v8266_v16, %s7866_s27 }
 0x237   : > { %628 = vrot.lane.b32.xlu0 %v8266_v16, %s7867_s14  ;;  %619 = vrot.lane.b32.xlu1 %v8266_v16, %s7868_s21 }
 0x23b   : > { %646 = vrot.lane.b32.xlu0 %v8266_v16, %s7869_s25  ;;  %637 = vrot.lane.b32.xlu1 %v8266_v16, %s7870_s8 }
 0x23f   : > { %667 = vrot.lane.b32.xlu0 %v8280_v17, %s7866_s27  ;;  %655 = vrot.lane.b32.xlu1 %v8266_v16, %s7871_s7 }
 0x243   : > { %685 = vrot.lane.b32.xlu0 %v8280_v17, %s7868_s21  ;;  %676 = vrot.lane.b32.xlu1 %v8280_v17, %s7865_s23 }
 0x247   : > { %703 = vrot.lane.b32.xlu0 %v8280_v17, %s7870_s8  ;;  %694 = vrot.lane.b32.xlu1 %v8280_v17, %s7867_s14 }
 0x24b   : > { %721 = vrot.lane.b32.xlu0 %v8280_v17, %s7871_s7  ;;  %712 = vrot.lane.b32.xlu1 %v8280_v17, %s7869_s25 }
 0x26d   : > { %v607_v25 = vpop.permute.xlu0 %606  ;;  %v598_v26 = vpop.permute.xlu1 %597 }
 0x26e   : > { %v726_v29 = vcombine.low %v8202_v2, %v607_v25  ;;  %v727_v30 = vcombine.high %v8202_v2, %v607_v25 }
 0x270   : > { %v734_v36 = vrot.slane %v726_v29, %v8298_v28  ;;  %v741_v37 = vrot.slane %v727_v30, %v8298_v28 }
 0x271   : > { %v625_v31 = vpop.permute.xlu0 %624  ;;  %v616_v32 = vpop.permute.xlu1 %615 }
 0x272   : > { %v742_v33 = vcombine.low %v598_v26, %v616_v32  ;;  %v743_v34 = vcombine.high %v598_v26, %v616_v32 }
 0x274   : > { %v750_v38 = vrot.slane %v742_v33, %v8298_v28  ;;  %v757_v39 = vrot.slane %v743_v34, %v8298_v28 }
 0x275   : > { %v643_v40 = vpop.permute.xlu0 %642  ;;  %v634_v41 = vpop.permute.xlu1 %633 }
 0x276   : > { %v790_v42 = vcombine.low %v734_v36, %v750_v38  ;;  %v791_v43 = vcombine.high %v734_v36, %v750_v38  ;;  %v806_v44 = vcombine.low %v741_v37, %v757_v39  ;;  %v807_v45 = vcombine.high %v741_v37, %v757_v39 }
 0x277   : > { %v758_v50 = vcombine.low %v625_v31, %v643_v40  ;;  %v759_v51 = vcombine.high %v625_v31, %v643_v40 }
 0x278   : > { %v798_v46 = vrot.slane %v790_v42, %v8302_v35  ;;  %v805_v47 = vrot.slane %v791_v43, %v8302_v35  ;;  %v814_v48 = vrot.slane %v806_v44, %v8302_v35  ;;  %v821_v49 = vrot.slane %v807_v45, %v8302_v35 }
 0x279   : > { %v664_v52 = vpop.permute.xlu0 %663  ;;  %v652_v53 = vpop.permute.xlu1 %651  ;;  %v766_v62 = vrot.slane %v758_v50, %v8298_v28  ;;  %v773_v63 = vrot.slane %v759_v51, %v8298_v28 }
 0x27a   : > { %v6970_v54 = vcombine.low %v798_v46, %v805_v47  ;;  %v6972_v55 = vcombine.high %v798_v46, %v805_v47  ;;  %v6974_v56 = vcombine.low %v814_v48, %v821_v49  ;;  %v6976_v57 = vcombine.high %v814_v48, %v821_v49 }
 0x27b   : > { %v774_v58 = vcombine.low %v634_v41, %v652_v53  ;;  %v775_v59 = vcombine.high %v634_v41, %v652_v53 }
 0x27c   : > { %v8313_v60 = vrot.slane %v6970_v54, %v8298_v28  ;;  %v8316_v61 = vrot.slane %v6972_v55, %v8298_v28  ;;  %v8323_v4 = vrot.slane %v6974_v56, %v8298_v28  ;;  %v8326_v6 = vrot.slane %v6976_v57, %v8298_v28 }
 0x27d   : > { %v782_v0 = vrot.slane %v774_v58, %v8298_v28  ;;  %v789_v1 = vrot.slane %v775_v59, %v8298_v28  ;;  %v682_v2 = vpop.permute.xlu0 %681  ;;  %v673_v3 = vpop.permute.xlu1 %672 }
 0x27e   : > { %v1468_v8 = vcombine.low %v8313_v60, %v8316_v61  ;;  %v1469_v10 = vcombine.high %v8313_v60, %v8316_v61  ;;  %v878_v18 = vcombine.low %v664_v52, %v682_v2  ;;  %v879_v19 = vcombine.high %v664_v52, %v682_v2 }
 0x27f   : > { %v822_v11 = vcombine.low %v766_v62, %v782_v0  ;;  %v823_v13 = vcombine.high %v766_v62, %v782_v0  ;;  %v838_v14 = vcombine.low %v773_v63, %v789_v1  ;;  %v839_v15 = vcombine.high %v773_v63, %v789_v1 }
 0x280   : > { %v862_v20 = vcombine.low %v8204_v5, %v673_v3  ;;  %v863_v21 = vcombine.high %v8204_v5, %v673_v3  ;;  %v886_v29 = vrot.slane %v878_v18, %v8298_v28  ;;  %v893_v30 = vrot.slane %v879_v19, %v8298_v28 }
 0x281   : > { %v830_v22 = vrot.slane %v822_v11, %v8302_v35  ;;  %v837_v23 = vrot.slane %v823_v13, %v8302_v35  ;;  %v846_v24 = vrot.slane %v838_v14, %v8302_v35  ;;  %v853_v25 = vrot.slane %v839_v15, %v8302_v35  ;;  %v8338_v26 = vpop.permute.xlu0 %699  ;;  %v8340_v27 = vpop.permute.xlu1 %690 }
 0x282   : > { %v870_v31 = vrot.slane %v862_v20, %v8298_v28  ;;  %v877_v5 = vrot.slane %v863_v21, %v8298_v28  ;;  %v1476_v15 = vrot.slane %v1468_v8, %v8302_v35  ;;  %v1483_v18 = vrot.slane %v1469_v10, %v8302_v35 }
 0x283   : > { %v6971_v32 = vcombine.low %v830_v22, %v837_v23  ;;  %v6973_v33 = vcombine.high %v830_v22, %v837_v23  ;;  %v6975_v34 = vcombine.low %v846_v24, %v853_v25  ;;  %v6977_v36 = vcombine.high %v846_v24, %v853_v25 }
 0x284   : > { %v926_v37 = vcombine.low %v870_v31, %v886_v29  ;;  %v927_v38 = vcombine.high %v870_v31, %v886_v29  ;;  %v942_v39 = vcombine.low %v877_v5, %v893_v30  ;;  %v943_v40 = vcombine.high %v877_v5, %v893_v30 }
 0x285   : > { %v1419_v41 = vrot.slane %v6971_v32, %v8298_v28  ;;  %v1435_v42 = vrot.slane %v6973_v33, %v8298_v28  ;;  %v8349_v43 = vrot.slane %v6975_v34, %v8298_v28  ;;  %v8352_v44 = vrot.slane %v6977_v36, %v8298_v28  ;;  %v609_v45 = vpop.permute.xlu0 %608  ;;  %v600_v46 = vpop.permute.xlu1 %599 }
 0x286   : > { %v934_v47 = vrot.slane %v926_v37, %v8302_v35  ;;  %v941_v48 = vrot.slane %v927_v38, %v8302_v35  ;;  %v950_v49 = vrot.slane %v942_v39, %v8302_v35  ;;  %v957_v50 = vrot.slane %v943_v40, %v8302_v35 }
 0x287   : > { %v1484_v53 = vcombine.low %v1419_v41, %v1435_v42  ;;  %v1485_v54 = vcombine.high %v1419_v41, %v1435_v42  ;;  %v998_v61 = vcombine.low %v8210_v7, %v609_v45  ;;  %v999_v62 = vcombine.high %v8210_v7, %v609_v45 }
 0x288   : > { %v6989_v55 = vcombine.low %v934_v47, %v941_v48  ;;  %v6991_v56 = vcombine.high %v934_v47, %v941_v48  ;;  %v6993_v57 = vcombine.low %v950_v49, %v957_v50  ;;  %v6995_v58 = vcombine.high %v950_v49, %v957_v50 }
 0x289   : > { %v627_v63 = vpop.permute.xlu0 %626  ;;  %v618_v0 = vpop.permute.xlu1 %617  ;;  %v1006_v20 = vrot.slane %v998_v61, %v8298_v28  ;;  %v1013_v21 = vrot.slane %v999_v62, %v8298_v28  ;;  %v8387_v31 = vrot.slane %v1484_v53, %v8302_v35  ;;  %v8390_v5 = vrot.slane %v1485_v54, %v8302_v35 }
 0x28a   : > { %v1751_v1 = vrot.slane %v6989_v55, %v8298_v28  ;;  %v1767_v2 = vrot.slane %v6991_v56, %v8298_v28  ;;  %v8371_v3 = vrot.slane %v6993_v57, %v8298_v28  ;;  %v8374_v11 = vrot.slane %v6995_v58, %v8298_v28 }
 0x28b   : > { %v1014_v13 = vcombine.low %v600_v46, %v618_v0  ;;  %v1015_v14 = vcombine.high %v600_v46, %v618_v0  ;;  %v7008_v39 = vcombine.low %v1476_v15, %v1483_v18  ;;  %v7010_v40 = vcombine.high %v1476_v15, %v1483_v18 }
 0x28c   : > { %v1807_v19 = vcombine.low %v1751_v1, %v1767_v2  ;;  %v1808_v7 = vcombine.high %v1751_v1, %v1767_v2  ;;  %v7012_v15 = vcombine.low %v8387_v31, %v8390_v5 }
 0x28d   : > { %v1022_v24 = vrot.slane %v1014_v13, %v8298_v28  ;;  %v1029_v25 = vrot.slane %v1015_v14, %v8298_v28  ;;  %v645_v29 = vpop.permute.xlu0 %644  ;;  %v636_v8 = vpop.permute.xlu1 %635  ;;  %v8410_v0 = vrot.slane %v7010_v40, %v8298_v28 }
 0x28e   : > { %v1030_v30 = vcombine.low %v627_v63, %v645_v29  ;;  %v1031_v10 = vcombine.high %v627_v63, %v645_v29  ;;  %v8393_v37 = vrot.slane %v1807_v19, %v8302_v35  ;;  %v8396_v38 = vrot.slane %v1808_v7, %v8302_v35 }
 0x28f   : > { %v1062_v32 = vcombine.low %v1006_v20, %v1022_v24  ;;  %v1063_v33 = vcombine.high %v1006_v20, %v1022_v24  ;;  %v1078_v34 = vcombine.low %v1013_v21, %v1029_v25  ;;  %v1079_v36 = vcombine.high %v1013_v21, %v1029_v25 }
 0x290   : > { %v1038_v49 = vrot.slane %v1030_v30, %v8298_v28  ;;  %v1045_v50 = vrot.slane %v1031_v10, %v8298_v28  ;;  %v8407_v63 = vrot.slane %v7008_v39, %v8298_v28 }
 0x291   : > { %v1070_v41 = vrot.slane %v1062_v32, %v8302_v35  ;;  %v1077_v42 = vrot.slane %v1063_v33, %v8302_v35  ;;  %v1086_v45 = vrot.slane %v1078_v34, %v8302_v35  ;;  %v1093_v46 = vrot.slane %v1079_v36, %v8302_v35  ;;  %v666_v47 = vpop.permute.xlu0 %665  ;;  %v654_v48 = vpop.permute.xlu1 %653 }
 0x292   : > { %v1046_v53 = vcombine.low %v636_v8, %v654_v48  ;;  %v1047_v54 = vcombine.high %v636_v8, %v654_v48 }
 0x293   : > { %v6978_v55 = vcombine.low %v1070_v41, %v1077_v42  ;;  %v6980_v56 = vcombine.high %v1070_v41, %v1077_v42  ;;  %v6982_v57 = vcombine.low %v1086_v45, %v1093_v46  ;;  %v6984_v58 = vcombine.high %v1086_v45, %v1093_v46 }
 0x294   : > { %v1054_v61 = vrot.slane %v1046_v53, %v8298_v28  ;;  %v1061_v62 = vrot.slane %v1047_v54, %v8298_v28 }
 0x295   : > { %v8413_v1 = vrot.slane %v6978_v55, %v8298_v28  ;;  %v8416_v2 = vrot.slane %v6980_v56, %v8298_v28  ;;  %v684_v13 = vpop.permute.xlu0 %683  ;;  %v675_v14 = vpop.permute.xlu1 %674  ;;  %v8423_v24 = vrot.slane %v6982_v57, %v8298_v28  ;;  %v8426_v25 = vrot.slane %v6984_v58, %v8298_v28 }
 0x296   : > { %v1094_v19 = vcombine.low %v1038_v49, %v1054_v61  ;;  %v1095_v7 = vcombine.high %v1038_v49, %v1054_v61  ;;  %v1110_v20 = vcombine.low %v1045_v50, %v1061_v62  ;;  %v1111_v21 = vcombine.high %v1045_v50, %v1061_v62 }
 0x297   : > { %v1604_v29 = vcombine.low %v8413_v1, %v8416_v2  ;;  %v1605_v8 = vcombine.high %v8413_v1, %v8416_v2  ;;  %v1150_v34 = vcombine.low %v666_v47, %v684_v13  ;;  %v1151_v36 = vcombine.high %v666_v47, %v684_v13 }
 0x298   : > { %v1102_v30 = vrot.slane %v1094_v19, %v8302_v35  ;;  %v1109_v10 = vrot.slane %v1095_v7, %v8302_v35  ;;  %v1118_v32 = vrot.slane %v1110_v20, %v8302_v35  ;;  %v1125_v33 = vrot.slane %v1111_v21, %v8302_v35 }
 0x299   : > { %v1134_v39 = vcombine.low %v8212_v9, %v675_v14  ;;  %v1135_v40 = vcombine.high %v8212_v9, %v675_v14  ;;  %v702_v41 = vpop.permute.xlu0 %701  ;;  %v693_v42 = vpop.permute.xlu1 %692  ;;  %v1158_v50 = vrot.slane %v1150_v34, %v8298_v28  ;;  %v1165_v53 = vrot.slane %v1151_v36, %v8298_v28 }
 0x29a   : > { %v6979_v45 = vcombine.low %v1102_v30, %v1109_v10  ;;  %v6981_v46 = vcombine.high %v1102_v30, %v1109_v10  ;;  %v6983_v48 = vcombine.low %v1118_v32, %v1125_v33  ;;  %v6985_v49 = vcombine.high %v1118_v32, %v1125_v33 }
 0x29b   : > { %v1142_v54 = vrot.slane %v1134_v39, %v8298_v28  ;;  %v1149_v55 = vrot.slane %v1135_v40, %v8298_v28 }
 0x29c   : > { %v8447_v56 = vrot.slane %v6979_v45, %v8298_v28  ;;  %v8450_v57 = vrot.slane %v6981_v46, %v8298_v28  ;;  %v8453_v7 = vrot.slane %v6983_v48, %v8298_v28  ;;  %v8456_v20 = vrot.slane %v6985_v49, %v8298_v28 }
 0x29d   : > { %v1198_v58 = vcombine.low %v1142_v54, %v1158_v50  ;;  %v1199_v61 = vcombine.high %v1142_v54, %v1158_v50  ;;  %v1214_v62 = vcombine.low %v1149_v55, %v1165_v53  ;;  %v1215_v13 = vcombine.high %v1149_v55, %v1165_v53  ;;  %v720_v14 = vpop.permute.xlu0 %719  ;;  %v711_v19 = vpop.permute.xlu1 %710 }
 0x29e   : > { %v1620_v21 = vcombine.low %v8447_v56, %v8450_v57  ;;  %v1621_v30 = vcombine.high %v8447_v56, %v8450_v57  ;;  %v1182_v36 = vcombine.low %v702_v41, %v720_v14  ;;  %v1183_v39 = vcombine.high %v702_v41, %v720_v14 }
 0x29f   : > { %v1206_v10 = vrot.slane %v1198_v58, %v8302_v35  ;;  %v1213_v32 = vrot.slane %v1199_v61, %v8302_v35  ;;  %v1222_v33 = vrot.slane %v1214_v62, %v8302_v35  ;;  %v1229_v34 = vrot.slane %v1215_v13, %v8302_v35 }
 0x2a0   : > { %v1166_v40 = vcombine.low %v693_v42, %v711_v19  ;;  %v1167_v45 = vcombine.high %v693_v42, %v711_v19  ;;  %v1190_v55 = vrot.slane %v1182_v36, %v8298_v28  ;;  %v1197_v58 = vrot.slane %v1183_v39, %v8298_v28 }
 0x2a1   : > { %v6997_v46 = vcombine.low %v1206_v10, %v1213_v32  ;;  %v6999_v48 = vcombine.high %v1206_v10, %v1213_v32  ;;  %v7001_v49 = vcombine.low %v1222_v33, %v1229_v34  ;;  %v7003_v50 = vcombine.high %v1222_v33, %v1229_v34  ;;  %v718_v53 = vpop.permute.xlu0 %717  ;;  %v709_v54 = vpop.permute.xlu1 %708 }
 0x2a2   : > { %v1174_v61 = vrot.slane %v1166_v40, %v8298_v28  ;;  %v1181_v62 = vrot.slane %v1167_v45, %v8298_v28  ;;  %v895_v23 = vcombine.high %v8340_v27, %v709_v54  ;;  %v1635_v1 = vrot.slane %v1621_v30, %v8302_v35 }
 0x2a3   : > { %v8475_v42 = vrot.slane %v6997_v46, %v8298_v28  ;;  %v8478_v14 = vrot.slane %v6999_v48, %v8298_v28  ;;  %v8481_v34 = vrot.slane %v7001_v49, %v8298_v28  ;;  %v8484_v36 = vrot.slane %v7003_v50, %v8298_v28 }
 0x2a4   : > { %v1230_v19 = vcombine.low %v1174_v61, %v1190_v55  ;;  %v1231_v10 = vcombine.high %v1174_v61, %v1190_v55  ;;  %v1246_v32 = vcombine.low %v1181_v62, %v1197_v58  ;;  %v1247_v33 = vcombine.high %v1181_v62, %v1197_v58 }
 0x2a5   : > { %v1943_v39 = vcombine.low %v8475_v42, %v8478_v14  ;;  %v1944_v40 = vcombine.high %v8475_v42, %v8478_v14  ;;  %v611_v45 = vpop.permute.xlu0 %610  ;;  %v602_v46 = vpop.permute.xlu1 %601  ;;  %v910_v61 = vcombine.low %v8338_v26, %v718_v53  ;;  %v911_v50 = vcombine.high %v8338_v26, %v718_v53 }
 0x2a6   : > { %v1238_v48 = vrot.slane %v1230_v19, %v8302_v35  ;;  %v1245_v55 = vrot.slane %v1231_v10, %v8302_v35  ;;  %v1254_v58 = vrot.slane %v1246_v32, %v8302_v35  ;;  %v1261_v49 = vrot.slane %v1247_v33, %v8302_v35 }
 0x2a7   : > { %v894_v62 = vcombine.low %v8340_v27, %v709_v54  ;;  %v918_v19 = vrot.slane %v910_v61, %v8298_v28  ;;  %v925_v10 = vrot.slane %v911_v50, %v8298_v28  ;;  %v909_v33 = vrot.slane %v895_v23, %v8298_v28 }
 0x2a8   : > { %v6998_v22 = vcombine.low %v1238_v48, %v1245_v55  ;;  %v7000_v60 = vcombine.high %v1238_v48, %v1245_v55  ;;  %v7002_v59 = vcombine.low %v1254_v58, %v1261_v49  ;;  %v7004_v52 = vcombine.high %v1254_v58, %v1261_v49 }
 0x2a9   : > { %v902_v32 = vrot.slane %v894_v62, %v8298_v28  ;;  %v629_v51 = vpop.permute.xlu0 %628  ;;  %v620_v41 = vpop.permute.xlu1 %619  ;;  %v974_v58 = vcombine.low %v909_v33, %v925_v10  ;;  %v975_v49 = vcombine.high %v909_v33, %v925_v10  ;;  %v1958_v56 = vrot.slane %v1944_v40, %v8302_v35 }
 0x2aa   : > { %v1894_v26 = vrot.slane %v6998_v22, %v8298_v28  ;;  %v1910_v53 = vrot.slane %v7000_v60, %v8298_v28  ;;  %v1926_v27 = vrot.slane %v7002_v59, %v8298_v28  ;;  %v1942_v54 = vrot.slane %v7004_v52, %v8298_v28 }
 0x2ab   : > { %v958_v48 = vcombine.low %v902_v32, %v918_v19  ;;  %v959_v55 = vcombine.high %v902_v32, %v918_v19  ;;  %v982_v60 = vrot.slane %v974_v58, %v8302_v35  ;;  %v989_v59 = vrot.slane %v975_v49, %v8302_v35 }
 0x2ac   : > { %v1959_v50 = vcombine.low %v1894_v26, %v1910_v53  ;;  %v1960_v62 = vcombine.high %v1894_v26, %v1910_v53  ;;  %v1991_v23 = vcombine.low %v1926_v27, %v1942_v54  ;;  %v1992_v33 = vcombine.high %v1926_v27, %v1942_v54 }
 0x2ad   : > { %v966_v13 = vrot.slane %v958_v48, %v8302_v35  ;;  %v973_v22 = vrot.slane %v959_v55, %v8302_v35  ;;  %v647_v9 = vpop.permute.xlu0 %646  ;;  %v638_v52 = vpop.permute.xlu1 %637  ;;  %v6994_v48 = vcombine.low %v982_v60, %v989_v59  ;;  %v6996_v55 = vcombine.high %v982_v60, %v989_v59 }
 0x2ae   : > { %v8515_v10 = vrot.slane %v1959_v50, %v8302_v35  ;;  %v8518_v32 = vrot.slane %v1960_v62, %v8302_v35  ;;  %v8521_v58 = vrot.slane %v1991_v23, %v8302_v35  ;;  %v1270_v49 = vcombine.low %v8266_v16, %v611_v45 }
 0x2af   : > { %v6990_v26 = vcombine.low %v966_v13, %v973_v22  ;;  %v6992_v53 = vcombine.high %v966_v13, %v973_v22  ;;  %v1278_v61 = vcombine.low %v602_v46, %v620_v41  ;;  %v1286_v47 = vcombine.low %v629_v51, %v647_v9 }
 0x2b0   : > { %v1790_v18 = vrot.slane %v6994_v48, %v8298_v28  ;;  %v1806_v62 = vrot.slane %v6996_v55, %v8298_v28  ;;  %v8529_v13 = vrot.slane %v1992_v33, %v8302_v35  ;;  %v1277_v23 = vrot.slane %v1270_v49, %v8298_v28 }
 0x2b1   : > { %v1758_v19 = vrot.slane %v6990_v26, %v8298_v28  ;;  %v1774_v50 = vrot.slane %v6992_v53, %v8298_v28  ;;  %v668_v27 = vpop.permute.xlu0 %667  ;;  %v656_v54 = vpop.permute.xlu1 %655  ;;  %v1285_v22 = vrot.slane %v1278_v61, %v8298_v28  ;;  %v1293_v9 = vrot.slane %v1286_v47, %v8298_v28 }
 0x2b2   : > { %v1294_v16 = vcombine.low %v638_v52, %v656_v54  ;;  %v1612_v45 = vrot.slane %v1604_v29, %v8302_v35  ;;  %v1855_v46 = vcombine.low %v1790_v18, %v1806_v62  ;;  %v1856_v52 = vcombine.high %v1790_v18, %v1806_v62 }
 0x2b3   : > { %v1823_v41 = vcombine.low %v1758_v19, %v1774_v50  ;;  %v1824_v51 = vcombine.high %v1758_v19, %v1774_v50  ;;  %v1302_v60 = vcombine.low %v1277_v23, %v1285_v22  ;;  %v1303_v59 = vcombine.high %v1277_v23, %v1285_v22 }
 0x2b4   : > { %v1301_v33 = vrot.slane %v1294_v16, %v8298_v28  ;;  %v1619_v47 = vrot.slane %v1605_v8, %v8302_v35  ;;  %v1628_v18 = vrot.slane %v1620_v21, %v8302_v35 }
 0x2b5   : > { %v8540_v26 = vrot.slane %v1823_v41, %v8302_v35  ;;  %v8543_v61 = vrot.slane %v1824_v51, %v8302_v35  ;;  %v686_v19 = vpop.permute.xlu0 %685  ;;  %v677_v53 = vpop.permute.xlu1 %676  ;;  %v1310_v29 = vrot.slane %v1302_v60, %v8302_v35  ;;  %v1317_v48 = vrot.slane %v1303_v59, %v8302_v35 }
 0x2b6   : > { %v1318_v55 = vcombine.low %v1293_v9, %v1301_v33  ;;  %v1319_v49 = vcombine.high %v1293_v9, %v1301_v33  ;;  %v1345_v50 = vcombine.low %v668_v27, %v686_v19  ;;  %v1337_v54 = vcombine.low %v8280_v17, %v677_v53 }
 0x2b7   : > { %v6986_v2 = vcombine.low %v1310_v29, %v1317_v48  ;;  %v1951_v17 = vrot.slane %v1943_v39, %v8302_v35  ;;  %v7024_v57 = vcombine.low %v1612_v45, %v1619_v47  ;;  %v7026_v59 = vcombine.high %v1612_v45, %v1619_v47 }
 0x2b8   : > { %v1326_v8 = vrot.slane %v1318_v55, %v8302_v35  ;;  %v1333_v62 = vrot.slane %v1319_v49, %v8302_v35  ;;  %v1352_v27 = vrot.slane %v1345_v50, %v8298_v28  ;;  %v1344_v23 = vrot.slane %v1337_v54, %v8298_v28 }
 0x2b9   : > { %v704_v21 = vpop.permute.xlu0 %703  ;;  %v8573_v30 = vrot.slane %v6986_v2, %v8298_v28  ;;  %v695_v51 = vpop.permute.xlu1 %694  ;;  %v2362_v60 = vrot.slane %v7024_v57, %v8298_v28  ;;  %v7028_v14 = vcombine.low %v1628_v18, %v1635_v1  ;;  %v7030_v48 = vcombine.high %v1628_v18, %v1635_v1 }
 0x2ba   : > { %v1335_v22 = vcombine.high %v1310_v29, %v1326_v8  ;;  %v6987_v16 = vcombine.low %v1326_v8, %v1333_v62  ;;  %v6988_v41 = vcombine.high %v1326_v8, %v10360_v12  ;;  %v1369_v39 = vcombine.low %v1344_v23, %v1352_v27 }
 0x2bb   : > { %v1370_v9 = vcombine.high %v1344_v23, %v1352_v27  ;;  %v2378_v29 = vrot.slane %v7026_v59, %v8298_v28  ;;  %v8588_v55 = vrot.slane %v1855_v46, %v8302_v35  ;;  %v8591_v45 = vrot.slane %v1856_v52, %v8302_v35 }
 0x2bc   : > { %v1691_v33 = vrot.slane %v6987_v16, %v8298_v28  ;;  %v8579_v19 = vrot.slane %v1335_v22, %v8298_v28  ;;  %v1706_v42 = vrot.slane %v6988_v41, %v8298_v28  ;;  %v8583_v40 = vrot.slane %v1369_v39, %v8302_v35 }
 0x2bd   : > { %v1384_v53 = vrot.slane %v1370_v9, %v8302_v35  ;;  %v2394_v54 = vrot.slane %v7028_v14, %v8298_v28  ;;  %v2410_v2 = vrot.slane %v7030_v48, %v8298_v28  ;;  %v2418_v8 = vcombine.low %v2362_v60, %v2378_v29  ;;  %v722_v62 = vpop.permute.xlu0 %721  ;;  %v713_v52 = vpop.permute.xlu1 %712 }
 0x2be   : > { %v1707_v47 = vcombine.low %v8573_v30, %v8579_v19  ;;  %v1723_v49 = vcombine.low %v1691_v33, %v1706_v42  ;;  %v1708_v50 = vcombine.high %v8573_v30, %v8579_v19  ;;  %v1724_v18 = vcombine.high %v1691_v33, %v1706_v42 }
 0x2bf   : > { %v7005_v46 = vcombine.low %v8583_v40, %v1384_v53  ;;  %v7032_v1 = vcombine.low %v1951_v17, %v1958_v56  ;;  %v7034_v27 = vcombine.high %v1951_v17, %v1958_v56  ;;  %v8604_v57 = vrot.slane %v2418_v8, %v8302_v35 }
 0x2c0   : > { %v8601_v23 = vrot.slane %v1723_v49, %v8302_v35  ;;  %v2450_v22 = vcombine.low %v2394_v54, %v2410_v2  ;;  %v7036_v16 = vcombine.low %v8515_v10, %v8518_v32  ;;  %v7038_v9 = vcombine.high %v8515_v10, %v8518_v32 }
 0x2c1   : > { %v2498_v41 = vrot.slane %v7032_v1, %v8298_v28  ;;  %v2514_v39 = vrot.slane %v7034_v27, %v8298_v28  ;;  %v1361_v59 = vcombine.low %v704_v21, %v722_v62  ;;  %v1353_v33 = vcombine.low %v695_v51, %v713_v52 }
 0x2c2   : > { %v8613_v17 = vrot.slane %v2450_v22, %v8302_v35  ;;  %v2530_v56 = vrot.slane %v7036_v16, %v8298_v28  ;;  %v2419_v42 = vcombine.high %v2362_v60, %v2378_v29  ;;  %v2546_v14 = vrot.slane %v7038_v9, %v8298_v28 }
 0x2c3   : > { %v2554_v53 = vcombine.low %v2498_v41, %v2514_v39  ;;  %v1368_v48 = vrot.slane %v1361_v59, %v8298_v28  ;;  %v2451_v49 = vcombine.high %v2394_v54, %v2410_v2  ;;  %v8619_v8 = vrot.slane %v1724_v18, %v8302_v35 }
 0x2c4   : > { %v2483_v32 = vcombine.high %v8604_v57, %v8613_v17  ;;  %v1360_v21 = vrot.slane %v1353_v33, %v8298_v28  ;;  %v2586_v60 = vcombine.low %v2530_v56, %v2546_v14  ;;  %v2433_v29 = vrot.slane %v2419_v42, %v8302_v35 }
 0x2c5   : > { %v8627_v51 = vrot.slane %v2554_v53, %v8302_v35  ;;  %v2555_v62 = vcombine.high %v2498_v41, %v2514_v39  ;;  %v2587_v2 = vcombine.high %v2530_v56, %v2546_v14  ;;  %v2122_v18 = vrot.slane %v7012_v15, %v8298_v28 }
 0x2c6   : > { %v1385_v1 = vcombine.low %v1360_v21, %v1368_v48  ;;  %v1386_v54 = vcombine.high %v1360_v21, %v1368_v48  ;;  %v8635_v27 = vrot.slane %v2586_v60, %v8302_v35  ;;  %v2465_v52 = vrot.slane %v2451_v49, %v8302_v35 }
 0x2c7   : > { %v2569_v22 = vrot.slane %v2555_v62, %v8302_v35  ;;  %v10415_v16 = vcombine.high %v8387_v31, %v8390_v5  ;;  %v2601_v59 = vrot.slane %v2587_v2, %v8302_v35  ;;  %v2146_v15 = vcombine.low %v8407_v63, %v8410_v0 }
 0x2c8   : > { %v1393_v39 = vrot.slane %v1385_v1, %v8302_v35  ;;  %v1400_v9 = vrot.slane %v1386_v54, %v8302_v35  ;;  %v2619_v56 = vcombine.high %v8627_v51, %v8635_v27  ;;  %v2618_v33 = vcombine.low %v8627_v51, %v8635_v27 }
 0x2c9   : > { %v2138_v41 = vrot.slane %v10415_v16, %v8298_v28  ;;  %v7016_v31 = vcombine.low %v8393_v37, %v8396_v38  ;;  %v2620_v48 = vcombine.low %v2569_v22, %v2601_v59  ;;  %v8657_v49 = vrot.slane %v7005_v46, %v8298_v28 }
 0x2ca   : > { %v1402_v5 = vcombine.high %v8583_v40, %v1393_v39  ;;  %v7006_v14 = vcombine.low %v1393_v39, %v1400_v9  ;;  %v7007_v53 = vcombine.high %v1393_v39, %v10360_v12  ;;  %v7622_v21 = vpack.i.bf16 %v2619_v56, %v2483_v32 }
 0x2cb   : > { %v2178_v42 = vcombine.low %v2122_v18, %v2138_v41  ;;  %v8660_v60 = vrot.slane %v2146_v15, %v8302_v35  ;;  %v2484_v2 = vcombine.low %v2433_v29, %v2465_v52  ;;  %v2226_v32 = vrot.slane %v7016_v31, %v8298_v28 }
 0x2cc   : > { %v8666_v1 = vrot.slane %v7006_v14, %v8298_v28  ;;  %v8669_v54 = vrot.slane %v1402_v5, %v8298_v28  ;;  %v8672_v40 = vrot.slane %v7007_v53, %v8298_v28  ;;  %7623 = vrot.lane.b32.xlu1 %v7622_v21, %s7871_s7  ;;  %v7018_v16 = vcombine.high %v8393_v37, %v8396_v38 }
 0x2cd   : > { %v8663_v62 = vrot.slane %v2178_v42, %v8302_v35  ;;  %v7020_v39 = vcombine.low %v8540_v26, %v8543_v61  ;;  %v7627_v56 = vpack.i.bf16 %v2620_v48, %v2484_v2  ;;  %v7022_v38 = vcombine.high %v8540_v26, %v8543_v61 }
 0x2ce   : > { %v2046_v9 = vcombine.low %v8657_v49, %v8669_v54  ;;  %v2062_v15 = vcombine.low %v8666_v1, %v8672_v40  ;;  %v2047_v5 = vcombine.high %v8657_v49, %v8669_v54  ;;  %v2242_v31 = vrot.slane %v7018_v16, %v8298_v28 }
 0x2cf   : > { %v2211_v42 = vcombine.high %v8660_v60, %v8663_v62  ;;  %v2258_v37 = vrot.slane %v7020_v39, %v8298_v28  ;;  %v2063_v14 = vcombine.high %v8666_v1, %v8672_v40  ;;  %v2485_v53 = vcombine.high %v2433_v29, %v2465_v52 }
 0x2d0   : > { %v2621_v21 = vcombine.high %v2569_v22, %v2601_v59  ;;  %v2147_v48 = vcombine.high %v8407_v63, %v8410_v0  ;;  %7628 = vrot.lane.b32.xlu1 %v7627_v56, %s7869_s25  ;;  %v2274_v2 = vrot.slane %v7022_v38, %v8298_v28  ;;  %v2282_v12 = vcombine.low %v2226_v32, %v2242_v31 }
 0x2d1   : > { %v2179_v46 = vcombine.high %v2122_v18, %v2138_v41  ;;  %v2283_v16 = vcombine.high %v2226_v32, %v2242_v31  ;;  %v8701_v39 = vrot.slane %v2062_v15, %v8302_v35  ;;  %v10416_v26 = vcombine.low %v8423_v24, %v8426_v25 }
 0x2d2   : > { %v7632_v10 = vpack.i.bf16 %v2621_v21, %v2485_v53  ;;  %v10417_v63 = vcombine.high %v8423_v24, %v8426_v25  ;;  %v8712_v29 = vrot.slane %v2282_v12, %v8302_v35  ;;  %v2314_v52 = vcombine.low %v2258_v37, %v2274_v2 }
 0x2d3   : > { %v1644_v61 = vrot.slane %v10416_v26, %v8302_v35  ;;  %v2161_v18 = vrot.slane %v2147_v48, %v8302_v35  ;;  %v2193_v22 = vrot.slane %v2179_v46, %v8302_v35  ;;  %v2315_v41 = vcombine.high %v2258_v37, %v2274_v2 }
 0x2d4   : > { %v1651_v0 = vrot.slane %v10417_v63, %v8302_v35  ;;  %v10418_v59 = vcombine.low %v8453_v7, %v8456_v20  ;;  %v10419_v15 = vcombine.high %v8453_v7, %v8456_v20  ;;  %v10420_v12 = vcombine.low %v8481_v34, %v8484_v36  ;;  %7633 = vrot.lane.b32.xlu1 %v7632_v10, %s7870_s8 }
 0x2d5   : > { %v8729_v56 = vrot.slane %v2314_v52, %v8302_v35  ;;  %v2297_v46 = vrot.slane %v2283_v16, %v8302_v35  ;;  %v10421_v31 = vcombine.high %v8481_v34, %v8484_v36  ;;  %v2329_v7 = vrot.slane %v2315_v41, %v8302_v35 }
 0x2d6   : > { %v1660_v32 = vrot.slane %v10418_v59, %v8302_v35  ;;  %v1667_v24 = vrot.slane %v10419_v15, %v8302_v35  ;;  %v1983_v25 = vrot.slane %v10420_v12, %v8302_v35  ;;  %v7025_v38 = vcombine.low %v1644_v61, %v1651_v0 }
 0x2d7   : > { %v1990_v37 = vrot.slane %v10421_v31, %v8302_v35  ;;  %v7027_v20 = vcombine.high %v1644_v61, %v1651_v0  ;;  %v2347_v48 = vcombine.high %v8712_v29, %v8729_v56  ;;  %v2346_v2 = vcombine.low %v8712_v29, %v8729_v56 }
 0x2d8   : > { %v7029_v53 = vcombine.low %v1660_v32, %v1667_v24  ;;  %v7031_v21 = vcombine.high %v1660_v32, %v1667_v24  ;;  %v8743_v10 = vrot.slane %v7025_v38, %v8298_v28  ;;  %v2348_v26 = vcombine.low %v2297_v46, %v2329_v7 }
 0x2d9   : > { %v7033_v16 = vcombine.low %v1983_v25, %v1990_v37  ;;  %v8746_v34 = vrot.slane %v7027_v20, %v8298_v28  ;;  %v7592_v63 = vpack.i.bf16 %v2347_v48, %v2211_v42  ;;  %v7035_v52 = vcombine.high %v1983_v25, %v1990_v37 }
 0x2da   : > { %v8749_v36 = vrot.slane %v7029_v53, %v8298_v28  ;;  %v8752_v61 = vrot.slane %v7031_v21, %v8298_v28  ;;  %v7037_v41 = vcombine.low %v8521_v58, %v8529_v13  ;;  %v2212_v59 = vcombine.low %v2161_v18, %v2193_v22 }
 0x2db   : > { %v8755_v0 = vrot.slane %v7033_v16, %v8298_v28  ;;  %v2434_v32 = vcombine.low %v8743_v10, %v8746_v34  ;;  %v7039_v24 = vcombine.high %v8521_v58, %v8529_v13  ;;  %7593 = vrot.lane.b32.xlu0 %v7592_v63, %s7871_s7  ;;  %v2521_v42 = vrot.slane %v7035_v52, %v8298_v28 }
 0x2dc   : > { %v2466_v15 = vcombine.low %v8749_v36, %v8752_v61  ;;  %v2537_v12 = vrot.slane %v7037_v41, %v8298_v28  ;;  %v2213_v25 = vcombine.high %v2161_v18, %v2193_v22  ;;  %v2349_v31 = vcombine.high %v2297_v46, %v2329_v7 }
 0x2dd   : > { %v2442_v37 = vrot.slane %v2434_v32, %v8302_v35  ;;  %v2553_v20 = vrot.slane %v7039_v24, %v8298_v28  ;;  %v10422_v53 = vcombine.low %v8323_v4, %v8326_v6  ;;  %v7597_v58 = vpack.i.bf16 %v2348_v26, %v2212_v59 }
 0x2de   : > { %v2474_v38 = vrot.slane %v2466_v15, %v8302_v35  ;;  %v2570_v13 = vcombine.low %v8755_v0, %v2521_v42  ;;  %v10423_v48 = vcombine.high %v8323_v4, %v8326_v6  ;;  %v10424_v22 = vcombine.low %v8349_v43, %v8352_v44 }
 0x2df   : > { %v1508_v21 = vrot.slane %v10422_v53, %v8302_v35  ;;  %v2602_v16 = vcombine.low %v2537_v12, %v2553_v20  ;;  %v7602_v63 = vpack.i.bf16 %v2349_v31, %v2213_v25  ;;  %v10425_v52 = vcombine.high %v8349_v43, %v8352_v44  ;;  %7598 = vrot.lane.b32.xlu0 %v7597_v58, %s7869_s25 }
 0x2e0   : > { %v1515_v18 = vrot.slane %v10423_v48, %v8302_v35  ;;  %v1524_v46 = vrot.slane %v10424_v22, %v8302_v35  ;;  %v2486_v7 = vcombine.low %v2442_v37, %v2474_v38  ;;  %v2578_v41 = vrot.slane %v2570_v13, %v8302_v35 }
 0x2e1   : > { %v1531_v26 = vrot.slane %v10425_v52, %v8302_v35  ;;  %v10426_v4 = vcombine.low %v8371_v3, %v8374_v11  ;;  %v10427_v59 = vcombine.high %v8371_v3, %v8374_v11  ;;  %v2610_v24 = vrot.slane %v2602_v16, %v8302_v35 }
 0x2e2   : > { %v7009_v15 = vcombine.low %v1508_v21, %v1515_v18  ;;  %v7011_v25 = vcombine.high %v1508_v21, %v1515_v18  ;;  %v7021_v13 = vcombine.low %v8588_v55, %v8591_v45  ;;  %v2487_v11 = vcombine.high %v2442_v37, %v2474_v38 }
 0x2e3   : > { %v1847_v6 = vrot.slane %v10426_v4, %v8302_v35  ;;  %v1854_v32 = vrot.slane %v10427_v59, %v8302_v35  ;;  %v7013_v43 = vcombine.low %v1524_v46, %v1531_v26  ;;  %v7015_v44 = vcombine.high %v1524_v46, %v1531_v26  ;;  %7603 = vrot.lane.b32.xlu0 %v7602_v63, %s7870_s8 }
 0x2e4   : > { %v2097_v31 = vrot.slane %v7009_v15, %v8298_v28  ;;  %v2622_v48 = vcombine.low %v2578_v41, %v2610_v24  ;;  %v2623_v22 = vcombine.high %v2578_v41, %v2610_v24  ;;  %v2113_v52 = vrot.slane %v7011_v25, %v8298_v28 }
 0x2e5   : > { %v7017_v53 = vcombine.low %v1847_v6, %v1854_v32  ;;  %v7019_v58 = vcombine.high %v1847_v6, %v1854_v32  ;;  %v2129_v3 = vrot.slane %v7013_v43, %v8298_v28  ;;  %v2145_v21 = vrot.slane %v7015_v44, %v8298_v28 }
 0x2e6   : > { %v7637_v16 = vpack.i.bf16 %v2622_v48, %v2486_v7  ;;  %v2162_v26 = vcombine.low %v2097_v31, %v2113_v52  ;;  %v2265_v4 = vrot.slane %v7021_v13, %v8298_v28  ;;  %v7023_v41 = vcombine.high %v8588_v55, %v8591_v45 }
 0x2e7   : > { %v2233_v18 = vrot.slane %v7017_v53, %v8298_v28  ;;  %v2249_v46 = vrot.slane %v7019_v58, %v8298_v28  ;;  %v2194_v6 = vcombine.low %v2129_v3, %v2145_v21  ;;  %v2435_v32 = vcombine.high %v8743_v10, %v8746_v34 }
 0x2e8   : > { %v2467_v37 = vcombine.high %v8749_v36, %v8752_v61  ;;  %7638 = vrot.lane.b32.xlu1 %v7637_v16, %s7867_s14  ;;  %v7642_v38 = vpack.i.bf16 %v2623_v22, %v2487_v11  ;;  %v2281_v63 = vrot.slane %v7023_v41, %v8298_v28  ;;  %v2571_v7 = vcombine.high %v8755_v0, %v2521_v42 }
 0x2e9   : > { %v2298_v59 = vcombine.low %v2233_v18, %v2249_v46  ;;  %v2603_v15 = vcombine.high %v2537_v12, %v2553_v20  ;;  %v2170_v24 = vrot.slane %v2162_v26, %v8302_v35  ;;  %v2202_v55 = vrot.slane %v2194_v6, %v8302_v35 }
 0x2ea   : > { %v2449_v45 = vrot.slane %v2435_v32, %v8302_v35  ;;  %v2481_v25 = vrot.slane %v2467_v37, %v8302_v35  ;;  %v2330_v10 = vcombine.low %v2265_v4, %v2281_v63  ;;  %v2585_v34 = vrot.slane %v2571_v7, %v8302_v35 }
 0x2eb   : > { %v2617_v36 = vrot.slane %v2603_v15, %v8302_v35  ;;  %v2163_v61 = vcombine.high %v2097_v31, %v2113_v52  ;;  %v2214_v43 = vcombine.low %v2170_v24, %v2202_v55  ;;  %v2306_v44 = vrot.slane %v2298_v59, %v8302_v35 }
 0x2ec   : > { %v2488_v53 = vcombine.low %v2449_v45, %v2481_v25  ;;  %v2215_v0 = vcombine.high %v2170_v24, %v2202_v55  ;;  %7643 = vrot.lane.b32.xlu1 %v7642_v38, %s7868_s21  ;;  %v2338_v42 = vrot.slane %v2330_v10, %v8302_v35  ;;  %v2489_v20 = vcombine.high %v2449_v45, %v2481_v25 }
 0x2ed   : > { %v2624_v12 = vcombine.low %v2585_v34, %v2617_v36  ;;  %v2625_v58 = vcombine.high %v2585_v34, %v2617_v36  ;;  %v8828_v13 = vrot.slane %v2163_v61, %v8302_v35  ;;  %v2195_v48 = vcombine.high %v2129_v3, %v2145_v21 }
 0x2ee   : > { %v2299_v22 = vcombine.high %v2233_v18, %v2249_v46  ;;  %v2331_v11 = vcombine.high %v2265_v4, %v2281_v63  ;;  %v2350_v16 = vcombine.low %v2306_v44, %v2338_v42  ;;  %v2351_v52 = vcombine.high %v2306_v44, %v2338_v42 }
 0x2ef   : > { %v7647_v31 = vpack.i.bf16 %v2624_v12, %v2488_v53  ;;  %v1715_v26 = vrot.slane %v1707_v47, %v8302_v35  ;;  %v2209_v41 = vrot.slane %v2195_v48, %v8302_v35  ;;  %v1722_v3 = vrot.slane %v1708_v50, %v8302_v35 }
 0x2f0   : > { %v2313_v6 = vrot.slane %v2299_v22, %v8302_v35  ;;  %v2345_v59 = vrot.slane %v2331_v11, %v8302_v35  ;;  %v2077_v21 = vrot.slane %v2063_v14, %v8302_v35  ;;  %v7607_v18 = vpack.i.bf16 %v2350_v16, %v2214_v43 }
 0x2f1   : > { %7648 = vrot.lane.b32.xlu1 %v7647_v31, %s7865_s23  ;;  %v2054_v47 = vrot.slane %v2046_v9, %v8302_v35  ;;  %v2061_v46 = vrot.slane %v2047_v5, %v8302_v35  ;;  %v7612_v30 = vpack.i.bf16 %v2351_v52, %v2215_v0  ;;  %v7652_v19 = vpack.i.bf16 %v2625_v58, %v2489_v20 }
 0x2f2   : > { %v2216_v50 = vcombine.low %v8828_v13, %v2209_v41  ;;  %v2352_v4 = vcombine.low %v2313_v6, %v2345_v59  ;;  %7608 = vrot.lane.b32.xlu0 %v7607_v18, %s7867_s14  ;;  %v2626_v1 = vcombine.low %v1715_v26, %v1722_v3  ;;  %v7040_v40 = vcombine.high %v1715_v26, %v1722_v3 }
 0x2f3   : > { %v2642_v14 = vcombine.low %v8601_v23, %v8619_v8  ;;  %v7041_v9 = vcombine.high %v8601_v23, %v8619_v8  ;;  %v2353_v37 = vcombine.high %v2313_v6, %v2345_v59  ;;  %v2693_v38 = vcombine.low %v2054_v47, %v2061_v46  ;;  %v8909_v59 = vld [vmem:[%s8902_s9] sm:$0xff] }
 0x2f4   : > { %v7617_v32 = vpack.i.bf16 %v2352_v4, %v2216_v50  ;;  %v7042_v49 = vcombine.high %v2054_v47, %v2061_v46  ;;  %v2633_v54 = vrot.slane %v2626_v1, %v8298_v28  ;;  %v2641_v5 = vrot.slane %v7040_v40, %v8298_v28  ;;  %7293 = vmatprep.mubr.msk.f32.mxu0 %vm2888_vm1, %v8909_v59 }
 0x2f5   : > { %7653 = vrot.lane.b32.xlu1 %v7652_v19, %s7866_s27  ;;  %v2649_v63 = vrot.slane %v2642_v14, %v8298_v28  ;;  %v2657_v7 = vrot.slane %v7041_v9, %v8298_v28  ;;  %v2700_v15 = vrot.slane %v2693_v38, %v8298_v28  ;;  %v2709_v23 = vcombine.low %v8701_v39, %v2077_v21 }
 0x2f6   : > { %v2708_v24 = vrot.slane %v7042_v49, %v8298_v28  ;;  %v7043_v8 = vcombine.high %v8701_v39, %v2077_v21  ;;  %7613 = vrot.lane.b32.xlu0 %v7612_v30, %s7868_s21  ;;  %v2659_v55 = vcombine.high %v2633_v54, %v2641_v5  ;;  %v2658_v25 = vcombine.low %v2633_v54, %v2641_v5 }
 0x2f7   : > { %v2675_v45 = vcombine.high %v2649_v63, %v2657_v7  ;;  %v2674_v10 = vcombine.low %v2649_v63, %v2657_v7  ;;  %v2716_v34 = vrot.slane %v2709_v23, %v8298_v28  ;;  %v2217_v48 = vcombine.high %v8828_v13, %v2209_v41 }
 0x2f8   : > { %v2724_v36 = vrot.slane %v7043_v8, %v8298_v28  ;;  %v2726_v61 = vcombine.high %v2700_v15, %v2708_v24  ;;  %v2725_v43 = vcombine.low %v2700_v15, %v2708_v24  ;;  %v2673_v44 = vrot.slane %v2659_v55, %v8302_v35 }
 0x2f9   : > { %v2689_v39 = vrot.slane %v2675_v45, %v8302_v35  ;;  %v8879_v53 = vrot.slane %v2658_v25, %v8302_v35  ;;  %v8882_v0 = vrot.slane %v2674_v10, %v8302_v35  ;;  %v7657_v31 = vpack.i.bf16 %v2353_v37, %v2217_v48 }
 0x2fa   : > { %v2740_v42 = vrot.slane %v2726_v61, %v8302_v35  ;;  %v2742_v12 = vcombine.high %v2716_v34, %v2724_v36  ;;  %v8886_v20 = vrot.slane %v2725_v43, %v8302_v35  ;;  %v2741_v58 = vcombine.low %v2716_v34, %v2724_v36  ;;  %7618 = vrot.lane.b32.xlu0 %v7617_v32, %s7865_s23 }
 0x2fb   : > { %v2690_v22 = vcombine.low %v8879_v53, %v8882_v0  ;;  %v2692_v52 = vcombine.low %v2673_v44, %v2689_v39  ;;  %v2691_v26 = vcombine.high %v8879_v53, %v8882_v0  ;;  %v10428_v7 = vcombine.low %v8604_v57, %v8613_v17  ;;  %v2929_v53 = vld [vmem:[%s8902_s9 + $0x10] sm:$0xff]  ;;  %v2930_v0 = vld [vmem:[%s8902_s9 + $0x18] sm:$0xff] }
 0x2fc   : > { %v2756_v11 = vrot.slane %v2742_v12, %v8302_v35  ;;  %v8895_v16 = vrot.slane %v2741_v58, %v8302_v35 }
 0x2fe   : > { %v2759_v13 = vcombine.low %v2740_v42, %v2756_v11  ;;  %v2758_v41 = vcombine.high %v8886_v20, %v8895_v16  ;;  %v2757_v6 = vcombine.low %v8886_v20, %v8895_v16  ;;  %7658 = vrot.lane.b32.xlu0 %v7657_v31, %s7866_s27  ;;  %v2928_v20 = vld [vmem:[%s8902_s9 + $0x8] sm:$0xff] }
 0x300   : > { %v7667_v3 = vpack.i.bf16 %v2759_v13, %v2692_v52  ;;  %v7662_v21 = vpack.i.bf16 %v2758_v41, %v2691_v26 }
 0x302   : > { %7663 = vrot.lane.b32.xlu1 %v7662_v21, %s7871_s7  ;;  %7668 = vrot.lane.b32.xlu0 %v7667_v3, %s7869_s25 }
 0x33e   : > { %v7624_v18 = vpop.permute.xlu1 %7623 }
 0x33f   : > { %v7626_v40 = vunpack.i.h.bf16 %v7624_v18  ;;  %v7625_v14 = vunpack.i.l.bf16 %v7624_v18 }
 0x341   : > { %v2910_v63 = vsel %vm2888_vm1, %v2618_v33, %v7626_v40  ;;  %v2909_v15 = vsel %vm2888_vm1, %v10428_v7, %v7625_v14 }
 0x342   : > { %v7629_v47 = vpop.permute.xlu1 %7628 }
 0x343   : > { %v7631_v9 = vunpack.i.h.bf16 %v7629_v47  ;;  %v7630_v32 = vunpack.i.l.bf16 %v7629_v47  ;;  %v10429_v47 = vcombine.low %v8660_v60, %v8663_v62 }
 0x345   : > { %v2911_v8 = vsel %vm489_vm0, %v2909_v15, %v7630_v32  ;;  %v2912_v55 = vsel %vm489_vm0, %v2910_v63, %v7631_v9 }
 0x346   : > { %v7634_v30 = vpop.permute.xlu1 %7633 }
 0x347   : > { %v7636_v37 = vunpack.i.h.bf16 %v7634_v30  ;;  %v7635_v38 = vunpack.i.l.bf16 %v7634_v30 }
 0x349   : > { %v2913_v34 = vsel %vm2894_vm2, %v2911_v8, %v7635_v38  ;;  %v2914_v51 = vsel %vm2894_vm2, %v2912_v55, %v7636_v37 }
 0x34d   : > { %v7594_v46 = vpop.permute.xlu0 %7593 }
 0x34e   : > { %v7596_v12 = vunpack.i.h.bf16 %v7594_v46  ;;  %v7595_v58 = vunpack.i.l.bf16 %v7594_v46 }
 0x350   : > { %v2889_v30 = vsel %vm2888_vm1, %v10429_v47, %v7595_v58  ;;  %v2890_v46 = vsel %vm2888_vm1, %v2346_v2, %v7596_v12  ;;  %v6033_v12 = vld [vmem:[#allocation8] sm:$0xff]  ;;  %v6034_v58 = vld [vmem:[#allocation8 + $0x8] sm:$0xff] }
 0x351   : > { %v7599_v19 = vpop.permute.xlu0 %7598 }
 0x352   : > { %v7601_v31 = vunpack.i.h.bf16 %v7599_v19  ;;  %v7600_v52 = vunpack.i.l.bf16 %v7599_v19 }
 0x354   : > { %v2892_v19 = vsel %vm489_vm0, %v2889_v30, %v7600_v52 }
 0x355   : > { %v7604_v4 = vpop.permute.xlu0 %7603 }
 0x356   : > { %v7606_v13 = vunpack.i.h.bf16 %v7604_v4  ;;  %v7605_v41 = vunpack.i.l.bf16 %v7604_v4  ;;  %v2893_v4 = vsel %vm489_vm0, %v2890_v46, %v7601_v31 }
 0x358   : > { %v2895_v9 = vsel %vm2894_vm2, %v2892_v19, %v7605_v41  ;;  %v2896_v32 = vsel %vm2894_vm2, %v2893_v4, %v7606_v13 }
 0x35a   : > { %v7639_v50 = vpop.permute.xlu1 %7638 }
 0x35b   : > { %v7641_v49 = vunpack.i.h.bf16 %v7639_v50  ;;  %v7640_v54 = vunpack.i.l.bf16 %v7639_v50 }
 0x35d   : > { %v2915_v27 = vsel %vm2897_vm3, %v2913_v34, %v7640_v54  ;;  %v2916_v57 = vsel %vm2897_vm3, %v2914_v51, %v7641_v49 }
 0x35e   : > { %v7644_v1 = vpop.permute.xlu1 %7643 }
 0x35f   : > { %v7646_v24 = vunpack.i.h.bf16 %v7644_v1  ;;  %v7645_v23 = vunpack.i.l.bf16 %v7644_v1 }
 0x361   : > { %v2917_v61 = vsel %vm2900_vm4, %v2915_v27, %v7645_v23  ;;  %v2918_v43 = vsel %vm2900_vm4, %v2916_v57, %v7646_v24  ;;  %v10430_v57 = vmov 0.0  }
 0x363   : > { %v7649_v5 = vpop.permute.xlu1 %7648 }
 0x364   : > { %v7609_v45 = vpop.permute.xlu0 %7608  ;;  %v7651_v25 = vunpack.i.h.bf16 %v7649_v5  ;;  %v7650_v10 = vunpack.i.l.bf16 %v7649_v5 }
 0x365   : > { %v7611_v3 = vunpack.i.h.bf16 %v7609_v45  ;;  %v7610_v21 = vunpack.i.l.bf16 %v7609_v45 }
 0x366   : > { %v2919_v39 = vsel %vm2903_vm5, %v2917_v61, %v7650_v10  ;;  %v2920_v42 = vsel %vm2903_vm5, %v2918_v43, %v7651_v25 }
 0x367   : > { %v7654_v17 = vpop.permute.xlu1 %7653  ;;  %v2898_v60 = vsel %vm2897_vm3, %v2895_v9, %v7610_v21  ;;  %v2899_v62 = vsel %vm2897_vm3, %v2896_v32, %v7611_v3 }
 0x368   : > { %v7656_v33 = vunpack.i.h.bf16 %v7654_v17  ;;  %v7655_v36 = vunpack.i.l.bf16 %v7654_v17  ;;  %v7614_v44 = vpop.permute.xlu0 %7613 }
 0x369   : > { %v7616_v50 = vunpack.i.h.bf16 %v7614_v44  ;;  %v7615_v1 = vunpack.i.l.bf16 %v7614_v44 }
 0x36a   : > { %v2921_v48 = vsel %vm2906_vm6, %v2919_v39, %v7655_v36  ;;  %v2922_v11 = vsel %vm2906_vm6, %v2920_v42, %v7656_v33 }
 0x36b   : > { %v7425_v26 = vpack.c.bf16 %v2922_v11, %v2921_v48  ;;  %v2901_v29 = vsel %vm2900_vm4, %v2898_v60, %v7615_v1  ;;  %v2902_v56 = vsel %vm2900_vm4, %v2899_v62, %v7616_v50  ;;  %v7433_v48 = vpack.c.bf16 %v6034_v58, %v6033_v12 }
 0x36c   : > { %v7619_v18 = vpop.permute.xlu0 %7618 }
 0x36d   : > { %7426 = vmatprep.subr.bf16.mxu1 %v7425_v26  ;;  %v7621_v40 = vunpack.i.h.bf16 %v7619_v18  ;;  %v7620_v14 = vunpack.i.l.bf16 %v7619_v18 }
 0x36f   : > { %v2904_v49 = vsel %vm2903_vm5, %v2901_v29, %v7620_v14  ;;  %v2905_v54 = vsel %vm2903_vm5, %v2902_v56, %v7621_v40 }
 0x370   : > { %v7659_v37 = vpop.permute.xlu0 %7658 }
 0x371   : > { %v7661_v2 = vunpack.i.h.bf16 %v7659_v37  ;;  %v7660_v38 = vunpack.i.l.bf16 %v7659_v37 }
 0x373   : > { %v2907_v63 = vsel %vm2906_vm6, %v2904_v49, %v7660_v38  ;;  %v2908_v7 = vsel %vm2906_vm6, %v2905_v54, %v7661_v2 }
 0x374   : > { %v7664_v5 = vpop.permute.xlu1 %7663  ;;  %v7669_v15 = vpop.permute.xlu0 %7668  ;;  %v7427_v8 = vpack.c.bf16 %v2908_v7, %v2907_v63 }
 0x375   : > { %v7666_v24 = vunpack.i.h.bf16 %v7664_v5  ;;  %v7665_v23 = vunpack.i.l.bf16 %v7664_v5  ;;  %v7671_v55 = vunpack.i.h.bf16 %v7669_v15  ;;  %v7670_v45 = vunpack.i.l.bf16 %v7669_v15 }
 0x376   : > { %7428 = vmatpush1.bf16.msra.mxu1 %v7427_v8 }
 0x377   : > { %v2924_v25 = vsel %vm2888_vm1, %v2757_v6, %v7666_v24  ;;  %v2923_v10 = vsel %vm2888_vm1, %v2690_v22, %v7665_v23  ;;  %7437 = vmatprep.subr.bf16.mxu1 %v7433_v48 }
 0x378   : > { %v2925_v34 = vsel %vm489_vm0, %v2923_v10, %v7670_v45  ;;  %v2926_v51 = vsel %vm489_vm0, %v2924_v25, %v7671_v55 }
 0x379   : > { %v7429_v27 = vpack.c.bf16 %v2926_v51, %v2925_v34  ;;  %7044 = vmatmul.mubr.msk.f32.vlgmr.msra.gmra.mrb[0].mxu1 %vm2888_vm1, %v8909_v59 }
 0x37a   : > { %3013 = vmatprep.mubr.f32.mxu1 %v10430_v57  ;;  %7438 = vmatpush3.bf16.msra.mxu1 %v7433_v48 }
 0x37b   : > { %7430 = vmatprep.subr.bf16.mxu0 %v7429_v27 }
 0x37c   : > { %7432 = vmatpush3.bf16.msra.mxu0 %v7429_v27 }
 0x37d   : > { %7045 = vmatmul.mubr.msk.f32.gmra.mrb[2].mxu1 %vm2888_vm1, %v2928_v20  ;;  %7434 = vmatprep.subr.bf16.mxu0 %v7433_v48 }
 0x37e   : > { %3019 = vmatprep.mubr.f32.mxu1 %v10430_v57 }
 0x37f   : > { %7294 = vmatmul.mubr.msk.f32.vlgmr.msra.gmra.mrb[6].mxu0 %vm2888_vm1, %v2928_v20 }
 0x380   : > { %7296 = vmatprep.mubr.msk.f32.mxu0 %vm2888_vm1, %v2929_v53  ;;  %7436 = vmatpush3.bf16.msra.mxu0 %v7433_v48 }
 0x381   : > { %7046 = vmatmul.mubr.msk.f32.gmra.mrb[4].mxu1 %vm2888_vm1, %v2929_v53 }
 0x382   : > { %3025 = vmatprep.mubr.f32.mxu1 %v10430_v57 }
 0x383   : > { %7297 = vmatmul.mubr.msk.f32.gmra.mrb[8].mxu0 %vm2888_vm1, %v2930_v0 }
 0x385   : > { %7047 = vmatmul.mubr.msk.f32.gmra.mrb[6].mxu1 %vm2888_vm1, %v2930_v0 }
 0x44c   : > { %v8980_v22 = vpop.f32.mrb[0].mxu1 }
 0x44d   : > { %3133 = vrot.lane.b32.xlu0 %v8980_v22, %s7865_s23  ;;  %3121 = vrot.lane.b32.xlu1 %v8980_v22, %s7866_s27  ;;  %v8986_v16 = vpop.f32.mrb[1].mxu1 }
 0x450   : > { %v8988_v6 = vpop.f32.mrb[2].mxu1 }
 0x451   : > { %3145 = vrot.lane.b32.xlu1 %v8980_v22, %s7868_s21  ;;  %3221 = vrot.lane.b32.xlu0 %v8986_v16, %s7865_s23  ;;  %v8994_v59 = vpop.f32.mrb[3].mxu1 }
 0x452   : > { %v8996_v17 = vpop.f32.mrb[6].mxu0 }
 0x453   : > { %10431 = vst [vmem:[#allocation22_spill] sm:$0xff] %v8996_v17  ;;  %v8998_v33 = vpop.f32.mrb[7].mxu0 }
 0x454   : > { %10432 = vst [vmem:[#allocation23_spill] sm:$0xff] %v8998_v33  ;;  %v9000_v36 = vpop.f32.mrb[4].mxu1 }
 0x455   : > { %3257 = vrot.lane.b32.xlu0 %v8986_v16, %s7870_s8  ;;  %3209 = vrot.lane.b32.xlu1 %v8986_v16, %s7866_s27  ;;  %v9006_v61 = vpop.f32.mrb[5].mxu1 }
 0x456   : > { %v9008_v43 = vpop.f32.mrb[8].mxu0 }
 0x457   : > { %10433 = vst [vmem:[#allocation24_spill] sm:$0xff] %v9008_v43  ;;  %v9010_v44 = vpop.f32.mrb[9].mxu0 }
 0x458   : > { %10434 = vst [vmem:[#allocation25_spill] sm:$0xff] %v9010_v44  ;;  %v9012_v39 = vpop.f32.mrb[6].mxu1 }
 0x459   : > { %3281 = vrot.lane.b32.xlu0 %v8986_v16, %s7871_s7  ;;  %3233 = vrot.lane.b32.xlu1 %v8986_v16, %s7868_s21  ;;  %v9018_v42 = vpop.f32.mrb[7].mxu1 }
 0x45d   : > { %3245 = vrot.lane.b32.xlu1 %v8986_v16, %s7867_s14  ;;  %3123 = vrot.lane.b32.xlu0 %v8988_v6, %s7866_s27 }
 0x461   : > { %3269 = vrot.lane.b32.xlu1 %v8986_v16, %s7869_s25  ;;  %3147 = vrot.lane.b32.xlu0 %v8988_v6, %s7868_s21 }
 0x465   : > { %3135 = vrot.lane.b32.xlu1 %v8988_v6, %s7865_s23  ;;  %3211 = vrot.lane.b32.xlu0 %v8994_v59, %s7866_s27 }
 0x469   : > { %3223 = vrot.lane.b32.xlu1 %v8994_v59, %s7865_s23  ;;  %3235 = vrot.lane.b32.xlu0 %v8994_v59, %s7868_s21 }
 0x46d   : > { %3247 = vrot.lane.b32.xlu1 %v8994_v59, %s7867_s14  ;;  %3259 = vrot.lane.b32.xlu0 %v8994_v59, %s7870_s8 }
 0x471   : > { %3271 = vrot.lane.b32.xlu1 %v8994_v59, %s7869_s25  ;;  %3283 = vrot.lane.b32.xlu0 %v8994_v59, %s7871_s7 }
 0x475   : > { %3137 = vrot.lane.b32.xlu0 %v9000_v36, %s7865_s23  ;;  %3125 = vrot.lane.b32.xlu1 %v9000_v36, %s7866_s27 }
 0x479   : > { %3149 = vrot.lane.b32.xlu1 %v9000_v36, %s7868_s21  ;;  %3225 = vrot.lane.b32.xlu0 %v9006_v61, %s7865_s23 }
 0x47d   : > { %3261 = vrot.lane.b32.xlu0 %v9006_v61, %s7870_s8  ;;  %3213 = vrot.lane.b32.xlu1 %v9006_v61, %s7866_s27 }
 0x481   : > { %3285 = vrot.lane.b32.xlu0 %v9006_v61, %s7871_s7  ;;  %3237 = vrot.lane.b32.xlu1 %v9006_v61, %s7868_s21 }
 0x485   : > { %3249 = vrot.lane.b32.xlu1 %v9006_v61, %s7867_s14  ;;  %3127 = vrot.lane.b32.xlu0 %v9012_v39, %s7866_s27 }
 0x489   : > { %3273 = vrot.lane.b32.xlu1 %v9006_v61, %s7869_s25  ;;  %3151 = vrot.lane.b32.xlu0 %v9012_v39, %s7868_s21 }
 0x48d   : > { %3139 = vrot.lane.b32.xlu1 %v9012_v39, %s7865_s23  ;;  %3215 = vrot.lane.b32.xlu0 %v9018_v42, %s7866_s27 }
 0x491   : > { %3227 = vrot.lane.b32.xlu1 %v9018_v42, %s7865_s23  ;;  %3239 = vrot.lane.b32.xlu0 %v9018_v42, %s7868_s21 }
 0x495   : > { %3157 = vrot.lane.b32.xlu1 %v8980_v22, %s7867_s14  ;;  %3169 = vrot.lane.b32.xlu0 %v8980_v22, %s7870_s8 }
 0x499   : > { %3181 = vrot.lane.b32.xlu1 %v8980_v22, %s7869_s25  ;;  %3193 = vrot.lane.b32.xlu0 %v8980_v22, %s7871_s7 }
 0x49d   : > { %3159 = vrot.lane.b32.xlu1 %v8988_v6, %s7867_s14  ;;  %3171 = vrot.lane.b32.xlu0 %v8988_v6, %s7870_s8 }
 0x4a1   : > { %3183 = vrot.lane.b32.xlu1 %v8988_v6, %s7869_s25  ;;  %3195 = vrot.lane.b32.xlu0 %v8988_v6, %s7871_s7 }
 0x4a5   : > { %3251 = vrot.lane.b32.xlu1 %v9018_v42, %s7867_s14  ;;  %3263 = vrot.lane.b32.xlu0 %v9018_v42, %s7870_s8 }
 0x4a9   : > { %3275 = vrot.lane.b32.xlu1 %v9018_v42, %s7869_s25  ;;  %3287 = vrot.lane.b32.xlu0 %v9018_v42, %s7871_s7 }
 0x4ad   : > { %3161 = vrot.lane.b32.xlu1 %v9000_v36, %s7867_s14  ;;  %3173 = vrot.lane.b32.xlu0 %v9000_v36, %s7870_s8 }
 0x4b1   : > { %3185 = vrot.lane.b32.xlu1 %v9000_v36, %s7869_s25  ;;  %3197 = vrot.lane.b32.xlu0 %v9000_v36, %s7871_s7 }
 0x4b5   : > { %3163 = vrot.lane.b32.xlu1 %v9012_v39, %s7867_s14  ;;  %3175 = vrot.lane.b32.xlu0 %v9012_v39, %s7870_s8 }
 0x4b9   : > { %3187 = vrot.lane.b32.xlu1 %v9012_v39, %s7869_s25  ;;  %3199 = vrot.lane.b32.xlu0 %v9012_v39, %s7871_s7 }
 0x4bd   : > { %3297 = vrot.lane.b32.xlu1 %v8998_v33, %s7866_s27  ;;  %3309 = vrot.lane.b32.xlu0 %v8998_v33, %s7865_s23 }
 0x4bf   : > { %v3134_v11 = vpop.permute.xlu0 %3133  ;;  %v3122_v31 = vpop.permute.xlu1 %3121 }
 0x4c0   : > { %v3321_v52 = vcombine.low %v8980_v22, %v3134_v11  ;;  %v3322_v26 = vcombine.high %v8980_v22, %v3134_v11 }
 0x4c1   : > { %3299 = vrot.lane.b32.xlu1 %v8996_v17, %s7866_s27  ;;  %3311 = vrot.lane.b32.xlu0 %v8996_v17, %s7865_s23 }
 0x4c2   : > { %v3329_v18 = vrot.slane %v3321_v52, %v8298_v28  ;;  %v3336_v47 = vrot.slane %v3322_v26, %v8298_v28 }
 0x4c3   : > { %v3146_v13 = vpop.permute.xlu1 %3145  ;;  %v3222_v41 = vpop.permute.xlu0 %3221 }
 0x4c4   : > { %v3337_v3 = vcombine.low %v3122_v31, %v3146_v13  ;;  %v3338_v21 = vcombine.high %v3122_v31, %v3146_v13  ;;  %v3457_v37 = vcombine.low %v8986_v16, %v3222_v41  ;;  %v3458_v29 = vcombine.high %v8986_v16, %v3222_v41 }
 0x4c5   : > { %3301 = vrot.lane.b32.xlu1 %v9010_v44, %s7866_s27  ;;  %3313 = vrot.lane.b32.xlu0 %v9010_v44, %s7865_s23 }
 0x4c6   : > { %v3345_v30 = vrot.slane %v3337_v3, %v8298_v28  ;;  %v3352_v46 = vrot.slane %v3338_v21, %v8298_v28  ;;  %v3465_v25 = vrot.slane %v3457_v37, %v8298_v28  ;;  %v3472_v10 = vrot.slane %v3458_v29, %v8298_v28 }
 0x4c7   : > { %v3258_v50 = vpop.permute.xlu0 %3257  ;;  %v3210_v1 = vpop.permute.xlu1 %3209 }
 0x4c8   : > { %v3385_v19 = vcombine.low %v3329_v18, %v3345_v30  ;;  %v3386_v4 = vcombine.high %v3329_v18, %v3345_v30  ;;  %v3401_v40 = vcombine.low %v3336_v47, %v3352_v46  ;;  %v3402_v14 = vcombine.high %v3336_v47, %v3352_v46 }
 0x4c9   : > { %3303 = vrot.lane.b32.xlu1 %v9008_v43, %s7866_s27  ;;  %3315 = vrot.lane.b32.xlu0 %v9008_v43, %s7865_s23 }
 0x4ca   : > { %v3393_v9 = vrot.slane %v3385_v19, %v8302_v35  ;;  %v3400_v32 = vrot.slane %v3386_v4, %v8302_v35  ;;  %v3409_v60 = vrot.slane %v3401_v40, %v8302_v35  ;;  %v3416_v62 = vrot.slane %v3402_v14, %v8302_v35 }
 0x4cb   : > { %v3282_v56 = vpop.permute.xlu0 %3281  ;;  %v3234_v2 = vpop.permute.xlu1 %3233 }
 0x4cc   : > { %v7052_v38 = vcombine.low %v3393_v9, %v3400_v32  ;;  %v7054_v49 = vcombine.high %v3393_v9, %v3400_v32  ;;  %v7056_v54 = vcombine.low %v3409_v60, %v3416_v62  ;;  %v7058_v5 = vcombine.high %v3409_v60, %v3416_v62 }
 0x4cd   : > { %v3505_v63 = vcombine.low %v3258_v50, %v3282_v56  ;;  %v3506_v7 = vcombine.high %v3258_v50, %v3282_v56  ;;  %v3473_v15 = vcombine.low %v3210_v1, %v3234_v2  ;;  %v3474_v24 = vcombine.high %v3210_v1, %v3234_v2 }
 0x4ce   : > { %v4685_v23 = vrot.slane %v7052_v38, %v8298_v28  ;;  %v4701_v8 = vrot.slane %v7054_v49, %v8298_v28  ;;  %v4717_v55 = vrot.slane %v7056_v54, %v8298_v28  ;;  %v4733_v45 = vrot.slane %v7058_v5, %v8298_v28 }
 0x4cf   : > { %v3481_v34 = vrot.slane %v3473_v15, %v8298_v28  ;;  %v3488_v51 = vrot.slane %v3474_v24, %v8298_v28  ;;  %v3246_v27 = vpop.permute.xlu1 %3245  ;;  %v3124_v20 = vpop.permute.xlu0 %3123  ;;  %v3513_v31 = vrot.slane %v3505_v63, %v8298_v28  ;;  %v3520_v52 = vrot.slane %v3506_v7, %v8298_v28 }
 0x4d0   : > { %v4741_v53 = vcombine.low %v4685_v23, %v4701_v8  ;;  %v4773_v0 = vcombine.low %v4717_v55, %v4733_v45  ;;  %v4742_v22 = vcombine.high %v4685_v23, %v4701_v8  ;;  %v4774_v16 = vcombine.high %v4717_v55, %v4733_v45 }
 0x4d1   : > { %v3521_v12 = vcombine.low %v3465_v25, %v3481_v34  ;;  %v3522_v58 = vcombine.high %v3465_v25, %v3481_v34  ;;  %v3537_v48 = vcombine.low %v3472_v10, %v3488_v51  ;;  %v3538_v11 = vcombine.high %v3472_v10, %v3488_v51 }
 0x4d2   : > { %v9155_v26 = vrot.slane %v4741_v53, %v8302_v35  ;;  %v9158_v13 = vrot.slane %v4773_v0, %v8302_v35  ;;  %v9165_v1 = vrot.slane %v4742_v22, %v8302_v35  ;;  %v9168_v19 = vrot.slane %v4774_v16, %v8302_v35 }
 0x4d3   : > { %v3529_v41 = vrot.slane %v3521_v12, %v8302_v35  ;;  %v3536_v3 = vrot.slane %v3522_v58, %v8302_v35  ;;  %v3545_v21 = vrot.slane %v3537_v48, %v8302_v35  ;;  %v3552_v18 = vrot.slane %v3538_v11, %v8302_v35  ;;  %v3270_v47 = vpop.permute.xlu1 %3269  ;;  %v3148_v30 = vpop.permute.xlu0 %3147 }
 0x4d4   : > { %v3489_v46 = vcombine.low %v3246_v27, %v3270_v47  ;;  %v3490_v50 = vcombine.high %v3246_v27, %v3270_v47  ;;  %v3676_v62 = vcombine.low %v3124_v20, %v3148_v30  ;;  %v3677_v37 = vcombine.high %v3124_v20, %v3148_v30 }
 0x4d5   : > { %v7084_v4 = vcombine.low %v3529_v41, %v3536_v3  ;;  %v7086_v40 = vcombine.high %v3529_v41, %v3536_v3  ;;  %v7088_v14 = vcombine.low %v3545_v21, %v3552_v18  ;;  %v7090_v9 = vcombine.high %v3545_v21, %v3552_v18 }
 0x4d6   : > { %v3497_v32 = vrot.slane %v3489_v46, %v8298_v28  ;;  %v3504_v60 = vrot.slane %v3490_v50, %v8298_v28  ;;  %v4805_v24 = vcombine.low %v9155_v26, %v9158_v13  ;;  %v3684_v51 = vrot.slane %v3676_v62, %v8298_v28 }
 0x4d7   : > { %v9173_v29 = vrot.slane %v7084_v4, %v8298_v28  ;;  %v9176_v56 = vrot.slane %v7086_v40, %v8298_v28  ;;  %v9179_v2 = vrot.slane %v7088_v14, %v8298_v28  ;;  %v9182_v38 = vrot.slane %v7090_v9, %v8298_v28  ;;  %v3136_v49 = vpop.permute.xlu1 %3135  ;;  %v3212_v54 = vpop.permute.xlu0 %3211 }
 0x4d8   : > { %v3553_v5 = vcombine.low %v3497_v32, %v3513_v31  ;;  %v3554_v63 = vcombine.high %v3497_v32, %v3513_v31  ;;  %v3569_v7 = vcombine.low %v3504_v60, %v3520_v52  ;;  %v3570_v15 = vcombine.high %v3504_v60, %v3520_v52  ;;  %7303 = vmatprep.mubr.msk.f32.mxu0 %vm2888_vm1, %v4805_v24 }
 0x4d9   : > { %v3660_v23 = vcombine.low %v8988_v6, %v3136_v49  ;;  %v3661_v8 = vcombine.high %v8988_v6, %v3136_v49  ;;  %v5285_v55 = vcombine.low %v9173_v29, %v9176_v56  ;;  %v3691_v27 = vrot.slane %v3677_v37, %v8298_v28 }
 0x4da   : > { %v3561_v45 = vrot.slane %v3553_v5, %v8302_v35  ;;  %v3568_v25 = vrot.slane %v3554_v63, %v8302_v35  ;;  %v9193_v10 = vrot.slane %v3569_v7, %v8302_v35  ;;  %v9196_v34 = vrot.slane %v3570_v15, %v8302_v35 }
 0x4db   : > { %v3668_v6 = vrot.slane %v3660_v23, %v8298_v28  ;;  %v3675_v20 = vrot.slane %v3661_v8, %v8298_v28  ;;  %v3224_v53 = vpop.permute.xlu1 %3223  ;;  %v3236_v0 = vpop.permute.xlu0 %3235  ;;  %v9214_v21 = vrot.slane %v5285_v55, %v8302_v35  ;;  %v5317_v18 = vcombine.low %v9179_v2, %v9182_v38 }
 0x4dc   : > { %v7085_v22 = vcombine.low %v3561_v45, %v3568_v25  ;;  %v7087_v16 = vcombine.high %v3561_v45, %v3568_v25  ;;  %v7089_v12 = vcombine.low %v9193_v10, %v9196_v34  ;;  %v7091_v58 = vcombine.high %v9193_v10, %v9196_v34 }
 0x4dd   : > { %v3724_v48 = vcombine.low %v3668_v6, %v3684_v51  ;;  %v3725_v11 = vcombine.high %v3668_v6, %v3684_v51  ;;  %v3740_v31 = vcombine.low %v3675_v20, %v3691_v27  ;;  %v3741_v52 = vcombine.high %v3675_v20, %v3691_v27  ;;  %10437 = vst [vmem:[#allocation28_spill] sm:$0xff] %v9214_v21 }
 0x4de   : > { %v9208_v41 = vrot.slane %v7085_v22, %v8298_v28  ;;  %v9211_v3 = vrot.slane %v7087_v16, %v8298_v28  ;;  %v3796_v14 = vcombine.low %v8994_v59, %v3224_v53  ;;  %v3797_v9 = vcombine.high %v8994_v59, %v3224_v53 }
 0x4df   : > { %v3732_v47 = vrot.slane %v3724_v48, %v8302_v35  ;;  %v3739_v30 = vrot.slane %v3725_v11, %v8302_v35  ;;  %v3748_v46 = vrot.slane %v3740_v31, %v8302_v35  ;;  %v3755_v50 = vrot.slane %v3741_v52, %v8302_v35  ;;  %v3248_v4 = vpop.permute.xlu1 %3247  ;;  %v3260_v40 = vpop.permute.xlu0 %3259 }
 0x4e0   : > { %10435 = vst [vmem:[#allocation26_spill] sm:$0xff] %v9208_v41  ;;  %10436 = vst [vmem:[#allocation27_spill] sm:$0xff] %v9211_v3  ;;  %v3812_v32 = vcombine.low %v3212_v54, %v3236_v0  ;;  %v3813_v60 = vcombine.high %v3212_v54, %v3236_v0  ;;  %v3804_v63 = vrot.slane %v3796_v14, %v8298_v28 }
 0x4e1   : > { %v7060_v62 = vcombine.low %v3732_v47, %v3739_v30  ;;  %v7062_v37 = vcombine.high %v3732_v47, %v3739_v30  ;;  %v7064_v49 = vcombine.low %v3748_v46, %v3755_v50  ;;  %v7066_v5 = vcombine.high %v3748_v46, %v3755_v50 }
 0x4e2   : > { %v3811_v7 = vrot.slane %v3797_v9, %v8298_v28  ;;  %v3820_v15 = vrot.slane %v3812_v32, %v8298_v28  ;;  %v3827_v24 = vrot.slane %v3813_v60, %v8298_v28  ;;  %v9245_v0 = vrot.slane %v5317_v18, %v8302_v35 }
 0x4e3   : > { %v9229_v23 = vrot.slane %v7060_v62, %v8298_v28  ;;  %v9232_v8 = vrot.slane %v7062_v37, %v8298_v28  ;;  %v9235_v59 = vrot.slane %v7064_v49, %v8298_v28  ;;  %v9238_v54 = vrot.slane %v7066_v5, %v8298_v28  ;;  %v3272_v55 = vpop.permute.xlu1 %3271  ;;  %v3284_v45 = vpop.permute.xlu0 %3283 }
 0x4e4   : > { %v3860_v25 = vcombine.low %v3804_v63, %v3820_v15  ;;  %v3861_v51 = vcombine.high %v3804_v63, %v3820_v15  ;;  %v3876_v27 = vcombine.low %v3811_v7, %v3827_v24  ;;  %v3877_v6 = vcombine.high %v3811_v7, %v3827_v24  ;;  %10438 = vst [vmem:[#allocation29_spill] sm:$0xff] %v9245_v0 }
 0x4e5   : > { %v4877_v20 = vcombine.low %v9229_v23, %v9232_v8  ;;  %v4909_v53 = vcombine.low %v9235_v59, %v9238_v54  ;;  %v3828_v22 = vcombine.low %v3248_v4, %v3272_v55  ;;  %v5350_v30 = vcombine.high %v9214_v21, %v9245_v0 }
 0x4e6   : > { %v3868_v16 = vrot.slane %v3860_v25, %v8302_v35  ;;  %v3875_v48 = vrot.slane %v3861_v51, %v8302_v35  ;;  %v3884_v11 = vrot.slane %v3876_v27, %v8302_v35  ;;  %v3891_v31 = vrot.slane %v3877_v6, %v8302_v35 }
 0x4e7   : > { %v9252_v52 = vrot.slane %v4877_v20, %v8302_v35  ;;  %v9255_v47 = vrot.slane %v4909_v53, %v8302_v35  ;;  %v3829_v18 = vcombine.high %v3248_v4, %v3272_v55  ;;  %v3138_v46 = vpop.permute.xlu0 %3137  ;;  %v3126_v50 = vpop.permute.xlu1 %3125  ;;  %7357 = vmatprep.mubr.msk.f32.mxu1 %vm2888_vm1, %v5350_v30  ;;  %v3836_v62 = vrot.slane %v3828_v22, %v8298_v28 }
 0x4e8   : > { %v7092_v14 = vcombine.low %v3868_v16, %v3875_v48  ;;  %v7094_v9 = vcombine.high %v3868_v16, %v3875_v48  ;;  %v7096_v32 = vcombine.low %v3884_v11, %v3891_v31  ;;  %v7098_v60 = vcombine.high %v3884_v11, %v3891_v31 }
 0x4e9   : > { %v3843_v37 = vrot.slane %v3829_v18, %v8298_v28  ;;  %v3844_v49 = vcombine.low %v3260_v40, %v3284_v45  ;;  %v3845_v5 = vcombine.high %v3260_v40, %v3284_v45  ;;  %v3999_v25 = vcombine.low %v9000_v36, %v3138_v46 }
 0x4ea   : > { %v9263_v63 = vrot.slane %v7092_v14, %v8298_v28  ;;  %v9266_v7 = vrot.slane %v7094_v9, %v8298_v28  ;;  %v9269_v4 = vrot.slane %v7096_v32, %v8298_v28  ;;  %v9272_v15 = vrot.slane %v7098_v60, %v8298_v28 }
 0x4eb   : > { %v3852_v24 = vrot.slane %v3844_v49, %v8298_v28  ;;  %v3859_v55 = vrot.slane %v3845_v5, %v8298_v28  ;;  %v4000_v40 = vcombine.high %v9000_v36, %v3138_v46  ;;  %v3150_v45 = vpop.permute.xlu1 %3149  ;;  %v3226_v51 = vpop.permute.xlu0 %3225  ;;  %v4941_v20 = vcombine.low %v9252_v52, %v9255_v47 }
 0x4ec   : > { %v5421_v27 = vcombine.low %v9263_v63, %v9266_v7  ;;  %v5453_v6 = vcombine.low %v9269_v4, %v9272_v15  ;;  %v4015_v53 = vcombine.low %v3126_v50, %v3150_v45  ;;  %v9288_v36 = vrot.slane %v7089_v12, %v8298_v28 }
 0x4ed   : > { %v3892_v22 = vcombine.low %v3836_v62, %v3852_v24  ;;  %v3893_v16 = vcombine.high %v3836_v62, %v3852_v24  ;;  %v3908_v48 = vcombine.low %v3843_v37, %v3859_v55  ;;  %v3909_v11 = vcombine.high %v3843_v37, %v3859_v55  ;;  %7304 = vmatmul.mubr.msk.f32.vlgmr.msra.gmra.mrb[10].mxu0 %vm2888_vm1, %v4941_v20 }
 0x4ee   : > { %10439 = vst [vmem:[#allocation30_spill] sm:$0xff] %v9288_v36  ;;  %v9294_v31 = vrot.slane %v7091_v58, %v8298_v28  ;;  %v9297_v30 = vrot.slane %v5421_v27, %v8302_v35  ;;  %v9300_v18 = vrot.slane %v5453_v6, %v8302_v35  ;;  %v4007_v34 = vrot.slane %v3999_v25, %v8298_v28 }
 0x4ef   : > { %v3900_v46 = vrot.slane %v3892_v22, %v8302_v35  ;;  %v3907_v14 = vrot.slane %v3893_v16, %v8302_v35  ;;  %v3916_v12 = vrot.slane %v3908_v48, %v8302_v35  ;;  %v3923_v9 = vrot.slane %v3909_v11, %v8302_v35  ;;  %v3262_v32 = vpop.permute.xlu0 %3261  ;;  %v3214_v10 = vpop.permute.xlu1 %3213 }
 0x4f0   : > { %10440 = vst [vmem:[#allocation31_spill] sm:$0xff] %v9294_v31  ;;  %10441 = vst [vmem:[#allocation32_spill] sm:$0xff] %v9297_v30  ;;  %v4016_v58 = vcombine.high %v3126_v50, %v3150_v45  ;;  %v4023_v60 = vrot.slane %v4015_v53, %v8298_v28  ;;  %v4135_v62 = vcombine.low %v9006_v61, %v3226_v51 }
 0x4f1   : > { %10442 = vst [vmem:[#allocation33_spill] sm:$0xff] %v9300_v18  ;;  %v7093_v37 = vcombine.low %v3900_v46, %v3907_v14  ;;  %v7095_v49 = vcombine.high %v3900_v46, %v3907_v14  ;;  %v7097_v5 = vcombine.low %v3916_v12, %v3923_v9  ;;  %v4014_v24 = vrot.slane %v4000_v40, %v8298_v28 }
 0x4f2   : > { %v4030_v55 = vrot.slane %v4016_v58, %v8298_v28  ;;  %v4063_v27 = vcombine.low %v4007_v34, %v4023_v60  ;;  %v4064_v6 = vcombine.high %v4007_v34, %v4023_v60  ;;  %v4136_v20 = vcombine.high %v9006_v61, %v3226_v51 }
 0x4f3   : > { %v9314_v22 = vrot.slane %v7093_v37, %v8298_v28  ;;  %v9317_v50 = vrot.slane %v7095_v49, %v8298_v28  ;;  %v7099_v25 = vcombine.high %v3916_v12, %v3923_v9  ;;  %v4143_v45 = vrot.slane %v4135_v62, %v8298_v28  ;;  %v3286_v53 = vpop.permute.xlu0 %3285  ;;  %v3238_v16 = vpop.permute.xlu1 %3237 }
 0x4f4   : > { %v4071_v48 = vrot.slane %v4063_v27, %v8302_v35  ;;  %v4078_v40 = vrot.slane %v4064_v6, %v8302_v35  ;;  %v4079_v11 = vcombine.low %v4014_v24, %v4030_v55  ;;  %v4080_v46 = vcombine.high %v4014_v24, %v4030_v55 }
 0x4f5   : > { %10443 = vst [vmem:[#allocation34_spill] sm:$0xff] %v9314_v22  ;;  %10444 = vst [vmem:[#allocation35_spill] sm:$0xff] %v9317_v50  ;;  %v9323_v14 = vrot.slane %v7097_v5, %v8298_v28  ;;  %v5486_v61 = vcombine.high %v9297_v30, %v9300_v18  ;;  %v4183_v51 = vcombine.low %v3262_v32, %v3286_v53 }
 0x4f6   : > { %v4184_v34 = vcombine.high %v3262_v32, %v3286_v53  ;;  %v4087_v12 = vrot.slane %v4079_v11, %v8302_v35  ;;  %v4094_v9 = vrot.slane %v4080_v46, %v8302_v35  ;;  %v7068_v58 = vcombine.low %v4071_v48, %v4078_v40 }
 0x4f7   : > { %10445 = vst [vmem:[#allocation36_spill] sm:$0xff] %v9323_v14  ;;  %v7070_v60 = vcombine.high %v4071_v48, %v4078_v40  ;;  %v9330_v62 = vrot.slane %v7099_v25, %v8298_v28  ;;  %v4150_v37 = vrot.slane %v4136_v20, %v8298_v28  ;;  %7358 = vmatmul.mubr.msk.f32.vlgmr.msra.gmra.mrb[8].mxu1 %vm2888_vm1, %v5486_v61  ;;  %v3250_v24 = vpop.permute.xlu1 %3249  ;;  %v3128_v55 = vpop.permute.xlu0 %3127 }
 0x4f8   : > { %v4151_v49 = vcombine.low %v3214_v10, %v3238_v16  ;;  %v4152_v5 = vcombine.high %v3214_v10, %v3238_v16  ;;  %v7072_v27 = vcombine.low %v4087_v12, %v4094_v9  ;;  %v7074_v6 = vcombine.high %v4087_v12, %v4094_v9 }
 0x4f9   : > { %10446 = vst [vmem:[#allocation37_spill] sm:$0xff] %v9330_v62  ;;  %v4191_v32 = vrot.slane %v4183_v51, %v8298_v28  ;;  %v4198_v53 = vrot.slane %v4184_v34, %v8298_v28  ;;  %v9337_v11 = vrot.slane %v7068_v58, %v8298_v28  ;;  %v9344_v10 = vrot.slane %v7070_v60, %v8298_v28 }
 0x4fa   : > { %v4159_v25 = vrot.slane %v4151_v49, %v8298_v28  ;;  %v4166_v48 = vrot.slane %v4152_v5, %v8298_v28  ;;  %v9347_v16 = vrot.slane %v7072_v27, %v8298_v28  ;;  %v9350_v40 = vrot.slane %v7074_v6, %v8298_v28 }
 0x4fb   : > { %v3274_v9 = vpop.permute.xlu1 %3273  ;;  %v3152_v58 = vpop.permute.xlu0 %3151 }
 0x4fc   : > { %v4199_v61 = vcombine.low %v4143_v45, %v4159_v25  ;;  %v4200_v51 = vcombine.high %v4143_v45, %v4159_v25  ;;  %v4215_v34 = vcombine.low %v4150_v37, %v4166_v48  ;;  %v4216_v12 = vcombine.high %v4150_v37, %v4166_v48 }
 0x4fd   : > { %v4167_v49 = vcombine.low %v3250_v24, %v3274_v9  ;;  %v4168_v5 = vcombine.high %v3250_v24, %v3274_v9  ;;  %v4354_v20 = vcombine.low %v3128_v55, %v3152_v58  ;;  %v4355_v60 = vcombine.high %v3128_v55, %v3152_v58 }
 0x4fe   : > { %v4207_v30 = vrot.slane %v4199_v61, %v8302_v35  ;;  %v4214_v27 = vrot.slane %v4200_v51, %v8302_v35  ;;  %v4223_v6 = vrot.slane %v4215_v34, %v8302_v35  ;;  %v4230_v18 = vrot.slane %v4216_v12, %v8302_v35 }
 0x4ff   : > { %v4175_v46 = vrot.slane %v4167_v49, %v8298_v28  ;;  %v4182_v45 = vrot.slane %v4168_v5, %v8298_v28  ;;  %v5013_v37 = vcombine.low %v9337_v11, %v9344_v10  ;;  %v3140_v9 = vpop.permute.xlu1 %3139  ;;  %v3216_v51 = vpop.permute.xlu0 %3215  ;;  %v4362_v0 = vrot.slane %v4354_v20, %v8298_v28 }
 0x500   : > { %v7100_v25 = vcombine.low %v4207_v30, %v4214_v27  ;;  %v7102_v55 = vcombine.high %v4207_v30, %v4214_v27  ;;  %v7104_v48 = vcombine.low %v4223_v6, %v4230_v18  ;;  %v7106_v61 = vcombine.high %v4223_v6, %v4230_v18 }
 0x501   : > { %v4231_v58 = vcombine.low %v4175_v46, %v4191_v32  ;;  %v4232_v34 = vcombine.high %v4175_v46, %v4191_v32  ;;  %v4247_v21 = vcombine.low %v4182_v45, %v4198_v53  ;;  %v4248_v12 = vcombine.high %v4182_v45, %v4198_v53 }
 0x502   : > { %v9365_v49 = vrot.slane %v7100_v25, %v8298_v28  ;;  %v9368_v5 = vrot.slane %v7102_v55, %v8298_v28  ;;  %v4369_v24 = vrot.slane %v4355_v60, %v8298_v28  ;;  %v9381_v53 = vrot.slane %v5013_v37, %v8302_v35 }
 0x503   : > { %v4239_v30 = vrot.slane %v4231_v58, %v8302_v35  ;;  %v4246_v18 = vrot.slane %v4232_v34, %v8302_v35  ;;  %v9375_v27 = vrot.slane %v4247_v21, %v8302_v35  ;;  %v9378_v32 = vrot.slane %v4248_v12, %v8302_v35  ;;  %v3228_v6 = vpop.permute.xlu1 %3227  ;;  %v3240_v45 = vpop.permute.xlu0 %3239 }
 0x504   : > { %v5045_v46 = vcombine.low %v9347_v16, %v9350_v40  ;;  %v4338_v20 = vcombine.low %v9012_v39, %v3140_v9  ;;  %v4339_v60 = vcombine.high %v9012_v39, %v3140_v9  ;;  %v9388_v25 = vrot.slane %v7104_v48, %v8298_v28 }
 0x505   : > { %v9391_v21 = vrot.slane %v7106_v61, %v8298_v28  ;;  %v7101_v55 = vcombine.low %v4239_v30, %v4246_v18  ;;  %v7103_v58 = vcombine.high %v4239_v30, %v4246_v18  ;;  %v4474_v43 = vcombine.low %v9018_v42, %v3228_v6 }
 0x506   : > { %v9394_v37 = vrot.slane %v5045_v46, %v8302_v35  ;;  %v4346_v34 = vrot.slane %v4338_v20, %v8298_v28  ;;  %v4353_v12 = vrot.slane %v4339_v60, %v8298_v28  ;;  %v4490_v33 = vcombine.low %v3216_v51, %v3240_v45 }
 0x507   : > { %v9400_v39 = vrot.slane %v7101_v55, %v8298_v28  ;;  %v9403_v48 = vrot.slane %v7103_v58, %v8298_v28  ;;  %v3158_v60 = vpop.permute.xlu1 %3157  ;;  %v3170_v44 = vpop.permute.xlu0 %3169  ;;  %v4475_v55 = vcombine.high %v9018_v42, %v3228_v6  ;;  %v4482_v58 = vrot.slane %v4474_v43, %v8298_v28 }
 0x508   : > { %v5077_v30 = vcombine.low %v9381_v53, %v9394_v37  ;;  %v4402_v18 = vcombine.low %v4346_v34, %v4362_v0  ;;  %v4403_v46 = vcombine.high %v4346_v34, %v4362_v0  ;;  %v4418_v20 = vcombine.low %v4353_v12, %v4369_v24 }
 0x509   : > { %10447 = vst [vmem:[#allocation38_spill] sm:$0xff] %v9400_v39  ;;  %10448 = vst [vmem:[#allocation39_spill] sm:$0xff] %v9403_v48  ;;  %v4419_v17 = vcombine.high %v4353_v12, %v4369_v24  ;;  %v4491_v39 = vcombine.high %v3216_v51, %v3240_v45  ;;  %v4489_v34 = vrot.slane %v4475_v55, %v8298_v28 }
 0x50a   : > { %7306 = vmatprep.mubr.msk.f32.mxu0 %vm2888_vm1, %v5077_v30  ;;  %v4410_v61 = vrot.slane %v4402_v18, %v8302_v35  ;;  %v4417_v9 = vrot.slane %v4403_v46, %v8302_v35  ;;  %v4426_v57 = vrot.slane %v4418_v20, %v8302_v35  ;;  %v4498_v24 = vrot.slane %v4490_v33, %v8298_v28 }
 0x50b   : > { %v4433_v0 = vrot.slane %v4419_v17, %v8302_v35  ;;  %v5557_v42 = vcombine.low %v9365_v49, %v9368_v5  ;;  %v4505_v12 = vrot.slane %v4491_v39, %v8298_v28  ;;  %v5589_v30 = vcombine.low %v9388_v25, %v9391_v21  ;;  %v3182_v18 = vpop.permute.xlu1 %3181  ;;  %v3194_v46 = vpop.permute.xlu0 %3193 }
 0x50c   : > { %v7076_v43 = vcombine.low %v4410_v61, %v4417_v9  ;;  %v7078_v6 = vcombine.high %v4410_v61, %v4417_v9  ;;  %v4538_v45 = vcombine.low %v4482_v58, %v4498_v24  ;;  %v4539_v17 = vcombine.high %v4482_v58, %v4498_v24 }
 0x50d   : > { %v7080_v20 = vcombine.low %v4426_v57, %v4433_v0  ;;  %v7082_v51 = vcombine.high %v4426_v57, %v4433_v0  ;;  %v4554_v48 = vcombine.low %v4489_v34, %v4505_v12  ;;  %v4555_v14 = vcombine.high %v4489_v34, %v4505_v12 }
 0x50e   : > { %v9426_v55 = vrot.slane %v7076_v43, %v8298_v28  ;;  %v9429_v33 = vrot.slane %v7078_v6, %v8298_v28  ;;  %v4546_v9 = vrot.slane %v4538_v45, %v8302_v35  ;;  %v4553_v57 = vrot.slane %v4539_v17, %v8302_v35 }
 0x50f   : > { %v9432_v61 = vrot.slane %v7080_v20, %v8298_v28  ;;  %v9435_v39 = vrot.slane %v7082_v51, %v8298_v28  ;;  %v4562_v58 = vrot.slane %v4554_v48, %v8302_v35  ;;  %v4569_v0 = vrot.slane %v4555_v14, %v8302_v35  ;;  %v3160_v34 = vpop.permute.xlu1 %3159  ;;  %v3172_v6 = vpop.permute.xlu0 %3171 }
 0x510   : > { %v9442_v24 = vrot.slane %v5557_v42, %v8302_v35  ;;  %v9445_v43 = vrot.slane %v5589_v30, %v8302_v35  ;;  %v7108_v12 = vcombine.low %v4546_v9, %v4553_v57  ;;  %v7110_v20 = vcombine.high %v4546_v9, %v4553_v57 }
 0x511   : > { %v3353_v51 = vcombine.low %v3158_v60, %v3182_v18  ;;  %v3354_v62 = vcombine.high %v3158_v60, %v3182_v18  ;;  %v7112_v22 = vcombine.low %v4562_v58, %v4569_v0  ;;  %v7114_v45 = vcombine.high %v4562_v58, %v4569_v0 }
 0x512   : > { %10449 = vst [vmem:[#allocation40_spill] sm:$0xff] %v9442_v24  ;;  %10450 = vst [vmem:[#allocation41_spill] sm:$0xff] %v9445_v43  ;;  %v5622_v17 = vcombine.high %v9442_v24, %v9445_v43  ;;  %v3369_v48 = vcombine.low %v3170_v44, %v3194_v46  ;;  %v9450_v14 = vrot.slane %v7108_v12, %v8298_v28 }
 0x513   : > { %v9453_v42 = vrot.slane %v7110_v20, %v8298_v28  ;;  %v3361_v30 = vrot.slane %v3353_v51, %v8298_v28  ;;  %v3368_v50 = vrot.slane %v3354_v62, %v8298_v28  ;;  %v9458_v9 = vrot.slane %v7112_v22, %v8298_v28  ;;  %v3184_v58 = vpop.permute.xlu1 %3183  ;;  %v3196_v0 = vpop.permute.xlu0 %3195 }
 0x514   : > { %v9461_v60 = vrot.slane %v7114_v45, %v8298_v28  ;;  %7360 = vmatprep.mubr.msk.f32.mxu1 %vm2888_vm1, %v5622_v17  ;;  %v3370_v18 = vcombine.high %v3170_v44, %v3194_v46  ;;  %v3377_v57 = vrot.slane %v3369_v48, %v8298_v28  ;;  %v5149_v12 = vcombine.low %v9426_v55, %v9429_v33 }
 0x515   : > { %v5181_v20 = vcombine.low %v9432_v61, %v9435_v39  ;;  %v3692_v62 = vcombine.low %v3160_v34, %v3184_v58  ;;  %v3693_v51 = vcombine.high %v3160_v34, %v3184_v58  ;;  %v3708_v43 = vcombine.low %v3172_v6, %v3196_v0 }
 0x516   : > { %v3384_v22 = vrot.slane %v3370_v18, %v8298_v28  ;;  %v3417_v24 = vcombine.low %v3361_v30, %v3377_v57  ;;  %v3418_v45 = vcombine.high %v3361_v30, %v3377_v57  ;;  %v5157_v17 = vrot.slane %v5149_v12, %v8302_v35 }
 0x517   : > { %v5189_v44 = vrot.slane %v5181_v20, %v8302_v35  ;;  %v3700_v46 = vrot.slane %v3692_v62, %v8298_v28  ;;  %v3707_v48 = vrot.slane %v3693_v51, %v8298_v28  ;;  %v9476_v34 = vpop.permute.xlu1 %3251  ;;  %v3709_v58 = vcombine.high %v3172_v6, %v3196_v0 }
 0x518   : > { %v3425_v36 = vrot.slane %v3417_v24, %v8302_v35  ;;  %v3432_v31 = vrot.slane %v3418_v45, %v8302_v35  ;;  %v3433_v41 = vcombine.low %v3368_v50, %v3384_v22  ;;  %v3434_v3 = vcombine.high %v3368_v50, %v3384_v22 }
 0x519   : > { %v5213_v18 = vcombine.low %v5157_v17, %v5189_v44  ;;  %v3716_v30 = vrot.slane %v3708_v43, %v8298_v28  ;;  %v5693_v57 = vcombine.low %v9450_v14, %v9453_v42  ;;  %v10451_v24 = vcombine.low %v9375_v27, %v9378_v32 }
 0x51a   : > { %v3441_v12 = vrot.slane %v3433_v41, %v8302_v35  ;;  %v3448_v20 = vrot.slane %v3434_v3, %v8302_v35  ;;  %v7053_v62 = vcombine.low %v3425_v36, %v3432_v31  ;;  %v7055_v51 = vcombine.high %v3425_v36, %v3432_v31 }
 0x51b   : > { %v9487_v50 = vrot.slane %v10451_v24, %v8298_v28  ;;  %7307 = vmatmul.mubr.msk.f32.gmra.mrb[12].mxu0 %vm2888_vm1, %v5213_v18  ;;  %v3723_v6 = vrot.slane %v3709_v58, %v8298_v28  ;;  %v3756_v43 = vcombine.low %v3700_v46, %v3716_v30  ;;  %v3757_v0 = vcombine.high %v3700_v46, %v3716_v30  ;;  %v3264_v18 = vpop.permute.xlu0 %3263 }
 0x51c   : > { %v10452_v41 = vcombine.high %v9375_v27, %v9378_v32  ;;  %v7057_v3 = vcombine.low %v3441_v12, %v3448_v20  ;;  %v7059_v36 = vcombine.high %v3441_v12, %v3448_v20  ;;  %v10453_v31 = vcombine.high %v9155_v26, %v9158_v13 }
 0x51d   : > { %v9502_v45 = vrot.slane %v5693_v57, %v8302_v35  ;;  %v3764_v58 = vrot.slane %v3756_v43, %v8302_v35  ;;  %v3771_v46 = vrot.slane %v3757_v0, %v8302_v35  ;;  %v3772_v30 = vcombine.low %v3707_v48, %v3723_v6  ;;  %v3276_v57 = vpop.permute.xlu1 %3275 }
 0x51e   : > { %v9495_v22 = vrot.slane %v10452_v41, %v8298_v28  ;;  %7309 = vmatprep.mubr.msk.f32.mxu0 %vm2888_vm1, %v10453_v31  ;;  %v3773_v24 = vcombine.high %v3707_v48, %v3723_v6  ;;  %v9507_v27 = vrot.slane %v7053_v62, %v8298_v28  ;;  %v9510_v32 = vrot.slane %v7055_v51, %v8298_v28 }
 0x51f   : > { %10454 = vst [vmem:[#allocation42_spill] sm:$0xff] %v9502_v45  ;;  %v5725_v26 = vcombine.low %v9458_v9, %v9461_v60  ;;  %v5078_v13 = vcombine.high %v9381_v53, %v9394_v37  ;;  %v9517_v12 = vrot.slane %v3772_v30, %v8302_v35  ;;  %v7061_v48 = vcombine.low %v3764_v58, %v3771_v46 }
 0x520   : > { %v9520_v20 = vrot.slane %v3773_v24, %v8302_v35  ;;  %v7063_v6 = vcombine.high %v3764_v58, %v3771_v46  ;;  %v10455_v62 = vcombine.high %v9252_v52, %v9255_v47  ;;  %v9527_v51 = vrot.slane %v7057_v3, %v8298_v28 }
 0x521   : > { %v9530_v43 = vrot.slane %v5725_v26, %v8302_v35  ;;  %v10457_v53 = vcombine.high %v9173_v29, %v9176_v56  ;;  %v5318_v0 = vcombine.high %v9179_v2, %v9182_v38  ;;  %v9542_v52 = vrot.slane %v7059_v36, %v8298_v28  ;;  %v3288_v38 = vpop.permute.xlu0 %3287  ;;  %v9577_v46 = vpop.permute.xlu1 %3161 }
 0x522   : > { %7310 = vmatmul.mubr.msk.f32.gmra.mrb[14].mxu0 %vm2888_vm1, %v10455_v62  ;;  %v9545_v47 = vrot.slane %v7061_v48, %v8298_v28  ;;  %v9548_v41 = vrot.slane %v7063_v6, %v8298_v28  ;;  %v5214_v3 = vcombine.high %v5157_v17, %v5189_v44  ;;  %v5422_v56 = vcombine.high %v9263_v63, %v9266_v7 }
 0x523   : > { %10456 = vst [vmem:[#allocation43_spill] sm:$0xff] %v9530_v43  ;;  %7312 = vmatprep.mubr.msk.f32.mxu0 %vm2888_vm1, %v5078_v13  ;;  %v9537_v37 = vrot.slane %v10457_v53, %v8302_v35  ;;  %v5758_v31 = vcombine.high %v9502_v45, %v9530_v43  ;;  %v9553_v29 = vrot.slane %v5318_v0, %v8302_v35 }
 0x524   : > { %v5454_v2 = vcombine.high %v9269_v4, %v9272_v15  ;;  %v7065_v36 = vcombine.low %v9517_v12, %v9520_v20  ;;  %v7067_v58 = vcombine.high %v9517_v12, %v9520_v20  ;;  %v4807_v17 = vcombine.low %v9165_v1, %v9168_v19 }
 0x525   : > { %v4506_v44 = vcombine.low %v9476_v34, %v3276_v57  ;;  %7361 = vmatmul.mubr.msk.f32.gmra.mrb[10].mxu1 %vm2888_vm1, %v5758_v31  ;;  %v5351_v63 = vcombine.low %v9537_v37, %v9553_v29  ;;  %v9571_v7 = vrot.slane %v5422_v56, %v8302_v35  ;;  %v4507_v15 = vcombine.high %v9476_v34, %v3276_v57 }
 0x526   : > { %7313 = vmatmul.mubr.msk.f32.gmra.mrb[16].mxu0 %vm2888_vm1, %v5214_v3  ;;  %v9574_v4 = vrot.slane %v5454_v2, %v8302_v35  ;;  %v5558_v24 = vcombine.high %v9365_v49, %v9368_v5  ;;  %v5590_v26 = vcombine.high %v9388_v25, %v9391_v21  ;;  %v4522_v13 = vcombine.low %v3264_v18, %v3288_v38 }
 0x527   : > { %7315 = vmatprep.mubr.msk.f32.mxu0 %vm2888_vm1, %v4807_v17  ;;  %v4514_v30 = vrot.slane %v4506_v44, %v8298_v28  ;;  %7363 = vmatprep.mubr.msk.f32.mxu1 %vm2888_vm1, %v5351_v63  ;;  %v4521_v34 = vrot.slane %v4507_v15, %v8298_v28  ;;  %v4523_v57 = vcombine.high %v3264_v18, %v3288_v38 }
 0x528   : > { %v5487_v12 = vcombine.low %v9571_v7, %v9574_v4  ;;  %v4878_v20 = vcombine.high %v9229_v23, %v9232_v8  ;;  %v9592_v48 = vrot.slane %v5558_v24, %v8302_v35  ;;  %v5604_v49 = vrot.slane %v5590_v26, %v8302_v35 }
 0x529   : > { %v4530_v5 = vrot.slane %v4522_v13, %v8298_v28  ;;  %v4910_v25 = vcombine.high %v9235_v59, %v9238_v54  ;;  %v4537_v21 = vrot.slane %v4523_v57, %v8298_v28  ;;  %v5694_v23 = vcombine.high %v9450_v14, %v9453_v42  ;;  %v3174_v59 = vpop.permute.xlu0 %3173  ;;  %v3186_v14 = vpop.permute.xlu1 %3185 }
 0x52a   : > { %7364 = vmatmul.mubr.msk.f32.gmra.mrb[12].mxu1 %vm2888_vm1, %v5487_v12  ;;  %v9601_v6 = vrot.slane %v4878_v20, %v8302_v35  ;;  %v5726_v8 = vcombine.high %v9458_v9, %v9461_v60  ;;  %v5623_v18 = vcombine.low %v9592_v48, %v5604_v49  ;;  %v5014_v2 = vcombine.high %v9337_v11, %v9344_v10 }
 0x52b   : > { %v4570_v62 = vcombine.low %v4514_v30, %v4530_v5  ;;  %v4571_v53 = vcombine.high %v4514_v30, %v4530_v5  ;;  %v9609_v0 = vrot.slane %v4910_v25, %v8302_v35  ;;  %v4586_v54 = vcombine.low %v4521_v34, %v4537_v21 }
 0x52c   : > { %v4587_v3 = vcombine.high %v4521_v34, %v4537_v21  ;;  %v9612_v31 = vrot.slane %v5694_v23, %v8302_v35  ;;  %v9615_v56 = vrot.slane %v5726_v8, %v8302_v35  ;;  %7366 = vmatprep.mubr.msk.f32.mxu1 %vm2888_vm1, %v5623_v18  ;;  %v5046_v63 = vcombine.high %v9347_v16, %v9350_v40 }
 0x52d   : > { %v4578_v42 = vrot.slane %v4570_v62, %v8302_v35  ;;  %v4585_v9 = vrot.slane %v4571_v53, %v8302_v35  ;;  %v4943_v60 = vcombine.low %v9601_v6, %v9609_v0  ;;  %v9625_v38 = vrot.slane %v4586_v54, %v8302_v35  ;;  %v3164_v57 = vpop.permute.xlu1 %3163  ;;  %v10458_v62 = vld [vmem:[#allocation27_spill] sm:$0xff]  ;;  %v10459_v53 = vld [vmem:[#allocation26_spill] sm:$0xff] }
 0x52e   : > { %v9628_v17 = vrot.slane %v4587_v3, %v8302_v35  ;;  %v5759_v44 = vcombine.low %v9612_v31, %v9615_v56  ;;  %v9636_v24 = vrot.slane %v5014_v2, %v8302_v35  ;;  %v5352_v11 = vcombine.high %v9537_v37, %v9553_v29  ;;  %v10460_v54 = vld [vmem:[#allocation31_spill] sm:$0xff]  ;;  %v10461_v3 = vld [vmem:[#allocation30_spill] sm:$0xff] }
 0x52f   : > { %v7109_v15 = vcombine.low %v4578_v42, %v4585_v9  ;;  %v7111_v30 = vcombine.high %v4578_v42, %v4585_v9  ;;  %7316 = vmatmul.mubr.msk.f32.gmra.mrb[18].mxu0 %vm2888_vm1, %v4943_v60  ;;  %v9641_v10 = vrot.slane %v7065_v36, %v8298_v28  ;;  %v9644_v26 = vrot.slane %v7067_v58, %v8298_v28  ;;  %v3198_v36 = vpop.permute.xlu0 %3197  ;;  %v10462_v9 = vld [vmem:[#allocation35_spill] sm:$0xff]  ;;  %v10463_v60 = vld [vmem:[#allocation34_spill] sm:$0xff] }
 0x530   : > { %7367 = vmatmul.mubr.msk.f32.gmra.mrb[14].mxu1 %vm2888_vm1, %v5759_v44  ;;  %v5060_v16 = vrot.slane %v5046_v63, %v8302_v35  ;;  %v5150_v40 = vcombine.high %v9426_v55, %v9429_v33  ;;  %v7113_v12 = vcombine.low %v9625_v38, %v9628_v17  ;;  %v7115_v37 = vcombine.high %v9625_v38, %v9628_v17 }
 0x531   : > { %v9651_v13 = vrot.slane %v7109_v15, %v8298_v28  ;;  %7369 = vmatprep.mubr.msk.f32.mxu1 %vm2888_vm1, %v5352_v11  ;;  %v5182_v29 = vcombine.high %v9432_v61, %v9435_v39  ;;  %v9661_v58 = vrot.slane %v7111_v30, %v8298_v28  ;;  %v5488_v34 = vcombine.high %v9571_v7, %v9574_v4  ;;  %v10464_v15 = vld [vmem:[#allocation37_spill] sm:$0xff]  ;;  %v10465_v30 = vld [vmem:[#allocation36_spill] sm:$0xff] }
 0x532   : > { %v5079_v55 = vcombine.low %v9636_v24, %v5060_v16  ;;  %v9665_v33 = vrot.slane %v5150_v40, %v8302_v35  ;;  %v4808_v5 = vcombine.high %v9165_v1, %v9168_v19  ;;  %v4031_v61 = vcombine.low %v9577_v46, %v3186_v14 }
 0x533   : > { %v5196_v20 = vrot.slane %v5182_v29, %v8302_v35  ;;  %v4032_v39 = vcombine.high %v9577_v46, %v3186_v14  ;;  %v5624_v25 = vcombine.high %v9592_v48, %v5604_v49  ;;  %v4047_v21 = vcombine.low %v3174_v59, %v3198_v36  ;;  %v3176_v42 = vpop.permute.xlu0 %3175 }
 0x534   : > { %7318 = vmatprep.mubr.msk.f32.mxu0 %vm2888_vm1, %v5079_v55  ;;  %7370 = vmatmul.mubr.msk.f32.gmra.mrb[16].mxu1 %vm2888_vm1, %v5488_v34  ;;  %v4048_v23 = vcombine.high %v3174_v59, %v3198_v36  ;;  %v9678_v7 = vrot.slane %v7113_v12, %v8298_v28  ;;  %v4039_v8 = vrot.slane %v4031_v61, %v8298_v28 }
 0x535   : > { %v5215_v4 = vcombine.low %v9665_v33, %v5196_v20  ;;  %v4046_v1 = vrot.slane %v4032_v39, %v8298_v28  ;;  %7372 = vmatprep.mubr.msk.f32.mxu1 %vm2888_vm1, %v5624_v25  ;;  %v4055_v19 = vrot.slane %v4047_v21, %v8298_v28  ;;  %v4944_v48 = vcombine.high %v9601_v6, %v9609_v0 }
 0x536   : > { %v4062_v46 = vrot.slane %v4048_v23, %v8298_v28  ;;  %v5760_v49 = vcombine.high %v9612_v31, %v9615_v56  ;;  %v5080_v18 = vcombine.high %v9636_v24, %v5060_v16  ;;  %v5301_v59 = vcombine.low %v10459_v53, %v10458_v62  ;;  %v3188_v56 = vpop.permute.xlu1 %3187 }
 0x537   : > { %7319 = vmatmul.mubr.msk.f32.gmra.mrb[20].mxu0 %vm2888_vm1, %v5215_v4  ;;  %v5333_v14 = vcombine.low %v10461_v3, %v10460_v54  ;;  %v5437_v2 = vcombine.low %v10463_v60, %v10462_v9  ;;  %v4095_v6 = vcombine.low %v4039_v8, %v4055_v19  ;;  %v4096_v0 = vcombine.high %v4039_v8, %v4055_v19  ;;  %v3200_v4 = vpop.permute.xlu0 %3199 }
 0x538   : > { %7321 = vmatprep.mubr.msk.f32.mxu0 %vm2888_vm1, %v4808_v5  ;;  %v4111_v38 = vcombine.low %v4046_v1, %v4062_v46  ;;  %v4112_v31 = vcombine.high %v4046_v1, %v4062_v46  ;;  %7373 = vmatmul.mubr.msk.f32.gmra.mrb[18].mxu1 %vm2888_vm1, %v5760_v49  ;;  %v9701_v17 = vrot.slane %v5301_v59, %v8302_v35  ;;  %v10467_v49 = vld [vmem:[#allocation38_spill] sm:$0xff] }
 0x539   : > { %v9704_v44 = vrot.slane %v5333_v14, %v8302_v35  ;;  %v9707_v63 = vrot.slane %v5437_v2, %v8302_v35  ;;  %v5469_v24 = vcombine.low %v10465_v30, %v10464_v15  ;;  %v4103_v11 = vrot.slane %v4095_v6, %v8302_v35 }
 0x53a   : > { %v4110_v16 = vrot.slane %v4096_v0, %v8302_v35  ;;  %v9714_v40 = vrot.slane %v4111_v38, %v8302_v35  ;;  %v9717_v12 = vrot.slane %v4112_v31, %v8302_v35  ;;  %v4370_v55 = vcombine.low %v3164_v57, %v3188_v56  ;;  %v3298_v0 = vpop.permute.xlu1 %3297 }
 0x53b   : > { %7322 = vmatmul.mubr.msk.f32.gmra.mrb[22].mxu0 %vm2888_vm1, %v4944_v48  ;;  %v5353_v29 = vcombine.low %v9701_v17, %v9704_v44  ;;  %v9723_v36 = vrot.slane %v5469_v24, %v8302_v35  ;;  %v4371_v34 = vcombine.high %v3164_v57, %v3188_v56  ;;  %v9726_v5 = vrot.slane %v7115_v37, %v8298_v28  ;;  %v10466_v48 = vld [vmem:[#allocation39_spill] sm:$0xff] }
 0x53c   : > { %v7069_v61 = vcombine.low %v4103_v11, %v4110_v16  ;;  %v7071_v39 = vcombine.high %v4103_v11, %v4110_v16  ;;  %7324 = vmatprep.mubr.msk.f32.mxu0 %vm2888_vm1, %v5080_v18  ;;  %v5216_v25 = vcombine.high %v9665_v33, %v5196_v20  ;;  %v7073_v21 = vcombine.low %v9714_v40, %v9717_v12 }
 0x53d   : > { %v7075_v23 = vcombine.high %v9714_v40, %v9717_v12  ;;  %7375 = vmatprep.mubr.msk.f32.mxu1 %vm2888_vm1, %v5353_v29  ;;  %v5489_v57 = vcombine.low %v9707_v63, %v9723_v36  ;;  %v4757_v37 = vcombine.low %v9507_v27, %v9510_v32  ;;  %v4378_v20 = vrot.slane %v4370_v55, %v8298_v28 }
 0x53e   : > { %v9740_v8 = vrot.slane %v7069_v61, %v8298_v28  ;;  %v9743_v33 = vrot.slane %v7071_v39, %v8298_v28  ;;  %v4385_v1 = vrot.slane %v4371_v34, %v8298_v28  ;;  %v4789_v46 = vcombine.low %v9527_v51, %v9542_v52 }
 0x53f   : > { %7325 = vmatmul.mubr.msk.f32.gmra.mrb[24].mxu0 %vm2888_vm1, %v5216_v25  ;;  %7376 = vmatmul.mubr.msk.f32.gmra.mrb[20].mxu1 %vm2888_vm1, %v5489_v57  ;;  %v9750_v19 = vrot.slane %v4757_v37, %v8302_v35  ;;  %v5573_v18 = vcombine.low %v10467_v49, %v10466_v48  ;;  %v5605_v59 = vcombine.low %v9487_v50, %v9495_v22  ;;  %v3310_v37 = vpop.permute.xlu0 %3309 }
 0x540   : > { %v4386_v14 = vcombine.low %v3176_v42, %v3200_v4  ;;  %v4387_v2 = vcombine.high %v3176_v42, %v3200_v4  ;;  %v4893_v6 = vcombine.low %v9545_v47, %v9548_v41  ;;  %v9761_v38 = vrot.slane %v4789_v46, %v8302_v35 }
 0x541   : > { %v9764_v31 = vrot.slane %v5573_v18, %v8302_v35  ;;  %v4925_v56 = vcombine.low %v9641_v10, %v9644_v26  ;;  %v5709_v24 = vcombine.low %v9651_v13, %v9661_v58  ;;  %v9771_v11 = vrot.slane %v5605_v59, %v8302_v35 }
 0x542   : > { %v4394_v42 = vrot.slane %v4386_v14, %v8298_v28  ;;  %v4401_v16 = vrot.slane %v4387_v2, %v8298_v28  ;;  %v9776_v40 = vrot.slane %v4893_v6, %v8302_v35  ;;  %v4809_v12 = vcombine.low %v9750_v19, %v9761_v38 }
 0x543   : > { %v9781_v29 = vrot.slane %v4925_v56, %v8302_v35  ;;  %v9784_v55 = vrot.slane %v5709_v24, %v8302_v35  ;;  %v5741_v34 = vcombine.low %v9678_v7, %v9726_v5  ;;  %v5625_v61 = vcombine.low %v9764_v31, %v9771_v11 }
 0x544   : > { %v4434_v39 = vcombine.low %v4378_v20, %v4394_v42  ;;  %v4435_v25 = vcombine.high %v4378_v20, %v4394_v42  ;;  %v4450_v57 = vcombine.low %v4385_v1, %v4401_v16  ;;  %7327 = vmatprep.mubr.msk.f32.mxu0 %vm2888_vm1, %v4809_v12  ;;  %v4451_v4 = vcombine.high %v4385_v1, %v4401_v16  ;;  %v3300_v1 = vpop.permute.xlu1 %3299 }
 0x545   : > { %v4945_v46 = vcombine.low %v9776_v40, %v9781_v29  ;;  %v9794_v18 = vrot.slane %v5741_v34, %v8302_v35  ;;  %v10468_v59 = vmov 0.0   ;;  %v9798_v2 = vrot.slane %v7073_v21, %v8298_v28  ;;  %7378 = vmatprep.mubr.msk.f32.mxu1 %vm2888_vm1, %v5625_v61  ;;  %v10469_v61 = vld [vmem:[#allocation23_spill] sm:$0xff] }
 0x546   : > { %v3609_v14 = vcombine.high %v3298_v0, %v10468_v59  ;;  %v4442_v20 = vrot.slane %v4434_v39, %v8302_v35  ;;  %v4449_v6 = vrot.slane %v4435_v25, %v8302_v35  ;;  %v4458_v56 = vrot.slane %v4450_v57, %v8302_v35 }
 0x547   : > { %v4465_v24 = vrot.slane %v4451_v4, %v8302_v35  ;;  %7328 = vmatmul.mubr.msk.f32.gmra.mrb[26].mxu0 %vm2888_vm1, %v4945_v46  ;;  %v5761_v42 = vcombine.low %v9784_v55, %v9794_v18  ;;  %v5354_v21 = vcombine.high %v9701_v17, %v9704_v44  ;;  %v3593_v39 = vcombine.low %v10469_v61, %v3310_v37 }
 0x548   : > { %v3623_v16 = vrot.slane %v3609_v14, %v8298_v28  ;;  %v7077_v12 = vcombine.low %v4442_v20, %v4449_v6  ;;  %v7079_v34 = vcombine.high %v4442_v20, %v4449_v6  ;;  %v3594_v25 = vcombine.high %v10469_v61, %v3310_v37  ;;  %v3312_v20 = vpop.permute.xlu0 %3311 }
 0x549   : > { %v9814_v57 = vrot.slane %v7075_v23, %v8298_v28  ;;  %v7081_v4 = vcombine.low %v4458_v56, %v4465_v24  ;;  %7379 = vmatmul.mubr.msk.f32.gmra.mrb[22].mxu1 %vm2888_vm1, %v5761_v42  ;;  %v3616_v46 = vrot.slane %v3298_v0, %v8298_v28  ;;  %v3948_v45 = vcombine.high %v3300_v1, %v10468_v59 }
 0x54a   : > { %v7083_v14 = vcombine.high %v4458_v56, %v4465_v24  ;;  %7381 = vmatprep.mubr.msk.f32.mxu1 %vm2888_vm1, %v5354_v21  ;;  %v3601_v17 = vrot.slane %v3593_v39, %v8298_v28  ;;  %v3608_v44 = vrot.slane %v3594_v25, %v8298_v28  ;;  %v5490_v37 = vcombine.high %v9707_v63, %v9723_v36  ;;  %v10470_v36 = vld [vmem:[#allocation22_spill] sm:$0xff] }
 0x54b   : > { %v9825_v23 = vrot.slane %v7077_v12, %v8298_v28  ;;  %v9828_v6 = vrot.slane %v7079_v34, %v8298_v28  ;;  %v9831_v0 = vrot.slane %v7081_v4, %v8298_v28  ;;  %v3962_v56 = vrot.slane %v3948_v45, %v8298_v28 }
 0x54c   : > { %v3624_v24 = vcombine.low %v3601_v17, %v3616_v46  ;;  %v3625_v42 = vcombine.high %v3601_v17, %v3616_v46  ;;  %v3640_v21 = vcombine.low %v3608_v44, %v3623_v16  ;;  %v3641_v61 = vcombine.high %v3608_v44, %v3623_v16 }
 0x54d   : > { %7382 = vmatmul.mubr.msk.f32.gmra.mrb[24].mxu1 %vm2888_vm1, %v5490_v37  ;;  %v5626_v63 = vcombine.high %v9764_v31, %v9771_v11  ;;  %v3932_v12 = vcombine.low %v10470_v36, %v3312_v20  ;;  %v3933_v39 = vcombine.high %v10470_v36, %v3312_v20  ;;  %v5029_v34 = vcombine.low %v9740_v8, %v9743_v33 }
 0x54e   : > { %v3632_v25 = vrot.slane %v3624_v24, %v8302_v35  ;;  %v3639_v45 = vrot.slane %v3625_v42, %v8302_v35  ;;  %v3648_v4 = vrot.slane %v3640_v21, %v8302_v35  ;;  %v3655_v16 = vrot.slane %v3641_v61, %v8302_v35  ;;  %v3302_v42 = vpop.permute.xlu1 %3301 }
 0x54f   : > { %v3955_v46 = vrot.slane %v3300_v1, %v8298_v28  ;;  %7384 = vmatprep.mubr.msk.f32.mxu1 %vm2888_vm1, %v5626_v63  ;;  %v3940_v31 = vrot.slane %v3932_v12, %v8298_v28  ;;  %v3947_v11 = vrot.slane %v3933_v39, %v8298_v28  ;;  %v5061_v17 = vcombine.low %v9798_v2, %v9814_v57 }
 0x550   : > { %v5765_v44 = vcombine.low %v3632_v25, %v3639_v45  ;;  %v7116_v37 = vcombine.high %v3632_v25, %v3639_v45  ;;  %v5781_v20 = vcombine.low %v3648_v4, %v3655_v16  ;;  %v7117_v24 = vcombine.high %v3648_v4, %v3655_v16 }
 0x551   : > { %v3963_v36 = vcombine.low %v3940_v31, %v3955_v46  ;;  %v3964_v21 = vcombine.high %v3940_v31, %v3955_v46  ;;  %v3979_v43 = vcombine.low %v3947_v11, %v3962_v56  ;;  %v3980_v61 = vcombine.high %v3947_v11, %v3962_v56  ;;  %v3314_v31 = vpop.permute.xlu0 %3313 }
 0x552   : > { %v9852_v1 = vrot.slane %v7083_v14, %v8298_v28  ;;  %v9855_v63 = vrot.slane %v5765_v44, %v8298_v28  ;;  %v9858_v12 = vrot.slane %v7116_v37, %v8298_v28  ;;  %v9861_v39 = vrot.slane %v5029_v34, %v8302_v35 }
 0x553   : > { %v3971_v25 = vrot.slane %v3963_v36, %v8302_v35  ;;  %v3978_v45 = vrot.slane %v3964_v21, %v8302_v35  ;;  %v3987_v4 = vrot.slane %v3979_v43, %v8302_v35  ;;  %v3994_v56 = vrot.slane %v3980_v61, %v8302_v35 }
 0x554   : > { %v9868_v14 = vrot.slane %v5781_v20, %v8298_v28  ;;  %v9871_v16 = vrot.slane %v5061_v17, %v8302_v35  ;;  %v5762_v46 = vcombine.high %v9784_v55, %v9794_v18  ;;  %v4287_v34 = vcombine.high %v3302_v42, %v10468_v59  ;;  %v3304_v18 = vpop.permute.xlu1 %3303 }
 0x555   : > { %v9877_v11 = vrot.slane %v7117_v24, %v8298_v28  ;;  %v5832_v44 = vcombine.low %v3971_v25, %v3978_v45  ;;  %v7118_v37 = vcombine.high %v3971_v25, %v3978_v45  ;;  %v4294_v43 = vrot.slane %v3302_v42, %v8298_v28 }
 0x556   : > { %v5848_v36 = vcombine.low %v3987_v4, %v3994_v56  ;;  %v5081_v20 = vcombine.low %v9861_v39, %v9871_v16  ;;  %7385 = vmatmul.mubr.msk.f32.gmra.mrb[26].mxu1 %vm2888_vm1, %v5762_v46  ;;  %v5302_v17 = vcombine.high %v10459_v53, %v10458_v62  ;;  %v5334_v55 = vcombine.high %v10461_v3, %v10460_v54  ;;  %v10471_v53 = vld [vmem:[#allocation25_spill] sm:$0xff] }
 0x557   : > { %v9888_v24 = vrot.slane %v5832_v44, %v8298_v28  ;;  %v9891_v21 = vrot.slane %v7118_v37, %v8298_v28  ;;  %v7119_v42 = vcombine.high %v3987_v4, %v3994_v56  ;;  %v4301_v61 = vrot.slane %v4287_v34, %v8298_v28 }
 0x558   : > { %7330 = vmatprep.mubr.msk.f32.mxu0 %vm2888_vm1, %v5081_v20  ;;  %v9896_v25 = vrot.slane %v5302_v17, %v8302_v35  ;;  %v9899_v62 = vrot.slane %v5334_v55, %v8302_v35  ;;  %v4271_v54 = vcombine.low %v10471_v53, %v3314_v31  ;;  %v4272_v3 = vcombine.high %v10471_v53, %v3314_v31  ;;  %v3316_v20 = vpop.permute.xlu0 %3315 }
 0x559   : > { %v5438_v45 = vcombine.high %v10463_v60, %v10462_v9  ;;  %v5470_v4 = vcombine.high %v10465_v30, %v10464_v15  ;;  %v4626_v56 = vcombine.high %v3304_v18, %v10468_v59  ;;  %v4633_v46 = vrot.slane %v3304_v18, %v8298_v28 }
 0x55a   : > { %v5355_v34 = vcombine.low %v9896_v25, %v9899_v62  ;;  %v4279_v44 = vrot.slane %v4271_v54, %v8298_v28  ;;  %v4286_v37 = vrot.slane %v4272_v3, %v8298_v28  ;;  %v5574_v31 = vcombine.high %v10467_v49, %v10466_v48  ;;  %v10472_v54 = vld [vmem:[#allocation24_spill] sm:$0xff] }
 0x55b   : > { %v9916_v9 = vrot.slane %v5438_v45, %v8302_v35  ;;  %v9919_v60 = vrot.slane %v5470_v4, %v8302_v35  ;;  %v4640_v15 = vrot.slane %v4626_v56, %v8298_v28  ;;  %v5606_v30 = vcombine.high %v9487_v50, %v9495_v22 }
 0x55c   : > { %7387 = vmatprep.mubr.msk.f32.mxu1 %vm2888_vm1, %v5355_v34  ;;  %v4302_v59 = vcombine.low %v4279_v44, %v4294_v43  ;;  %v4303_v17 = vcombine.high %v4279_v44, %v4294_v43  ;;  %v4318_v55 = vcombine.low %v4286_v37, %v4301_v61  ;;  %v4319_v18 = vcombine.high %v4286_v37, %v4301_v61 }
 0x55d   : > { %v5491_v48 = vcombine.low %v9916_v9, %v9919_v60  ;;  %v9928_v49 = vrot.slane %v5574_v31, %v8302_v35  ;;  %v9931_v53 = vrot.slane %v5606_v30, %v8302_v35  ;;  %v4610_v3 = vcombine.low %v10472_v54, %v3316_v20 }
 0x55e   : > { %v4310_v45 = vrot.slane %v4302_v59, %v8302_v35  ;;  %v4317_v50 = vrot.slane %v4303_v17, %v8302_v35  ;;  %v4326_v22 = vrot.slane %v4318_v55, %v8302_v35  ;;  %v4333_v43 = vrot.slane %v4319_v18, %v8302_v35 }
 0x55f   : > { %7388 = vmatmul.mubr.msk.f32.gmra.mrb[28].mxu1 %vm2888_vm1, %v5491_v48  ;;  %v5627_v61 = vcombine.low %v9928_v49, %v9931_v53  ;;  %v4611_v4 = vcombine.high %v10472_v54, %v3316_v20  ;;  %v4618_v56 = vrot.slane %v4610_v3, %v8298_v28  ;;  %v5165_v34 = vcombine.low %v9825_v23, %v9828_v6 }
 0x560   : > { %v9946_v44 = vrot.slane %v5848_v36, %v8298_v28  ;;  %v5899_v37 = vcombine.low %v4310_v45, %v4317_v50  ;;  %v7120_v31 = vcombine.high %v4310_v45, %v4317_v50  ;;  %v5915_v30 = vcombine.low %v4326_v22, %v4333_v43 }
 0x561   : > { %v9949_v59 = vrot.slane %v7119_v42, %v8298_v28  ;;  %7390 = vmatprep.mubr.msk.f32.mxu1 %vm2888_vm1, %v5627_v61  ;;  %v4625_v17 = vrot.slane %v4611_v4, %v8298_v28  ;;  %v4641_v55 = vcombine.low %v4618_v56, %v4633_v46  ;;  %v4642_v20 = vcombine.high %v4618_v56, %v4633_v46 }
 0x562   : > { %v9954_v18 = vrot.slane %v5899_v37, %v8298_v28  ;;  %v9957_v48 = vrot.slane %v7120_v31, %v8298_v28  ;;  %v7121_v36 = vcombine.high %v4326_v22, %v4333_v43  ;;  %v9960_v54 = vrot.slane %v5165_v34, %v8302_v35 }
 0x563   : > { %v4649_v3 = vrot.slane %v4641_v55, %v8302_v35  ;;  %v4656_v42 = vrot.slane %v4642_v20, %v8302_v35  ;;  %v4657_v45 = vcombine.low %v4625_v17, %v4640_v15  ;;  %v4658_v50 = vcombine.high %v4625_v17, %v4640_v15 }
 0x564   : > { %v9965_v61 = vrot.slane %v5915_v30, %v8298_v28  ;;  %v5197_v46 = vcombine.low %v9831_v0, %v9852_v1  ;;  %v5710_v4 = vcombine.high %v9651_v13, %v9661_v58  ;;  %v5742_v22 = vcombine.high %v9678_v7, %v9726_v5 }
 0x565   : > { %v4665_v43 = vrot.slane %v4657_v45, %v8302_v35  ;;  %v4672_v56 = vrot.slane %v4658_v50, %v8302_v35  ;;  %v5966_v34 = vcombine.low %v4649_v3, %v4656_v42  ;;  %v7122_v37 = vcombine.high %v4649_v3, %v4656_v42 }
 0x566   : > { %v5205_v15 = vrot.slane %v5197_v46, %v8302_v35  ;;  %v5724_v31 = vrot.slane %v5710_v4, %v8302_v35  ;;  %v5756_v30 = vrot.slane %v5742_v22, %v8302_v35  ;;  %v5356_v17 = vcombine.high %v9896_v25, %v9899_v62 }
 0x567   : > { %v9981_v13 = vrot.slane %v7121_v36, %v8298_v28  ;;  %v5982_v58 = vcombine.low %v4665_v43, %v4672_v56  ;;  %v7123_v7 = vcombine.high %v4665_v43, %v4672_v56  ;;  %v4810_v5 = vcombine.high %v9750_v19, %v9761_v38 }
 0x568   : > { %v9986_v55 = vrot.slane %v5966_v34, %v8298_v28  ;;  %v9989_v20 = vrot.slane %v7122_v37, %v8298_v28  ;;  %v5217_v3 = vcombine.low %v9960_v54, %v5205_v15  ;;  %v5763_v42 = vcombine.low %v5724_v31, %v5756_v30 }
 0x569   : > { %v9993_v45 = vrot.slane %v5982_v58, %v8298_v28  ;;  %v9996_v25 = vrot.slane %v7123_v7, %v8298_v28  ;;  %v4946_v62 = vcombine.high %v9776_v40, %v9781_v29  ;;  %v5492_v19 = vcombine.high %v9916_v9, %v9919_v60 }
 0x56a   : > { %7331 = vmatmul.mubr.msk.f32.gmra.mrb[28].mxu0 %vm2888_vm1, %v5217_v3  ;;  %7391 = vmatmul.mubr.msk.f32.gmra.mrb[30].mxu1 %vm2888_vm1, %v5763_v42  ;;  %v5082_v38 = vcombine.high %v9861_v39, %v9871_v16  ;;  %v5628_v36 = vcombine.high %v9928_v49, %v9931_v53  ;;  %v4758_v28 = vcombine.high %v9507_v27, %v9510_v32 }
 0x56b   : > { %7333 = vmatprep.mubr.msk.f32.mxu0 %vm2888_vm1, %v4810_v5  ;;  %7393 = vmatprep.mubr.msk.f32.mxu1 %vm2888_vm1, %v5356_v17  ;;  %v4790_v40 = vcombine.high %v9527_v51, %v9542_v52  ;;  %v5797_v29 = vcombine.low %v9855_v63, %v9858_v12  ;;  %v5813_v9 = vcombine.low %v9868_v14, %v9877_v11 }
 0x56c   : > { %v4772_v39 = vrot.slane %v4758_v28, %v8302_v35  ;;  %v4894_v16 = vcombine.high %v9545_v47, %v9548_v41  ;;  %v4926_v27 = vcombine.high %v9641_v10, %v9644_v26  ;;  %v5864_v32 = vcombine.low %v9888_v24, %v9891_v21 }
 0x56d   : > { %v4804_v60 = vrot.slane %v4790_v40, %v8302_v35  ;;  %v5805_v51 = vrot.slane %v5797_v29, %v8302_v35  ;;  %v5821_v52 = vrot.slane %v5813_v9, %v8302_v35  ;;  %v5880_v49 = vcombine.low %v9946_v44, %v9949_v59 }
 0x56e   : > { %7334 = vmatmul.mubr.msk.f32.gmra.mrb[30].mxu0 %vm2888_vm1, %v4946_v62  ;;  %7394 = vmatmul.mubr.msk.f32.gmra.mrb[32].mxu1 %vm2888_vm1, %v5492_v19  ;;  %v5218_v47 = vcombine.high %v9960_v54, %v5205_v15  ;;  %v5764_v41 = vcombine.high %v5724_v31, %v5756_v30  ;;  %v4908_v10 = vrot.slane %v4894_v16, %v8302_v35 }
 0x56f   : > { %7336 = vmatprep.mubr.msk.f32.mxu0 %vm2888_vm1, %v5082_v38  ;;  %7396 = vmatprep.mubr.msk.f32.mxu1 %vm2888_vm1, %v5628_v36  ;;  %v4940_v26 = vrot.slane %v4926_v27, %v8302_v35  ;;  %v5872_v53 = vrot.slane %v5864_v32, %v8302_v35  ;;  %v5888_v50 = vrot.slane %v5880_v49, %v8302_v35  ;;  %v10478_v49 = vld [vmem:[#allocation41_spill] sm:$0xff] }
 0x570   : > { %v4811_v46 = vcombine.low %v4772_v39, %v4804_v60  ;;  %v5030_v4 = vcombine.high %v9740_v8, %v9743_v33  ;;  %v5062_v54 = vcombine.high %v9798_v2, %v9814_v57  ;;  %v5931_v22 = vcombine.low %v9954_v18, %v9957_v48 }
 0x571   : > { %v5829_v43 = vcombine.low %v5805_v51, %v5821_v52  ;;  %v5947_v56 = vcombine.low %v9965_v61, %v9981_v13  ;;  %v5166_v34 = vcombine.high %v9825_v23, %v9828_v6  ;;  %v5198_v37 = vcombine.high %v9831_v0, %v9852_v1 }
 0x572   : > { %7337 = vmatmul.mubr.msk.f32.gmra.mrb[32].mxu0 %vm2888_vm1, %v5218_v47  ;;  %7397 = vmatmul.mubr.msk.f32.gmra.mrb[34].mxu1 %vm2888_vm1, %v5764_v41  ;;  %v5044_v8 = vrot.slane %v5030_v4, %v8302_v35  ;;  %v5076_v33 = vrot.slane %v5062_v54, %v8302_v35  ;;  %v5939_v2 = vrot.slane %v5931_v22, %v8302_v35  ;;  %v10479_v47 = vld [vmem:[#allocation40_spill] sm:$0xff] }
 0x573   : > { %7339 = vmatprep.mubr.msk.f32.mxu0 %vm2888_vm1, %v4811_v46  ;;  %7399 = vmatprep.mubr.msk.f32.mxu1 %vm2888_vm1, %v5829_v43  ;;  %v4947_v57 = vcombine.low %v4908_v10, %v4940_v26  ;;  %v5896_v15 = vcombine.low %v5872_v53, %v5888_v50  ;;  %v5955_v23 = vrot.slane %v5947_v56, %v8302_v35 }
 0x574   : > { %v5180_v6 = vrot.slane %v5166_v34, %v8302_v35  ;;  %v5212_v0 = vrot.slane %v5198_v37, %v8302_v35  ;;  %v5998_v1 = vcombine.low %v9986_v55, %v9989_v20  ;;  %v6014_v31 = vcombine.low %v9993_v45, %v9996_v25 }
 0x575   : > { %v5083_v30 = vcombine.low %v5044_v8, %v5076_v33  ;;  %v5963_v17 = vcombine.low %v5939_v2, %v5955_v23  ;;  %v4812_v42 = vcombine.high %v4772_v39, %v4804_v60  ;;  %v5830_v62 = vcombine.high %v5805_v51, %v5821_v52 }
 0x576   : > { %7340 = vmatmul.mubr.msk.f32.gmra.mrb[34].mxu0 %vm2888_vm1, %v4947_v57  ;;  %7400 = vmatmul.mubr.msk.f32.gmra.mrb[36].mxu1 %vm2888_vm1, %v5896_v15  ;;  %v6006_v58 = vrot.slane %v5998_v1, %v8302_v35  ;;  %v6022_v7 = vrot.slane %v6014_v31, %v8302_v35  ;;  %v5219_v5 = vcombine.low %v5180_v6, %v5212_v0 }
 0x577   : > { %7342 = vmatprep.mubr.msk.f32.mxu0 %vm2888_vm1, %v5083_v30  ;;  %7402 = vmatprep.mubr.msk.f32.mxu1 %vm2888_vm1, %v5963_v17  ;;  %v5798_v19 = vcombine.high %v9855_v63, %v9858_v12  ;;  %v5814_v38 = vcombine.high %v9868_v14, %v9877_v11  ;;  %v4948_v36 = vcombine.high %v4908_v10, %v4940_v26  ;;  %v10480_v26 = vld [vmem:[#allocation43_spill] sm:$0xff] }
 0x578   : > { %v6030_v3 = vcombine.low %v6006_v58, %v6022_v7  ;;  %v5897_v28 = vcombine.high %v5872_v53, %v5888_v50  ;;  %v5084_v40 = vcombine.high %v5044_v8, %v5076_v33  ;;  %v5964_v29 = vcombine.high %v5939_v2, %v5955_v23  ;;  %v10481_v53 = vld [vmem:[#allocation42_spill] sm:$0xff] }
 0x579   : > { %v5865_v9 = vcombine.high %v9888_v24, %v9891_v21  ;;  %v5881_v63 = vcombine.high %v9946_v44, %v9949_v59  ;;  %v5812_v12 = vrot.slane %v5798_v19, %v8302_v35  ;;  %v5828_v14 = vrot.slane %v5814_v38, %v8302_v35 }
 0x57a   : > { %7343 = vmatmul.mubr.msk.f32.gmra.mrb[36].mxu0 %vm2888_vm1, %v5219_v5  ;;  %7403 = vmatmul.mubr.msk.f32.gmra.mrb[38].mxu1 %vm2888_vm1, %v6030_v3  ;;  %v5932_v11 = vcombine.high %v9954_v18, %v9957_v48  ;;  %v5948_v39 = vcombine.high %v9965_v61, %v9981_v13  ;;  %v5220_v24 = vcombine.high %v5180_v6, %v5212_v0  ;;  %v10473_v61 = vld [vmem:[#allocation29_spill] sm:$0xff]  ;;  %v10474_v13 = vld [vmem:[#allocation28_spill] sm:$0xff] }
 0x57b   : > { %7345 = vmatprep.mubr.msk.f32.mxu0 %vm2888_vm1, %v4812_v42  ;;  %7405 = vmatprep.mubr.msk.f32.mxu1 %vm2888_vm1, %v5830_v62  ;;  %v6031_v21 = vcombine.high %v6006_v58, %v6022_v7  ;;  %v5879_v44 = vrot.slane %v5865_v9, %v8302_v35  ;;  %v5895_v59 = vrot.slane %v5881_v63, %v8302_v35 }
 0x57c   : > { %v5999_v18 = vcombine.high %v9986_v55, %v9989_v20  ;;  %v6015_v48 = vcombine.high %v9993_v45, %v9996_v25  ;;  %v5349_v16 = vcombine.low %v10474_v13, %v10473_v61  ;;  %v5831_v27 = vcombine.low %v5812_v12, %v5828_v14  ;;  %v10476_v55 = vld [vmem:[#allocation33_spill] sm:$0xff]  ;;  %v10477_v20 = vld [vmem:[#allocation32_spill] sm:$0xff] }
 0x57d   : > { %v5946_v32 = vrot.slane %v5932_v11, %v8302_v35  ;;  %v5962_v60 = vrot.slane %v5948_v39, %v8302_v35  ;;  %v5485_v45 = vcombine.low %v10477_v20, %v10476_v55  ;;  %v5898_v25 = vcombine.low %v5879_v44, %v5895_v59 }
 0x57e   : > { %7346 = vmatmul.mubr.msk.f32.gmra.mrb[38].mxu0 %vm2888_vm1, %v4948_v36  ;;  %7406 = vmatmul.mubr.msk.f32.gmra.mrb[40].mxu1 %vm2888_vm1, %v5897_v28  ;;  %v6013_v51 = vrot.slane %v5999_v18, %v8302_v35  ;;  %v6029_v52 = vrot.slane %v6015_v48, %v8302_v35  ;;  %v5621_v41 = vcombine.low %v10479_v47, %v10478_v49 }
 0x57f   : > { %7348 = vmatprep.mubr.msk.f32.mxu0 %vm2888_vm1, %v5084_v40  ;;  %7408 = vmatprep.mubr.msk.f32.mxu1 %vm2888_vm1, %v5964_v29  ;;  %v5965_v10 = vcombine.low %v5946_v32, %v5962_v60  ;;  %v5757_v50 = vcombine.low %v10481_v53, %v10480_v26 }
 0x580   : > { %v6032_v46 = vcombine.low %v6013_v51, %v6029_v52 }
 0x582   : > { %7349 = vmatmul.mubr.msk.f32.gmra.mrb[40].mxu0 %vm2888_vm1, %v5220_v24  ;;  %7409 = vmatmul.mubr.msk.f32.gmra.mrb[42].mxu1 %vm2888_vm1, %v6031_v21 }
 0x583   : > { %7351 = vmatprep.mubr.msk.f32.mxu0 %vm2888_vm1, %v5349_v16  ;;  %7411 = vmatprep.mubr.msk.f32.mxu1 %vm2888_vm1, %v5831_v27 }
 0x586   : > { %7352 = vmatmul.mubr.msk.f32.gmra.mrb[42].mxu0 %vm2888_vm1, %v5485_v45  ;;  %7412 = vmatmul.mubr.msk.f32.gmra.mrb[44].mxu1 %vm2888_vm1, %v5898_v25 }
 0x587   : > { %7354 = vmatprep.mubr.msk.f32.mxu0 %vm2888_vm1, %v5621_v41  ;;  %7414 = vmatprep.mubr.msk.f32.mxu1 %vm2888_vm1, %v5965_v10 }
 0x58a   : > { %7355 = vmatmul.mubr.msk.f32.gmra.mrb[44].mxu0 %vm2888_vm1, %v5757_v50  ;;  %7415 = vmatmul.mubr.msk.f32.gmra.mrb[46].mxu1 %vm2888_vm1, %v6032_v46 }
 0x5c0   : > { %v7305_v35 = vpop.f32.mrb[10].mxu0 }
 0x5c1   : > { %6709 = vst.msk [vmem:[%s10124_s16 + $0x8] sm:$0xff] %vm2897_vm3, %v7305_v35  ;;  %v6329_v4 = vpop.f32.mrb[11].mxu0 }
 0x5c2   : > { %6708 = vst.msk [vmem:[%s10124_s16] sm:$0xff] %vm2897_vm3, %v6329_v4 }
 0x5ca   : > { %v7359_v54 = vpop.f32.mrb[8].mxu1 }
 0x5cb   : > { %6745 = vst.msk [vmem:[%s10124_s16 + $0x128] sm:$0xff] %vm2897_vm3, %v7359_v54  ;;  %v6509_v22 = vpop.f32.mrb[9].mxu1 }
 0x5cc   : > { %6744 = vst.msk [vmem:[%s10124_s16 + $0x120] sm:$0xff] %vm2897_vm3, %v6509_v22 }
 0x5ee   : > { %v7308_v43 = vpop.f32.mrb[12].mxu0 }
 0x5ef   : > { %6711 = vst.msk [vmem:[%s10124_s16 + $0x18] sm:$0xff] %vm2897_vm3, %v7308_v43  ;;  %v6339_v56 = vpop.f32.mrb[13].mxu0 }
 0x5f0   : > { %6710 = vst.msk [vmem:[%s10124_s16 + $0x10] sm:$0xff] %vm2897_vm3, %v6339_v56 }
 0x5f5   : > { %v7311_v34 = vpop.f32.mrb[14].mxu0 }
 0x5f6   : > { %6713 = vst.msk [vmem:[%s10124_s16 + $0x28] sm:$0xff] %vm2897_vm3, %v7311_v34  ;;  %v6349_v37 = vpop.f32.mrb[15].mxu0 }
 0x5f7   : > { %6712 = vst.msk [vmem:[%s10124_s16 + $0x20] sm:$0xff] %vm2897_vm3, %v6349_v37 }
 0x5f8   : > { %v7362_v33 = vpop.f32.mrb[10].mxu1 }
 0x5f9   : > { %v7314_v8 = vpop.f32.mrb[16].mxu0  ;;  %6747 = vst.msk [vmem:[%s10124_s16 + $0x138] sm:$0xff] %vm2897_vm3, %v7362_v33  ;;  %v6519_v57 = vpop.f32.mrb[11].mxu1 }
 0x5fa   : > { %6715 = vst.msk [vmem:[%s10124_s16 + $0x38] sm:$0xff] %vm2897_vm3, %v7314_v8  ;;  %v6359_v2 = vpop.f32.mrb[17].mxu0  ;;  %6746 = vst.msk [vmem:[%s10124_s16 + $0x130] sm:$0xff] %vm2897_vm3, %v6519_v57 }
 0x5fb   : > { %6714 = vst.msk [vmem:[%s10124_s16 + $0x30] sm:$0xff] %vm2897_vm3, %v6359_v2 }
 0x5fd   : > { %v7365_v15 = vpop.f32.mrb[12].mxu1 }
 0x5fe   : > { %6749 = vst.msk [vmem:[%s10124_s16 + $0x148] sm:$0xff] %vm2897_vm3, %v7365_v15  ;;  %v6529_v23 = vpop.f32.mrb[13].mxu1 }
 0x5ff   : > { %6748 = vst.msk [vmem:[%s10124_s16 + $0x140] sm:$0xff] %vm2897_vm3, %v6529_v23 }
 0x602   : > { %v7317_v6 = vpop.f32.mrb[18].mxu0 }
 0x603   : > { %6717 = vst.msk [vmem:[%s10124_s16 + $0x48] sm:$0xff] %vm2897_vm3, %v7317_v6  ;;  %v7368_v0 = vpop.f32.mrb[14].mxu1  ;;  %v6369_v1 = vpop.f32.mrb[19].mxu0 }
 0x604   : > { %6751 = vst.msk [vmem:[%s10124_s16 + $0x158] sm:$0xff] %vm2897_vm3, %v7368_v0  ;;  %6716 = vst.msk [vmem:[%s10124_s16 + $0x40] sm:$0xff] %vm2897_vm3, %v6369_v1  ;;  %v6539_v31 = vpop.f32.mrb[15].mxu1 }
 0x605   : > { %6750 = vst.msk [vmem:[%s10124_s16 + $0x150] sm:$0xff] %vm2897_vm3, %v6539_v31 }
 0x607   : > { %v7371_v30 = vpop.f32.mrb[16].mxu1 }
 0x608   : > { %6753 = vst.msk [vmem:[%s10124_s16 + $0x168] sm:$0xff] %vm2897_vm3, %v7371_v30  ;;  %v6549_v17 = vpop.f32.mrb[17].mxu1 }
 0x609   : > { %6752 = vst.msk [vmem:[%s10124_s16 + $0x160] sm:$0xff] %vm2897_vm3, %v6549_v17 }
 0x60a   : > { %v7320_v58 = vpop.f32.mrb[20].mxu0 }
 0x60b   : > { %6719 = vst.msk [vmem:[%s10124_s16 + $0x58] sm:$0xff] %vm2897_vm3, %v7320_v58  ;;  %v6379_v7 = vpop.f32.mrb[21].mxu0  ;;  %v7374_v5 = vpop.f32.mrb[18].mxu1 }
 0x60c   : > { %6718 = vst.msk [vmem:[%s10124_s16 + $0x50] sm:$0xff] %vm2897_vm3, %v6379_v7  ;;  %6755 = vst.msk [vmem:[%s10124_s16 + $0x178] sm:$0xff] %vm2897_vm3, %v7374_v5  ;;  %v6559_v3 = vpop.f32.mrb[19].mxu1 }
 0x60d   : > { %6754 = vst.msk [vmem:[%s10124_s16 + $0x170] sm:$0xff] %vm2897_vm3, %v6559_v3 }
 0x60e   : > { %v7323_v42 = vpop.f32.mrb[22].mxu0 }
 0x60f   : > { %6721 = vst.msk [vmem:[%s10124_s16 + $0x68] sm:$0xff] %vm2897_vm3, %v7323_v42  ;;  %v6389_v62 = vpop.f32.mrb[23].mxu0 }
 0x610   : > { %6720 = vst.msk [vmem:[%s10124_s16 + $0x60] sm:$0xff] %vm2897_vm3, %v6389_v62 }
 0x612   : > { %v7326_v19 = vpop.f32.mrb[24].mxu0  ;;  %v7377_v38 = vpop.f32.mrb[20].mxu1 }
 0x613   : > { %6723 = vst.msk [vmem:[%s10124_s16 + $0x78] sm:$0xff] %vm2897_vm3, %v7326_v19  ;;  %6757 = vst.msk [vmem:[%s10124_s16 + $0x188] sm:$0xff] %vm2897_vm3, %v7377_v38  ;;  %v6399_v36 = vpop.f32.mrb[25].mxu0  ;;  %v6569_v28 = vpop.f32.mrb[21].mxu1 }
 0x614   : > { %6722 = vst.msk [vmem:[%s10124_s16 + $0x70] sm:$0xff] %vm2897_vm3, %v6399_v36  ;;  %6756 = vst.msk [vmem:[%s10124_s16 + $0x180] sm:$0xff] %vm2897_vm3, %v6569_v28 }
 0x61a   : > { %v7329_v40 = vpop.f32.mrb[26].mxu0 }
 0x61b   : > { %6725 = vst.msk [vmem:[%s10124_s16 + $0x88] sm:$0xff] %vm2897_vm3, %v7329_v40  ;;  %v6409_v29 = vpop.f32.mrb[27].mxu0 }
 0x61c   : > { %v7380_v9 = vpop.f32.mrb[22].mxu1  ;;  %6724 = vst.msk [vmem:[%s10124_s16 + $0x80] sm:$0xff] %vm2897_vm3, %v6409_v29 }
 0x61d   : > { %6759 = vst.msk [vmem:[%s10124_s16 + $0x198] sm:$0xff] %vm2897_vm3, %v7380_v9  ;;  %v6579_v63 = vpop.f32.mrb[23].mxu1 }
 0x61e   : > { %6758 = vst.msk [vmem:[%s10124_s16 + $0x190] sm:$0xff] %vm2897_vm3, %v6579_v63 }
 0x620   : > { %v7383_v12 = vpop.f32.mrb[24].mxu1 }
 0x621   : > { %6761 = vst.msk [vmem:[%s10124_s16 + $0x1a8] sm:$0xff] %vm2897_vm3, %v7383_v12  ;;  %v6589_v14 = vpop.f32.mrb[25].mxu1 }
 0x622   : > { %6760 = vst.msk [vmem:[%s10124_s16 + $0x1a0] sm:$0xff] %vm2897_vm3, %v6589_v14 }
 0x629   : > { %v7386_v11 = vpop.f32.mrb[26].mxu1 }
 0x62a   : > { %6763 = vst.msk [vmem:[%s10124_s16 + $0x1b8] sm:$0xff] %vm2897_vm3, %v7386_v11  ;;  %v6599_v39 = vpop.f32.mrb[27].mxu1 }
 0x62b   : > { %6762 = vst.msk [vmem:[%s10124_s16 + $0x1b0] sm:$0xff] %vm2897_vm3, %v6599_v39 }
 0x632   : > { %v7389_v24 = vpop.f32.mrb[28].mxu1 }
 0x633   : > { %6765 = vst.msk [vmem:[%s10124_s16 + $0x1c8] sm:$0xff] %vm2897_vm3, %v7389_v24  ;;  %v6609_v21 = vpop.f32.mrb[29].mxu1 }
 0x634   : > { %6764 = vst.msk [vmem:[%s10124_s16 + $0x1c0] sm:$0xff] %vm2897_vm3, %v6609_v21 }
 0x63d   : > { %v7332_v44 = vpop.f32.mrb[28].mxu0  ;;  %v7392_v59 = vpop.f32.mrb[30].mxu1 }
 0x63e   : > { %6727 = vst.msk [vmem:[%s10124_s16 + $0x98] sm:$0xff] %vm2897_vm3, %v7332_v44  ;;  %6767 = vst.msk [vmem:[%s10124_s16 + $0x1d8] sm:$0xff] %vm2897_vm3, %v7392_v59  ;;  %v6419_v18 = vpop.f32.mrb[29].mxu0  ;;  %v6619_v48 = vpop.f32.mrb[31].mxu1 }
 0x63f   : > { %6726 = vst.msk [vmem:[%s10124_s16 + $0x90] sm:$0xff] %vm2897_vm3, %v6419_v18  ;;  %6766 = vst.msk [vmem:[%s10124_s16 + $0x1d0] sm:$0xff] %vm2897_vm3, %v6619_v48 }
 0x641   : > { %v7335_v61 = vpop.f32.mrb[30].mxu0  ;;  %v7395_v13 = vpop.f32.mrb[32].mxu1 }
 0x642   : > { %6729 = vst.msk [vmem:[%s10124_s16 + $0xa8] sm:$0xff] %vm2897_vm3, %v7335_v61  ;;  %6769 = vst.msk [vmem:[%s10124_s16 + $0x1e8] sm:$0xff] %vm2897_vm3, %v7395_v13  ;;  %v6429_v16 = vpop.f32.mrb[31].mxu0  ;;  %v6629_v27 = vpop.f32.mrb[33].mxu1 }
 0x643   : > { %6728 = vst.msk [vmem:[%s10124_s16 + $0xa0] sm:$0xff] %vm2897_vm3, %v6429_v16  ;;  %6768 = vst.msk [vmem:[%s10124_s16 + $0x1e0] sm:$0xff] %vm2897_vm3, %v6629_v27 }
 0x645   : > { %v7338_v32 = vpop.f32.mrb[32].mxu0  ;;  %v7398_v60 = vpop.f32.mrb[34].mxu1 }
 0x646   : > { %6731 = vst.msk [vmem:[%s10124_s16 + $0xb8] sm:$0xff] %vm2897_vm3, %v7338_v32  ;;  %6771 = vst.msk [vmem:[%s10124_s16 + $0x1f8] sm:$0xff] %vm2897_vm3, %v7398_v60  ;;  %v6439_v55 = vpop.f32.mrb[33].mxu0  ;;  %v6639_v20 = vpop.f32.mrb[35].mxu1 }
 0x647   : > { %6730 = vst.msk [vmem:[%s10124_s16 + $0xb0] sm:$0xff] %vm2897_vm3, %v6439_v55  ;;  %6770 = vst.msk [vmem:[%s10124_s16 + $0x1f0] sm:$0xff] %vm2897_vm3, %v6639_v20 }
 0x649   : > { %v7341_v45 = vpop.f32.mrb[34].mxu0  ;;  %v7401_v25 = vpop.f32.mrb[36].mxu1 }
 0x64a   : > { %6733 = vst.msk [vmem:[%s10124_s16 + $0xc8] sm:$0xff] %vm2897_vm3, %v7341_v45  ;;  %6773 = vst.msk [vmem:[%s10124_s16 + $0x208] sm:$0xff] %vm2897_vm3, %v7401_v25  ;;  %v6449_v51 = vpop.f32.mrb[35].mxu0  ;;  %v6649_v52 = vpop.f32.mrb[37].mxu1 }
 0x64b   : > { %6732 = vst.msk [vmem:[%s10124_s16 + $0xc0] sm:$0xff] %vm2897_vm3, %v6449_v51  ;;  %6772 = vst.msk [vmem:[%s10124_s16 + $0x200] sm:$0xff] %vm2897_vm3, %v6649_v52 }
 0x64d   : > { %v7344_v49 = vpop.f32.mrb[36].mxu0  ;;  %v7404_v47 = vpop.f32.mrb[38].mxu1 }
 0x64e   : > { %6735 = vst.msk [vmem:[%s10124_s16 + $0xd8] sm:$0xff] %vm2897_vm3, %v7344_v49  ;;  %6775 = vst.msk [vmem:[%s10124_s16 + $0x218] sm:$0xff] %vm2897_vm3, %v7404_v47  ;;  %v6459_v41 = vpop.f32.mrb[37].mxu0  ;;  %v6659_v10 = vpop.f32.mrb[39].mxu1 }
 0x64f   : > { %6734 = vst.msk [vmem:[%s10124_s16 + $0xd0] sm:$0xff] %vm2897_vm3, %v6459_v41  ;;  %6774 = vst.msk [vmem:[%s10124_s16 + $0x210] sm:$0xff] %vm2897_vm3, %v6659_v10 }
 0x651   : > { %v7347_v26 = vpop.f32.mrb[38].mxu0  ;;  %v7407_v53 = vpop.f32.mrb[40].mxu1 }
 0x652   : > { %6737 = vst.msk [vmem:[%s10124_s16 + $0xe8] sm:$0xff] %vm2897_vm3, %v7347_v26  ;;  %6777 = vst.msk [vmem:[%s10124_s16 + $0x228] sm:$0xff] %vm2897_vm3, %v7407_v53  ;;  %v6469_v50 = vpop.f32.mrb[39].mxu0  ;;  %v6669_v46 = vpop.f32.mrb[41].mxu1 }
 0x653   : > { %6736 = vst.msk [vmem:[%s10124_s16 + $0xe0] sm:$0xff] %vm2897_vm3, %v6469_v50  ;;  %6776 = vst.msk [vmem:[%s10124_s16 + $0x220] sm:$0xff] %vm2897_vm3, %v6669_v46 }
 0x655   : > { %v7350_v35 = vpop.f32.mrb[40].mxu0  ;;  %v7410_v4 = vpop.f32.mrb[42].mxu1 }
 0x656   : > { %6739 = vst.msk [vmem:[%s10124_s16 + $0xf8] sm:$0xff] %vm2897_vm3, %v7350_v35  ;;  %6779 = vst.msk [vmem:[%s10124_s16 + $0x238] sm:$0xff] %vm2897_vm3, %v7410_v4  ;;  %v6479_v54 = vpop.f32.mrb[41].mxu0  ;;  %v6679_v22 = vpop.f32.mrb[43].mxu1 }
 0x657   : > { %6738 = vst.msk [vmem:[%s10124_s16 + $0xf0] sm:$0xff] %vm2897_vm3, %v6479_v54  ;;  %6778 = vst.msk [vmem:[%s10124_s16 + $0x230] sm:$0xff] %vm2897_vm3, %v6679_v22 }
 0x659   : > { %v7353_v43 = vpop.f32.mrb[42].mxu0  ;;  %v7413_v56 = vpop.f32.mrb[44].mxu1 }
 0x65a   : > { %6741 = vst.msk [vmem:[%s10124_s16 + $0x108] sm:$0xff] %vm2897_vm3, %v7353_v43  ;;  %6781 = vst.msk [vmem:[%s10124_s16 + $0x248] sm:$0xff] %vm2897_vm3, %v7413_v56  ;;  %v6489_v34 = vpop.f32.mrb[43].mxu0  ;;  %v6689_v37 = vpop.f32.mrb[45].mxu1 }
 0x65b   : > { %6740 = vst.msk [vmem:[%s10124_s16 + $0x100] sm:$0xff] %vm2897_vm3, %v6489_v34  ;;  %6780 = vst.msk [vmem:[%s10124_s16 + $0x240] sm:$0xff] %vm2897_vm3, %v6689_v37 }
 0x65d   : > { %v7356_v8 = vpop.f32.mrb[44].mxu0  ;;  %v7416_v33 = vpop.f32.mrb[46].mxu1 }
 0x65e   : > { %6743 = vst.msk [vmem:[%s10124_s16 + $0x118] sm:$0xff] %vm2897_vm3, %v7356_v8  ;;  %6783 = vst.msk [vmem:[%s10124_s16 + $0x258] sm:$0xff] %vm2897_vm3, %v7416_v33  ;;  %v6499_v2 = vpop.f32.mrb[45].mxu0  ;;  %v6699_v57 = vpop.f32.mrb[47].mxu1 }
 0x65f   : > { %6742 = vst.msk [vmem:[%s10124_s16 + $0x110] sm:$0xff] %vm2897_vm3, %v6499_v2  ;;  %6782 = vst.msk [vmem:[%s10124_s16 + $0x250] sm:$0xff] %vm2897_vm3, %v6699_v57 }
 0x660   : > { %s10482_s23 = sld [smem:[#allocation17_spill]]  ;;  %s10483_s27 = sld [smem:[#allocation19_spill]] }
 0x661   : > { %s6817_s21 = sshll.u32 %s10124_s16, 4  ;;  %s7874_s8 = smov 512   ;;  %s6818_s21 = int_to_ptr.vmem [resolvable:$true] %s6817_s21 }
 0x662   : > { %s10485_s24 = sld [smem:[#allocation46_spill]]  ;;  %s7875_s9 = smov 1024  }
 0x663   : > { %s7876_s19 = smov 4   ;;  %s7877_s18 = smov 128  }
 0x664   : > { %s7879_s15 = smov [#allocation10]   ;;  %s7880_s16 = smov 0  }
 0x666   : > { %s7440_s14 = smul.u32 152, %s10482_s23  ;;  %p10484_p3 = scmp.ne.s32.totalorder %s10483_s27, 0 }
 0x668   : > { %s6798_s25 = sadd.s32 %s7440_s14, %s8871_s3  ;;  %7451 = sst [smem:[#allocation11]] (%p10484_p3), %s7874_s8 }
 0x669   : > { %s7201_s7 = sshll.u32 %s6798_s25, 7  ;;  %7452 = sst [smem:[#allocation11 + $0x1]] (%p10484_p3), %s7875_s9 }
 0x66a   : > { %s6800_s20 = scalar_lea.hbm %s10485_s24, %s7201_s7  ;;  %7453 = sst [smem:[#allocation11 + $0x2]] (%p10484_p3), %s7876_s19 }
 0x66b   : > { %7454 = sst [smem:[#allocation11 + $0x3]] (%p10484_p3), %s7877_s18  ;;  %s7878_s3 = smov 8  }
 0x66c   : > { %7455 = sst [smem:[#allocation11 + $0x4]] (%p10484_p3), %s7877_s18 }
 0x66d   : > { %7456 = sst [smem:[#allocation11 + $0x5]] (%p10484_p3), %s7878_s3 }
 0x66e   : > { %7457 = dma.general (%p10484_p3), %s6818_s21, 9728, %s6800_s20, %s6785_s13, %s7879_s15, [#allocation11], %s7880_s16, 0  }
 0x66f PF: > { %s10486_s23 = sld [smem:[#allocation15_spill]]  ;;  %s10487_s14 = sld [smem:[#allocation20_spill]] }
 0x670   : > { %p7479_p7 = scmp.ge.s32.totalorder %s7856_s11, 2 }
 0x675   : > { %s6845_s25 = sand.u32 1, %s10486_s23   ;;  %p10488_p13 = scmp.ne.s32.totalorder %s10487_s14, 0 }
 0x676   : > { %s6846_s8 = scalar_lea.sflag [#allocation5], %s6845_s25 }
 0x677   : > { %p7471_p9 = pnand %p7479_p7, %p10488_p13 }
 0x679   : > { %7811 = dma.done.wait (!%p7471_p9), %s6846_s8, 9728  }
 0x67a   : > { %7813 = vsyncadd (!%p7471_p9), %s6846_s8, 4294957568  ;;  %s24_s11 = sadd.s32 1, %s7856_s11   ;;  %s10489_s24 = sld [smem:[#allocation16_spill]] }
 0x67b   : > { %p21_p11 = scmp.ge.s32.totalorder %s24_s11, 6   ;;  %s10490_s30 = sld [smem:[#allocation18_spill]] }
 0x67c   : > { %s10491_s9 = sld [smem:[#allocation21_spill]]  ;;  %s10492_s25 = smov %s7824_s26 }
 0x67d   : > { %s10493_s26 = smov %s8102_s6  ;;  %s10494_s27 = smov %s7832_s28 }
 0x67e   : > { %s10495_s28 = smov %s7836_s29  ;;  %s10496_s29 = smov %s8097_s12 }
 0x67f   : > { %s10497_s8 = smov %s7852_s10  ;;  %s10498_s10 = smov %s10504_s22 }
 0x680   :  { %23 = sbr.rel (!%p21_p11) target bundleno = 14 (0xe), region = 113 }
 0x687   :  { %6851 = vsyncpa [#allocation4], 1 }
 0x688   :  { %6853 = vsyncpa [#allocation4 + $0x1], 1 }
 0x689   :  { %6854 = vsyncpa [#allocation7], 1 }
 0x68a   :  { %6855 = vsyncpa [#allocation5], 1 }
 0x68b   :  { %6857 = vsyncpa [#allocation5 + $0x1], 1 }

// kernel: tpu_custom_call.1
= control target key start
LH: loop header
LB: loop body
LE: loop exit
PB: predicated region body
PF: predicated region fallthrough
CT: control target
= control target key end

     0   :  { %s807_s18 = smov 0   ;;  %s809_s19 = smov 0   ;;  %s952_s0 = inlined_call_operand.vmem [shape: bf16[2,32,256], index: 0, kind: input, shape index: {}]   ;;  %s953_s1 = inlined_call_operand.vmem [shape: f32[32,1], index: 1, kind: input, shape index: {}]   ;;  %s954_s2 = inlined_call_operand.vmem [shape: f32[32,1], index: 2, kind: input, shape index: {}]   ;;  %s955_s3 = inlined_call_operand.vmem [shape: f32[19,32], index: 3, kind: input, shape index: {}]   ;;  %s956_s4 = inlined_call_operand.vmem [shape: f32[19,1], index: 4, kind: input, shape index: {}]   ;;  %s957_s5 = inlined_call_operand.vmem [shape: f32[2,19,256], index: 5, kind: output, shape index: {}]  }
   0x1   :  { %s811_s20 = smov 0   ;;  %s813_s21 = smov 0  }
   0x2   :  { %s815_s22 = smov 0   ;;  %s817_s23 = smov 0  }
   0x3   :  { %s819_s24 = smov 0  }
   0x4 LB: > { %s24_s25 = sadd.s32 1, %s763_s22  ;;  %s27_s26 = sadd.s32 1, %s767_s23  ;;  %s771_s24 = sphi %s819_s24, %s15_s24   ;;  %s767_s23 = sphi %s817_s23, %s964_s23   ;;  %s763_s22 = sphi %s815_s22, %s963_s22   ;;  %s759_s21 = sphi %s813_s21, %s962_s21   ;;  %s755_s20 = sphi %s811_s20, %s961_s20   ;;  %s751_s19 = sphi %s809_s19, %s960_s19   ;;  %s747_s18 = sphi %s807_s18, %s959_s18  }
   0x5   : > { %p25_p0 = scmp.ge.s32.totalorder %s24_s25, 2  ;;  %s595_s27 = sadd.s32 4294967295, %s771_s24  }
   0x6   : > { %p43_p1 = scmp.ne.s32.totalorder %s751_s19, %s747_s18  ;;  %p44_p2 = scmp.eq.s32.totalorder %s771_s24, 0 }
   0x7   : > { %s966_s25 = smov (%p25_p0, %s24_s25), 0  ;;  %s968_s26 = smov (!%p25_p0, %s27_s26), %s767_s23 }
   0x8   : > { %p29_p3 = scmp.ge.s32.totalorder %s968_s26, 2  ;;  %p159_p4 = scmp.eq.s32.totalorder %s595_s27, 3 }
   0x9   : > { %s32_s28 = ssub.s32 %s763_s22, %s966_s25  ;;  %p45_p5 = por %p44_p2, %p43_p1 }
   0xa   : > { %s970_s26 = smov (%p29_p3, %s968_s26), 0  ;;  %p855_p6 = por %p159_p4, %p43_p1 }
   0xb   : > { %s31_s30 = ssub.s32 %s767_s23, %s970_s26  ;;  %s36_s7 = sadd.s32 1, %s751_s19 }
   0xc   : > { %s33_s6 = sor.u32 %s32_s28, %s31_s30  ;;  %p598_p8 = scmp.ge.s32.totalorder %s771_s24, 4 }
   0xd   : > { %p34_p7 = scmp.eq.s32.totalorder %s33_s6, 0 }
   0xe   : > { %193 = sbr.rel (%p598_p8) target bundleno = 29 (0x1d), region = 32 }
   0xf   : > { %s863_s8 = scalar_select %p34_p7, %s751_s19, %s36_s7  }
  0x15   : > { %196 = sbr.rel (!%p45_p5) target bundleno = 29 (0x1d), region = 36  ;;  %s198_s9 = sand.u32 (%p45_p5), 1, %s751_s19  }
  0x16   : > { %s600_s10 = sshll.u32 (%p45_p5), %s767_s23, 3  ;;  %s599_s11 = sshll.u32 (%p45_p5), %s198_s9, 4 }
  0x17   : > { %s202_s12 = sadd.s32 (%p45_p5), %s763_s22, %s600_s10  ;;  %s200_s17 = scalar_lea.vmem (%p45_p5), [#allocation2], %s599_s11 }
  0x18   : > { %s601_s13 = sshll.u32 (%p45_p5), %s202_s12, 2 }
  0x19   : > { %s204_s16 = scalar_lea.vmem (%p45_p5), %s952_s0, %s601_s13 }
  0x1a   : > { %v220_v0 = vld [vmem:[%s204_s16] sm:$0xf] (%p45_p5)  ;;  %v222_v1 = vld [vmem:[%s204_s16 + $0x8] sm:$0xf] (%p45_p5)  ;;  %v224_v2 = vld [vmem:[%s204_s16 + $0x10] sm:$0xf] (%p45_p5) }
  0x1b   : > { %221 = vst [vmem:[%s200_s17] sm:$0xf] (%p45_p5), %v220_v0  ;;  %223 = vst [vmem:[%s200_s17 + $0x4] sm:$0xf] (%p45_p5), %v222_v1  ;;  %v226_v3 = vld [vmem:[%s204_s16 + $0x18] sm:$0xf] (%p45_p5) }
  0x1c   : > { %225 = vst [vmem:[%s200_s17 + $0x8] sm:$0xf] %v224_v2  ;;  %227 = vst [vmem:[%s200_s17 + $0xc] sm:$0xf] %v226_v3 }
  0x1d PF: > { %p602_p9 = scmp.ge.s32.totalorder %s771_s24, 1  ;;  %p257_p10 = scmp.lt.s32.totalorder %s771_s24, 5 }
  0x1f   : > { %p258_p11 = pnand %p602_p9, %p257_p10 }
  0x20   : > { %v326_v4 = vld [vmem:[%s954_s2] sm:$0xff] (!%p258_p11)  ;;  %v773_v6 = vmov (!%p258_p11), 0   ;;  %v327_v7 = vld [vmem:[%s954_s2 + $0x8] sm:$0xff] (!%p258_p11)  ;;  %v301_v9 = vld [vmem:[%s953_s1 + $0x18] sm:$0xff] (!%p258_p11)  ;;  %v774_v13 = vmov (!%p258_p11), 0.0|0.0   ;;  %vm775_vm0 = vmmov (!%p258_p11), 0  }
  0x21   : > { %261 = sbr.rel (%p258_p11) target bundleno = 410 (0x19a), region = 77  ;;  %v298_v5 = vld [vmem:[%s953_s1] sm:$0xff] (!%p258_p11)  ;;  %716 = vset.pattern.permute.xlu1 (!%p258_p11), %v773_v6  ;;  %715 = vset.pattern.permute.xlu0 (!%p258_p11), %v773_v6  ;;  %v299_v8 = vld [vmem:[%s953_s1 + $0x8] sm:$0xff] (!%p258_p11)  ;;  %v300_v10 = vld [vmem:[%s953_s1 + $0x10] sm:$0xff] (!%p258_p11)  ;;  %v776_v17 = vmov (!%p258_p11), 0.0   ;;  %s264_s12 = sand.u32 (!%p258_p11), 1, %s747_s18  }
  0x22   : > { %332 = vperm.xlu1 (!%p258_p11), %716, %v326_v4   ;;  %304 = vperm.xlu0 (!%p258_p11), %715, %v298_v5   ;;  %v329_v11 = vld [vmem:[%s954_s2 + $0x18] sm:$0xff] (!%p258_p11)  ;;  %v328_v12 = vld [vmem:[%s954_s2 + $0x10] sm:$0xff] (!%p258_p11)  ;;  %v362_v14 = vld [vmem:[%s956_s4 + $0x8] sm:$0xff] (!%p258_p11)  ;;  %s603_s13 = sshll.u32 (!%p258_p11), %s264_s12, 4  ;;  %vm379_vm1 = vcmask (!%p258_p11), 261120   ;;  %s653_s6 = smul.u32 (!%p258_p11), 24, %s264_s12 }
  0x23   : > { %643 = vmatprep.subr.bf16.mxu0 (!%p258_p11), %v774_v13  ;;  %649 = vmatprep.subr.bf16.mxu1 (!%p258_p11), %v774_v13  ;;  %v361_v15 = vld [vmem:[%s956_s4] sm:$0xff] (!%p258_p11)  ;;  %v363_v16 = vld [vmem:[%s956_s4 + $0x10] sm:$0x7] (!%p258_p11)  ;;  %s266_s14 = scalar_lea.vmem (!%p258_p11), [#allocation2], %s603_s13  ;;  %v359_v47 = vld [vmem:[%s955_s3 + $0x8] sm:$0xff] (!%p258_p11) }
  0x24   : > { %634 = vmatprep.mubr.msk.f32.mxu0 (!%p258_p11), %vm775_vm0, %v776_v17  ;;  %637 = vmatprep.mubr.msk.f32.mxu1 (!%p258_p11), %vm775_vm0, %v776_v17  ;;  %v611_v18 = vld [vmem:[%s266_s14] sm:$0xff] (!%p258_p11)   ;;  %v618_v26 = vld [vmem:[%s266_s14 + $0x8] sm:$0xff] (!%p258_p11)   ;;  %s289_s7 = scalar_lea.vmem (!%p258_p11), [#allocation3], %s653_s6 }
  0x25   : > { %v612_v19 = vunpack.c.l.bf16 (!%p258_p11), %v611_v18  ;;  %v613_v23 = vunpack.c.h.bf16 (!%p258_p11), %v611_v18  ;;  %v617_v30 = vunpack.c.h.bf16 (!%p258_p11), %v618_v26  ;;  %v616_v31 = vunpack.c.l.bf16 (!%p258_p11), %v618_v26  ;;  %v358_v46 = vld [vmem:[%s955_s3] sm:$0xff] (!%p258_p11)  ;;  %v360_v48 = vld [vmem:[%s955_s3 + $0x10] sm:$0x7] (!%p258_p11) }
  0x26   : > { %337 = vperm.xlu1 (!%p258_p11), %716, %v327_v7   ;;  %309 = vperm.xlu0 (!%p258_p11), %715, %v299_v8  }
  0x28   : > { %s654_s18 = smul.u32 (%p855_p6), 6, %s759_s21 }
  0x2a   : > { %319 = vperm.xlu1 %716, %v301_v9   ;;  %314 = vperm.xlu0 %715, %v300_v10   ;;  %s480_s9 = sadd.s32 (%p855_p6), %s755_s20, %s654_s18 }
  0x2b   : > { %s607_s10 = sshll.u32 (%p855_p6), %s480_s9, 3 }
  0x2c   : > { %s482_s13 = scalar_lea.vmem (%p855_p6), %s957_s5, %s607_s10 }
  0x2e   : > { %347 = vperm.xlu1 %716, %v329_v11   ;;  %342 = vperm.xlu0 %715, %v328_v12  }
  0x32   : > { %371 = vperm.xlu1 %716, %v362_v14   ;;  %366 = vperm.xlu0 %715, %v361_v15  }
  0x36   : > { %376 = vperm.xlu0 %715, %v363_v16  }
  0xa1   : > { %v333_v20 = vpop.permute.xlu1 %332  ;;  %v305_v21 = vpop.permute.xlu0 %304 }
  0xa2   : > { %v322_v22 = vmul.f32 %v612_v19, %v305_v21 }
  0xa4   : > { %v350_v27 = vadd.f32 %v333_v20, %v322_v22 }
  0xa5   : > { %v338_v24 = vpop.permute.xlu1 %337  ;;  %v310_v25 = vpop.permute.xlu0 %309 }
  0xa6   : > { %v323_v28 = vmul.f32 %v613_v23, %v310_v25  ;;  %v354_v34 = vmax.f32 %v350_v27, 0.0 }
  0xa8   : > { %v351_v29 = vadd.f32 %v338_v24, %v323_v28 }
  0xa9   : > { %v320_v32 = vpop.permute.xlu1 %319  ;;  %v315_v33 = vpop.permute.xlu0 %314 }
  0xaa   : > { %v355_v35 = vmax.f32 %v351_v29, 0.0  ;;  %v325_v36 = vmul.f32 %v617_v30, %v320_v32  ;;  %v324_v37 = vmul.f32 %v616_v31, %v315_v33 }
  0xac   : > { %v644_v38 = vpack.c.bf16 %v355_v35, %v354_v34 }
  0xad   : > { %v348_v39 = vpop.permute.xlu1 %347  ;;  %v343_v40 = vpop.permute.xlu0 %342 }
  0xae   : > { %v353_v41 = vadd.f32 %v348_v39, %v325_v36  ;;  %v352_v42 = vadd.f32 %v343_v40, %v324_v37  ;;  %645 = vmatpush3.bf16.msra.mxu0 %v644_v38  ;;  %651 = vmatpush3.bf16.msra.mxu1 %v644_v38 }
  0xaf   : > { %646 = vmatprep.subr.bf16.mxu0 %v774_v13  ;;  %650 = vmatprep.subr.bf16.mxu1 %v774_v13 }
  0xb0   : > { %v357_v43 = vmax.f32 %v353_v41, 0.0  ;;  %v356_v44 = vmax.f32 %v352_v42, 0.0 }
  0xb1   : > { %v367_v49 = vpop.permute.xlu0 %366  ;;  %v372_v50 = vpop.permute.xlu1 %371 }
  0xb2   : > { %v647_v45 = vpack.c.bf16 %v357_v43, %v356_v44 }
  0xb4   : > { %648 = vmatpush3.bf16.msra.mxu0 %v647_v45  ;;  %652 = vmatpush3.bf16.msra.mxu1 %v647_v45 }
  0xb5   : > { %v377_v57 = vpop.permute.xlu0 %376 }
  0xb7   : > { %635 = vmatmul.mubr.msk.f32.vlgmr.msra.gmra.mrb[0].mxu0 %vm379_vm1, %v358_v46  ;;  %638 = vmatmul.mubr.msk.f32.vlgmr.msra.gmra.mrb[0].mxu1 %vm379_vm1, %v359_v47 }
  0xb8   : > { %640 = vmatprep.mubr.msk.f32.mxu1 %vm775_vm0, %v776_v17 }
  0xbb   : > { %641 = vmatmul.mubr.msk.f32.gmra.mrb[2].mxu1 %vm379_vm1, %v360_v48 }
 0x18a   : > { %v455_v51 = vpop.f32.mrb[0].mxu0  ;;  %v460_v52 = vpop.f32.mrb[0].mxu1 }
 0x18b   : > { %v456_v53 = vadd.f32 %v455_v51, %v367_v49  ;;  %v461_v54 = vadd.f32 %v460_v52, %v372_v50  ;;  %v639_v55 = vpop.f32.mrb[1].mxu1  ;;  %v636_v56 = vpop.f32.mrb[1].mxu0  ;;  %478 = sbr.rel (!%p855_p6) target bundleno = 410 (0x19a), region = 85 }
 0x18d   : > { %469 = vst [vmem:[%s289_s7] sm:$0xff] %v456_v53  ;;  %470 = vst [vmem:[%s289_s7 + $0x8] sm:$0xff] %v461_v54 }
 0x18e   : > { %v465_v58 = vpop.f32.mrb[2].mxu1 }
 0x18f   : > { %v466_v59 = vadd.f32 %v465_v58, %v377_v57  ;;  %v642_v60 = vpop.f32.mrb[3].mxu1 }
 0x191   : > { %471 = vst [vmem:[%s289_s7 + $0x10] sm:$0x7] %v466_v59 }
 0x194   : > { %v514_v61 = vld [vmem:[%s289_s7] sm:$0xff]  ;;  %v516_v62 = vld [vmem:[%s289_s7 + $0x8] sm:$0xff] }
 0x195   : > { %515 = vst [vmem:[%s482_s13] sm:$0xff] %v514_v61  ;;  %517 = vst [vmem:[%s482_s13 + $0x10] sm:$0xff] %v516_v62 }
 0x198   : > { %v518_v63 = vld [vmem:[%s289_s7 + $0x10] sm:$0xff] }
 0x199   : > { %519 = vst [vmem:[%s482_s13 + $0x20] sm:$0xff] %v518_v63 }
 0x19a PF: > { %s15_s24 = sadd.s32 1, %s771_s24   ;;  %s959_s18 = smov %s751_s19 }
 0x19b   : > { %p12_p12 = scmp.ge.s32.totalorder %s15_s24, 6   ;;  %s960_s19 = smov %s863_s8 }
 0x19c   : > { %s961_s20 = smov %s763_s22  ;;  %s962_s21 = smov %s767_s23 }
 0x19d   : > { %s963_s22 = smov %s966_s25  ;;  %s964_s23 = smov %s970_s26 }
 0x19e   :  { %14 = sbr.rel (!%p12_p12) target bundleno = 4 (0x4), region = 154 }

</bundles_post_ra>
